<compile_context>
chip_gen: v7x
topology: tpu7x:2x2x1
jax: 0.10.0
libtpu: 0.0.40
codegen_flags: <defaults>
</compile_context>

<pallas_src>
import functools

import jax
import jax.numpy as jnp
import numpy as np
from jax import lax
from jax.experimental import pallas as pl
from jax.experimental.pallas import tpu as pltpu


def _round_up(a, b):
    return (a + b - 1) // b * b


# ----------------------------------------------------------------------------
# Pallas kernel (B_TILE batch elements per grid step)
# ----------------------------------------------------------------------------
def _upsingle_kernel(x_ref, w1_ref, w2_ref, params_ref, gsel_ref, mask_ref,
                     out_ref, col1_ref, ybuf_ref, col2_ref, *,
                     H, W, Cin, Cout, B_TILE, Ncs, base, yseg, eps):
    Wp = W + 2                      # width-padded coarse row length
    Nc = H * Wp                     # flat coarse grid (with junk pad columns)
    NP = 4 * Cout                   # (phase, channel) rows

    bt = params_ref[:, 0:1]         # (NP, 1) stage-1 bias
    gamma = params_ref[:, 1:2]
    beta = params_ref[:, 2:3]
    b2 = params_ref[:, 3:4]         # stage-2 bias
    m = mask_ref[...]               # (1, Ncs): 1 on valid coarse pixels
    gsel = gsel_ref[...]            # (NP, NP) group-selection / (1/count)

    # ---- stage 1: ConvTranspose2d(4, s=2, p=1) via polyphase decomposition.
    # im2col of the 3x3 padded-input neighbourhood; every tap is a contiguous
    # flat-offset slice (lane shift only), per batch element a 128-aligned,
    # full-width destination segment.
    for b in range(B_TILE):
        for s in range(3):
            for t in range(3):
                tap = 3 * s + t
                off = s * Wp + t
                col1_ref[tap * Cin:(tap + 1) * Cin,
                         b * Ncs:(b + 1) * Ncs] = x_ref[b, :, off:off + Ncs]
    a1 = jnp.dot(w1_ref[...], col1_ref[...],
                 preferred_element_type=jnp.float32)        # (NP, B_TILE*Ncs)
    a1 = a1 + bt

    # ---- per-element GroupNorm (two-pass / centered variance, lane-reduced
    # BEFORE the tiny group-selection matvec) + ELU; the phase-separated
    # result is parked in a zero-ringed, 128-aligned segment of ybuf.
    zeros_halo = jnp.zeros((NP, base), ybuf_ref.dtype)
    for b in range(B_TILE):
        seg = b * yseg
        a1b = a1[:, b * Ncs:(b + 1) * Ncs]                  # aligned slice
        rs = jnp.sum(a1b * m, axis=1, keepdims=True)        # (NP, 1)
        mean = jnp.dot(gsel, rs, preferred_element_type=jnp.float32)
        xc = (a1b - mean) * m
        rs2 = jnp.sum(xc * xc, axis=1, keepdims=True)       # (NP, 1)
        var = jnp.dot(gsel, rs2, preferred_element_type=jnp.float32)
        y = xc * (lax.rsqrt(var + eps) * gamma) + beta
        # ELU(alpha=1); the trailing *m re-zeroes pad columns + segment tail
        # so they double as the 3x3 conv's zero padding.  (exp-1 kept instead
        # of expm1 for lowering safety.)
        y = jnp.where(y > 0.0, y, jnp.exp(jnp.minimum(y, 0.0)) - 1.0) * m
        # zero ring (top + bottom halo regions), then the aligned interior.
        ybuf_ref[:, seg:seg + base] = zeros_halo
        ybuf_ref[:, seg + base + Ncs:seg + 2 * base + Ncs] = zeros_halo
        ybuf_ref[:, seg + base:seg + base + Ncs] = y.astype(ybuf_ref.dtype)

    # ---- stage 2: Conv2d(3, s=1, p=1) on the fine grid, phase-separated in
    # and out: ONE matmul with K = 16*Cout; unused combos are zero in w2_ref.
    combos = ((0, 0), (0, 1), (1, -1), (1, 0))   # (input phase, coarse offset)
    for b in range(B_TILE):
        seg = b * yseg
        k = 0
        for p, da in combos:
            for q, db in combos:
                ph = 2 * p + q
                off = seg + base + da * Wp + db
                col2_ref[k * Cout:(k + 1) * Cout, b * Ncs:(b + 1) * Ncs] = \
                    ybuf_ref[ph * Cout:(ph + 1) * Cout, off:off + Ncs]
                k += 1
    a2 = jnp.dot(w2_ref[...], col2_ref[...],
                 preferred_element_type=jnp.float32)        # (NP, B_TILE*Ncs)
    out_ref[0] = (a2 + b2).astype(out_ref.dtype)


# ----------------------------------------------------------------------------
# Parameter prep (plain JAX)
# ----------------------------------------------------------------------------
def spectral_normalize(w, dim, n_iter=50):
    # TODO(synk): PyTorch spectral_norm does 1 power iteration per forward from
    # a persisted random u; here sigma is computed to convergence from a
    # deterministic start (same normalization semantics, deterministic init).
    perm = (dim,) + tuple(i for i in range(w.ndim) if i != dim)
    wm = jnp.transpose(w, perm).reshape(w.shape[dim], -1)
    u = jnp.full((wm.shape[0],), 1.0 / np.sqrt(wm.shape[0]), jnp.float32)
    v = jnp.zeros((wm.shape[1],), jnp.float32)
    for _ in range(n_iter):
        v = wm.T @ u
        v = v / (jnp.linalg.norm(v) + 1e-12)
        u = wm @ v
        u = u / (jnp.linalg.norm(u) + 1e-12)
    sigma = u @ (wm @ v)
    return w / sigma


def _build_w1(wt_sn, Cin, Cout):
    """(Cin,Cout,4,4) -> (4*Cout, 9*Cin); row = (2*rh+rw)*Cout + co."""
    rows = []
    for rh in range(2):
        for rw in range(2):
            taps = []
            for s in range(3):
                for t in range(3):
                    if 0 <= s - rh <= 1 and 0 <= t - rw <= 1:
                        kh, kw = 3 - 2 * s + rh, 3 - 2 * t + rw
                        taps.append(wt_sn[:, :, kh, kw].T)        # (Cout, Cin)
                    else:
                        taps.append(jnp.zeros((Cout, Cin), jnp.float32))
            rows.append(jnp.concatenate(taps, axis=1))
    return jnp.concatenate(rows, axis=0)


_COMBOS = ((0, 0), (0, 1), (1, -1), (1, 0))       # (input phase, coarse offset)


def _build_w2(w2_sn, Cout):
    """(Cout,Cout,3,3) -> (4*Cout, 16*Cout); row = (2*P+Q)*Cout + co."""
    rows = []
    for P in range(2):
        for Q in range(2):
            blocks = []
            for p, da in _COMBOS:
                for q, db in _COMBOS:
                    dh, dw = 2 * da + p - P, 2 * db + q - Q
                    if abs(dh) <= 1 and abs(dw) <= 1:
                        blocks.append(w2_sn[:, :, dh + 1, dw + 1])
                    else:
                        blocks.append(jnp.zeros((Cout, Cout), jnp.float32))
            rows.append(jnp.concatenate(blocks, axis=1))
    return jnp.concatenate(rows, axis=0)


# ----------------------------------------------------------------------------
# Wrapper: NCHW in, NCHW out (PyTorch convention)
# ----------------------------------------------------------------------------
@jax.jit
def upsingle_forward(x_nchw, wt, bt, gamma, beta, w2, b2):
    N, Cin, H, W = x_nchw.shape
    Cout = wt.shape[1]
    assert Cout % 4 == 0
    Wp = W + 2
    Nc = H * Wp
    NP = 4 * Cout
    groups = Cout // 4
    group_size = Cout // groups

    # lane-aligned per-element geometry
    Ncs = _round_up(Nc, 128)                 # per-element lane segment
    base = _round_up(Wp + 1, 128)            # aligned ybuf interior offset
    yseg = 2 * base + Ncs                    # per-element ybuf segment length
    Lxp = 2 * Wp + 2 + Ncs                   # padded flat input length

    # batch tile: largest divisor of N (<=8) whose VMEM footprint is modest.
    def _scratch_bytes(btile):
        ltot = btile * Ncs
        return (_round_up(9 * Cin, 16) * ltot * 2
                + _round_up(NP, 16) * btile * yseg * 2
                + _round_up(16 * Cout, 16) * ltot * 2
                + 2 * _round_up(NP, 8) * ltot * 4
                + 2 * btile * _round_up(Cin, 16) * _round_up(Lxp, 128) * 2)

    B_TILE = 1
    for d in range(1, min(N, 8) + 1):
        if N % d == 0 and _scratch_bytes(d) <= 24 * (1 << 20):
            B_TILE = d
    NB = N // B_TILE
    Ltot = B_TILE * Ncs

    # spectral norm (dim=1 for ConvTranspose2d, dim=0 for Conv2d, as in torch)
    wt_sn = spectral_normalize(wt, dim=1)
    w2_sn = spectral_normalize(w2, dim=0)

    # bf16 MXU operands (accumulation happens in f32 inside the kernel)
    w1_all = _build_w1(wt_sn, Cin, Cout).astype(jnp.bfloat16)   # (NP, 9*Cin)
    w2_all = _build_w2(w2_sn, Cout).astype(jnp.bfloat16)        # (NP, 16*Cout)

    # padded + flattened input: channels on sublanes, spatial on lanes.
    xpad = jnp.pad(x_nchw.astype(jnp.float32), ((0, 0), (0, 0), (1, 1), (1, 1)))
    xflat = xpad.reshape(N, Cin, (H + 2) * Wp)
    xflat = jnp.pad(xflat, ((0, 0), (0, 0), (1, Lxp - (H + 2) * Wp - 1)))
    xflat = xflat.astype(jnp.bfloat16)                          # (N, Cin, Lxp)

    # merged per-row parameters: [bt, gamma, beta, b2]
    params = jnp.stack([jnp.tile(bt, 4), jnp.tile(gamma, 4),
                        jnp.tile(beta, 4), jnp.tile(b2, 4)],
                       axis=1).astype(jnp.float32)              # (NP, 4)

    cnt = float(group_size * 4 * H * W)       # = group_size * OH * OW
    gid = (jnp.arange(NP) % Cout) // group_size
    gsel = (gid[:, None] == gid[None, :]).astype(jnp.float32) / cnt  # (NP, NP)

    lane = jnp.arange(Ncs)
    mask = ((lane < Nc) & (lane % Wp >= 1) & (lane % Wp <= W))
    mask = mask.astype(jnp.float32).reshape(1, Ncs)

    kern = functools.partial(_upsingle_kernel, H=H, W=W, Cin=Cin, Cout=Cout,
                             B_TILE=B_TILE, Ncs=Ncs, base=base, yseg=yseg,
                             eps=1e-5)

    # explicit VMEM budget sized from the actual blocks + scratch.
    vmem_est = (_scratch_bytes(B_TILE)
                + 2 * (_round_up(NP, 16) * 128 * 2 * 2        # w1, w2 tiles
                       + _round_up(NP, 8) * 128 * 4 * 2       # params, gsel
                       + 8 * _round_up(Ncs, 128) * 4))        # mask
    vmem_limit = int(min(64 * (1 << 20), max(4 * vmem_est, 16 * (1 << 20))))

    def invariant(shape):
        return pl.BlockSpec(shape, lambda n: (0, 0))

    out_flat = pl.pallas_call(
        kern,
        out_shape=jax.ShapeDtypeStruct((NB, NP, Ltot), jnp.float32),
        grid_spec=pltpu.PrefetchScalarGridSpec(
            num_scalar_prefetch=0,
            grid=(NB,),
            in_specs=[
                pl.BlockSpec((B_TILE, Cin, Lxp), lambda n: (n, 0, 0)),
                invariant((NP, 9 * Cin)),
                invariant((NP, 16 * Cout)),
                invariant((NP, 4)),
                invariant((NP, NP)),
                invariant((1, Ncs)),
            ],
            out_specs=pl.BlockSpec((1, NP, Ltot), lambda n: (n, 0, 0)),
            scratch_shapes=[
                pltpu.VMEM((9 * Cin, Ltot), jnp.bfloat16),      # stage-1 im2col
                pltpu.VMEM((NP, B_TILE * yseg), jnp.bfloat16),  # padded interm.
                pltpu.VMEM((16 * Cout, Ltot), jnp.bfloat16),    # stage-2 im2col
            ],
        ),
        compiler_params=pltpu.CompilerParams(
            # batch tiles are independent -> v7x can split them over 2 TCs
            dimension_semantics=("parallel",),
            vmem_limit_bytes=vmem_limit),
    )(xflat, w1_all, w2_all, params, gsel, mask)

    # un-phase the lane-dense kernel output (pure XLA layout glue):
    # (NB, NP, B_TILE*Ncs) -> (N, NP, Ncs) -> slice -> NCHW fine grid.
    o = out_flat.reshape(NB, NP, B_TILE, Ncs)
    o = o.transpose(0, 2, 1, 3).reshape(N, NP, Ncs)[:, :, :Nc]
    o = o.reshape(N, 2, 2, Cout, H, Wp)[:, :, :, :, :, 1:W + 1]
    o = jnp.transpose(o, (0, 3, 4, 1, 5, 2)).reshape(N, Cout, 2 * H, 2 * W)
    return o


# ----------------------------------------------------------------------------
# Pure-JAX reference (mirrors the PyTorch forward; conv inputs/weights are
# rounded through bf16 to mirror the kernel's bf16 MXU operands -- bf16 x bf16
# products are exact in f32, so only summation order differs).
# ----------------------------------------------------------------------------
def ref_forward(x, wt_sn, bt, gamma, beta, w2_sn, b2, groups, eps=1e-5):
    rnd = lambda a: a.astype(jnp.bfloat16).astype(jnp.float32)
    w_conv = jnp.flip(rnd(wt_sn), axis=(2, 3)).transpose(1, 0, 2, 3)
    y = lax.conv_general_dilated(
        rnd(x), w_conv, window_strides=(1, 1), padding=((2, 2), (2, 2)),
        lhs_dilation=(2, 2), dimension_numbers=('NCHW', 'OIHW', 'NCHW'),
        precision=lax.Precision.HIGHEST)
    y = y + bt[None, :, None, None]
    N, C, Hh, Ww = y.shape
    yg = y.reshape(N, groups, C // groups, Hh, Ww)
    mean = yg.mean(axis=(2, 3, 4), keepdims=True)
    var = yg.var(axis=(2, 3, 4), keepdims=True)
    yg = (yg - mean) / jnp.sqrt(var + eps)
    y = yg.reshape(N, C, Hh, Ww) * gamma[None, :, None, None] + beta[None, :, None, None]
    y = jnp.where(y > 0.0, y, jnp.exp(jnp.minimum(y, 0.0)) - 1.0)
    y2 = lax.conv_general_dilated(
        rnd(y), rnd(w2_sn), window_strides=(1, 1), padding=((1, 1), (1, 1)),
        dimension_numbers=('NCHW', 'OIHW', 'NCHW'),
        precision=lax.Precision.HIGHEST)
    return y2 + b2[None, :, None, None]


if __name__ == "__main__":
    key = jax.random.PRNGKey(0)
    N, in_ch, out_ch, H, W = 2, 8, 8, 16, 16
    ks = jax.random.split(key, 7)
    x = jax.random.normal(ks[0], (N, in_ch, H, W), jnp.float32)
    wt = 0.1 * jax.random.normal(ks[1], (in_ch, out_ch, 4, 4), jnp.float32)
    bt = 0.1 * jax.random.normal(ks[2], (out_ch,), jnp.float32)
    gamma = 1.0 + 0.1 * jax.random.normal(ks[3], (out_ch,), jnp.float32)
    beta = 0.1 * jax.random.normal(ks[4], (out_ch,), jnp.float32)
    w2 = 0.1 * jax.random.normal(ks[5], (out_ch, out_ch, 3, 3), jnp.float32)
    b2 = 0.1 * jax.random.normal(ks[6], (out_ch,), jnp.float32)

    out = upsingle_forward(x, wt, bt, gamma, beta, w2, b2)
    out = jax.block_until_ready(out)

    ref = ref_forward(x, spectral_normalize(wt, dim=1), bt, gamma, beta,
                      spectral_normalize(w2, dim=0), b2, groups=out_ch // 4)
    np.testing.assert_allclose(np.asarray(out), np.asarray(ref),
                               rtol=2e-3, atol=2e-3)
    print("KERNEL_OK")
</pallas_src>

<mosaic_0001>
module attributes {stable_mosaic.version = 11 : i64} {
  func.func @_upsingle_kernel(%arg0: i32, %arg1: memref<2x8x422xbf16, #tpu.memory_space<vmem>>, %arg2: memref<32x72xbf16, #tpu.memory_space<vmem>>, %arg3: memref<32x128xbf16, #tpu.memory_space<vmem>>, %arg4: memref<32x4xf32, #tpu.memory_space<vmem>>, %arg5: memref<32x32xf32, #tpu.memory_space<vmem>>, %arg6: memref<1x384xf32, #tpu.memory_space<vmem>>, %arg7: memref<1x32x768xf32, #tpu.memory_space<vmem>>, %arg8: memref<72x768xbf16, #tpu.memory_space<vmem>>, %arg9: memref<32x1280xbf16, #tpu.memory_space<vmem>>, %arg10: memref<128x768xbf16, #tpu.memory_space<vmem>>) attributes {dimension_semantics = [#tpu.dimension_semantics<parallel>], iteration_bounds = array<i64: 1>, scalar_prefetch = 0 : i64, scratch_operands = 3 : i64, tpu.core_type = #tpu.core_type<tc>, window_params = [{transform_indices = @transform_0, window_bounds = array<i64: 2, 8, 422>}, {pipeline_mode = #tpu.pipeline_mode<synchronous>, transform_indices = @transform_1, window_bounds = array<i64: 32, 72>}, {pipeline_mode = #tpu.pipeline_mode<synchronous>, transform_indices = @transform_2, window_bounds = array<i64: 32, 128>}, {pipeline_mode = #tpu.pipeline_mode<synchronous>, transform_indices = @transform_3, window_bounds = array<i64: 32, 4>}, {pipeline_mode = #tpu.pipeline_mode<synchronous>, transform_indices = @transform_4, window_bounds = array<i64: 32, 32>}, {pipeline_mode = #tpu.pipeline_mode<synchronous>, transform_indices = @transform_5, window_bounds = array<i64: 1, 384>}, {transform_indices = @transform_6, window_bounds = array<i64: 1, 32, 768>}]} {
    %c0 = arith.constant 0 : index
    %c0_0 = arith.constant 0 : index
    %0 = vector.load %arg4[%c0, %c0_0] : memref<32x4xf32, #tpu.memory_space<vmem>>, vector<32x1xf32>
    %c0_1 = arith.constant 0 : index
    %c1 = arith.constant 1 : index
    %1 = vector.load %arg4[%c0_1, %c1] : memref<32x4xf32, #tpu.memory_space<vmem>>, vector<32x1xf32>
    %c0_2 = arith.constant 0 : index
    %c2 = arith.constant 2 : index
    %2 = vector.load %arg4[%c0_2, %c2] : memref<32x4xf32, #tpu.memory_space<vmem>>, vector<32x1xf32>
    %c0_3 = arith.constant 0 : index
    %c3 = arith.constant 3 : index
    %3 = vector.load %arg4[%c0_3, %c3] : memref<32x4xf32, #tpu.memory_space<vmem>>, vector<32x1xf32>
    %c0_4 = arith.constant 0 : index
    %c0_5 = arith.constant 0 : index
    %4 = vector.load %arg6[%c0_4, %c0_5] : memref<1x384xf32, #tpu.memory_space<vmem>>, vector<1x384xf32>
    %c0_6 = arith.constant 0 : index
    %c0_7 = arith.constant 0 : index
    %5 = vector.load %arg5[%c0_6, %c0_7] : memref<32x32xf32, #tpu.memory_space<vmem>>, vector<32x32xf32>
    %c0_8 = arith.constant 0 : index
    %c0_9 = arith.constant 0 : index
    %c0_10 = arith.constant 0 : index
    %6 = vector.load %arg1[%c0_8, %c0_9, %c0_10] : memref<2x8x422xbf16, #tpu.memory_space<vmem>>, vector<1x8x384xbf16>
    %7 = vector.shape_cast %6 : vector<1x8x384xbf16> to vector<8x384xbf16>
    %c0_11 = arith.constant 0 : index
    %c0_12 = arith.constant 0 : index
    %8 = vector.load %arg8[%c0_11, %c0_12] : memref<72x768xbf16, #tpu.memory_space<vmem>>, vector<8x384xbf16>
    tpu.vector_store %arg8[%c0_11, %c0_12], %7 {strides = array<i32>} : memref<72x768xbf16, #tpu.memory_space<vmem>>, vector<8x384xbf16>,
    %c0_13 = arith.constant 0 : index
    %c0_14 = arith.constant 0 : index
    %c1_15 = arith.constant 1 : index
    %9 = vector.load %arg1[%c0_13, %c0_14, %c1_15] : memref<2x8x422xbf16, #tpu.memory_space<vmem>>, vector<1x8x384xbf16>
    %10 = vector.shape_cast %9 : vector<1x8x384xbf16> to vector<8x384xbf16>
    %c8 = arith.constant 8 : index
    %c0_16 = arith.constant 0 : index
    %11 = vector.load %arg8[%c8, %c0_16] : memref<72x768xbf16, #tpu.memory_space<vmem>>, vector<8x384xbf16>
    tpu.vector_store %arg8[%c8, %c0_16], %10 {strides = array<i32>} : memref<72x768xbf16, #tpu.memory_space<vmem>>, vector<8x384xbf16>,
    %c0_17 = arith.constant 0 : index
    %c0_18 = arith.constant 0 : index
    %c2_19 = arith.constant 2 : index
    %12 = vector.load %arg1[%c0_17, %c0_18, %c2_19] : memref<2x8x422xbf16, #tpu.memory_space<vmem>>, vector<1x8x384xbf16>
    %13 = vector.shape_cast %12 : vector<1x8x384xbf16> to vector<8x384xbf16>
    %c16 = arith.constant 16 : index
    %c0_20 = arith.constant 0 : index
    %14 = vector.load %arg8[%c16, %c0_20] : memref<72x768xbf16, #tpu.memory_space<vmem>>, vector<8x384xbf16>
    tpu.vector_store %arg8[%c16, %c0_20], %13 {strides = array<i32>} : memref<72x768xbf16, #tpu.memory_space<vmem>>, vector<8x384xbf16>,
    %c0_21 = arith.constant 0 : index
    %c0_22 = arith.constant 0 : index
    %c18 = arith.constant 18 : index
    %15 = vector.load %arg1[%c0_21, %c0_22, %c18] : memref<2x8x422xbf16, #tpu.memory_space<vmem>>, vector<1x8x384xbf16>
    %16 = vector.shape_cast %15 : vector<1x8x384xbf16> to vector<8x384xbf16>
    %c24 = arith.constant 24 : index
    %c0_23 = arith.constant 0 : index
    %17 = vector.load %arg8[%c24, %c0_23] : memref<72x768xbf16, #tpu.memory_space<vmem>>, vector<8x384xbf16>
    tpu.vector_store %arg8[%c24, %c0_23], %16 {strides = array<i32>} : memref<72x768xbf16, #tpu.memory_space<vmem>>, vector<8x384xbf16>,
    %c0_24 = arith.constant 0 : index
    %c0_25 = arith.constant 0 : index
    %c19 = arith.constant 19 : index
    %18 = vector.load %arg1[%c0_24, %c0_25, %c19] : memref<2x8x422xbf16, #tpu.memory_space<vmem>>, vector<1x8x384xbf16>
    %19 = vector.shape_cast %18 : vector<1x8x384xbf16> to vector<8x384xbf16>
    %c32 = arith.constant 32 : index
    %c0_26 = arith.constant 0 : index
    %20 = vector.load %arg8[%c32, %c0_26] : memref<72x768xbf16, #tpu.memory_space<vmem>>, vector<8x384xbf16>
    tpu.vector_store %arg8[%c32, %c0_26], %19 {strides = array<i32>} : memref<72x768xbf16, #tpu.memory_space<vmem>>, vector<8x384xbf16>,
    %c0_27 = arith.constant 0 : index
    %c0_28 = arith.constant 0 : index
    %c20 = arith.constant 20 : index
    %21 = vector.load %arg1[%c0_27, %c0_28, %c20] : memref<2x8x422xbf16, #tpu.memory_space<vmem>>, vector<1x8x384xbf16>
    %22 = vector.shape_cast %21 : vector<1x8x384xbf16> to vector<8x384xbf16>
    %c40 = arith.constant 40 : index
    %c0_29 = arith.constant 0 : index
    %23 = vector.load %arg8[%c40, %c0_29] : memref<72x768xbf16, #tpu.memory_space<vmem>>, vector<8x384xbf16>
    tpu.vector_store %arg8[%c40, %c0_29], %22 {strides = array<i32>} : memref<72x768xbf16, #tpu.memory_space<vmem>>, vector<8x384xbf16>,
    %c0_30 = arith.constant 0 : index
    %c0_31 = arith.constant 0 : index
    %c36 = arith.constant 36 : index
    %24 = vector.load %arg1[%c0_30, %c0_31, %c36] : memref<2x8x422xbf16, #tpu.memory_space<vmem>>, vector<1x8x384xbf16>
    %25 = vector.shape_cast %24 : vector<1x8x384xbf16> to vector<8x384xbf16>
    %c48 = arith.constant 48 : index
    %c0_32 = arith.constant 0 : index
    %26 = vector.load %arg8[%c48, %c0_32] : memref<72x768xbf16, #tpu.memory_space<vmem>>, vector<8x384xbf16>
    tpu.vector_store %arg8[%c48, %c0_32], %25 {strides = array<i32>} : memref<72x768xbf16, #tpu.memory_space<vmem>>, vector<8x384xbf16>,
    %c0_33 = arith.constant 0 : index
    %c0_34 = arith.constant 0 : index
    %c37 = arith.constant 37 : index
    %27 = vector.load %arg1[%c0_33, %c0_34, %c37] : memref<2x8x422xbf16, #tpu.memory_space<vmem>>, vector<1x8x384xbf16>
    %28 = vector.shape_cast %27 : vector<1x8x384xbf16> to vector<8x384xbf16>
    %c56 = arith.constant 56 : index
    %c0_35 = arith.constant 0 : index
    %29 = vector.load %arg8[%c56, %c0_35] : memref<72x768xbf16, #tpu.memory_space<vmem>>, vector<8x384xbf16>
    tpu.vector_store %arg8[%c56, %c0_35], %28 {strides = array<i32>} : memref<72x768xbf16, #tpu.memory_space<vmem>>, vector<8x384xbf16>,
    %c0_36 = arith.constant 0 : index
    %c0_37 = arith.constant 0 : index
    %c38 = arith.constant 38 : index
    %30 = vector.load %arg1[%c0_36, %c0_37, %c38] : memref<2x8x422xbf16, #tpu.memory_space<vmem>>, vector<1x8x384xbf16>
    %31 = vector.shape_cast %30 : vector<1x8x384xbf16> to vector<8x384xbf16>
    %c64 = arith.constant 64 : index
    %c0_38 = arith.constant 0 : index
    %32 = vector.load %arg8[%c64, %c0_38] : memref<72x768xbf16, #tpu.memory_space<vmem>>, vector<8x384xbf16>
    tpu.vector_store %arg8[%c64, %c0_38], %31 {strides = array<i32>} : memref<72x768xbf16, #tpu.memory_space<vmem>>, vector<8x384xbf16>,
    %c1_39 = arith.constant 1 : index
    %c0_40 = arith.constant 0 : index
    %c0_41 = arith.constant 0 : index
    %33 = vector.load %arg1[%c1_39, %c0_40, %c0_41] : memref<2x8x422xbf16, #tpu.memory_space<vmem>>, vector<1x8x384xbf16>
    %34 = vector.shape_cast %33 : vector<1x8x384xbf16> to vector<8x384xbf16>
    %c0_42 = arith.constant 0 : index
    %c384 = arith.constant 384 : index
    %35 = vector.load %arg8[%c0_42, %c384] : memref<72x768xbf16, #tpu.memory_space<vmem>>, vector<8x384xbf16>
    tpu.vector_store %arg8[%c0_42, %c384], %34 {strides = array<i32>} : memref<72x768xbf16, #tpu.memory_space<vmem>>, vector<8x384xbf16>,
    %c1_43 = arith.constant 1 : index
    %c0_44 = arith.constant 0 : index
    %c1_45 = arith.constant 1 : index
    %36 = vector.load %arg1[%c1_43, %c0_44, %c1_45] : memref<2x8x422xbf16, #tpu.memory_space<vmem>>, vector<1x8x384xbf16>
    %37 = vector.shape_cast %36 : vector<1x8x384xbf16> to vector<8x384xbf16>
    %c8_46 = arith.constant 8 : index
    %c384_47 = arith.constant 384 : index
    %38 = vector.load %arg8[%c8_46, %c384_47] : memref<72x768xbf16, #tpu.memory_space<vmem>>, vector<8x384xbf16>
    tpu.vector_store %arg8[%c8_46, %c384_47], %37 {strides = array<i32>} : memref<72x768xbf16, #tpu.memory_space<vmem>>, vector<8x384xbf16>,
    %c1_48 = arith.constant 1 : index
    %c0_49 = arith.constant 0 : index
    %c2_50 = arith.constant 2 : index
    %39 = vector.load %arg1[%c1_48, %c0_49, %c2_50] : memref<2x8x422xbf16, #tpu.memory_space<vmem>>, vector<1x8x384xbf16>
    %40 = vector.shape_cast %39 : vector<1x8x384xbf16> to vector<8x384xbf16>
    %c16_51 = arith.constant 16 : index
    %c384_52 = arith.constant 384 : index
    %41 = vector.load %arg8[%c16_51, %c384_52] : memref<72x768xbf16, #tpu.memory_space<vmem>>, vector<8x384xbf16>
    tpu.vector_store %arg8[%c16_51, %c384_52], %40 {strides = array<i32>} : memref<72x768xbf16, #tpu.memory_space<vmem>>, vector<8x384xbf16>,
    %c1_53 = arith.constant 1 : index
    %c0_54 = arith.constant 0 : index
    %c18_55 = arith.constant 18 : index
    %42 = vector.load %arg1[%c1_53, %c0_54, %c18_55] : memref<2x8x422xbf16, #tpu.memory_space<vmem>>, vector<1x8x384xbf16>
    %43 = vector.shape_cast %42 : vector<1x8x384xbf16> to vector<8x384xbf16>
    %c24_56 = arith.constant 24 : index
    %c384_57 = arith.constant 384 : index
    %44 = vector.load %arg8[%c24_56, %c384_57] : memref<72x768xbf16, #tpu.memory_space<vmem>>, vector<8x384xbf16>
    tpu.vector_store %arg8[%c24_56, %c384_57], %43 {strides = array<i32>} : memref<72x768xbf16, #tpu.memory_space<vmem>>, vector<8x384xbf16>,
    %c1_58 = arith.constant 1 : index
    %c0_59 = arith.constant 0 : index
    %c19_60 = arith.constant 19 : index
    %45 = vector.load %arg1[%c1_58, %c0_59, %c19_60] : memref<2x8x422xbf16, #tpu.memory_space<vmem>>, vector<1x8x384xbf16>
    %46 = vector.shape_cast %45 : vector<1x8x384xbf16> to vector<8x384xbf16>
    %c32_61 = arith.constant 32 : index
    %c384_62 = arith.constant 384 : index
    %47 = vector.load %arg8[%c32_61, %c384_62] : memref<72x768xbf16, #tpu.memory_space<vmem>>, vector<8x384xbf16>
    tpu.vector_store %arg8[%c32_61, %c384_62], %46 {strides = array<i32>} : memref<72x768xbf16, #tpu.memory_space<vmem>>, vector<8x384xbf16>,
    %c1_63 = arith.constant 1 : index
    %c0_64 = arith.constant 0 : index
    %c20_65 = arith.constant 20 : index
    %48 = vector.load %arg1[%c1_63, %c0_64, %c20_65] : memref<2x8x422xbf16, #tpu.memory_space<vmem>>, vector<1x8x384xbf16>
    %49 = vector.shape_cast %48 : vector<1x8x384xbf16> to vector<8x384xbf16>
    %c40_66 = arith.constant 40 : index
    %c384_67 = arith.constant 384 : index
    %50 = vector.load %arg8[%c40_66, %c384_67] : memref<72x768xbf16, #tpu.memory_space<vmem>>, vector<8x384xbf16>
    tpu.vector_store %arg8[%c40_66, %c384_67], %49 {strides = array<i32>} : memref<72x768xbf16, #tpu.memory_space<vmem>>, vector<8x384xbf16>,
    %c1_68 = arith.constant 1 : index
    %c0_69 = arith.constant 0 : index
    %c36_70 = arith.constant 36 : index
    %51 = vector.load %arg1[%c1_68, %c0_69, %c36_70] : memref<2x8x422xbf16, #tpu.memory_space<vmem>>, vector<1x8x384xbf16>
    %52 = vector.shape_cast %51 : vector<1x8x384xbf16> to vector<8x384xbf16>
    %c48_71 = arith.constant 48 : index
    %c384_72 = arith.constant 384 : index
    %53 = vector.load %arg8[%c48_71, %c384_72] : memref<72x768xbf16, #tpu.memory_space<vmem>>, vector<8x384xbf16>
    tpu.vector_store %arg8[%c48_71, %c384_72], %52 {strides = array<i32>} : memref<72x768xbf16, #tpu.memory_space<vmem>>, vector<8x384xbf16>,
    %c1_73 = arith.constant 1 : index
    %c0_74 = arith.constant 0 : index
    %c37_75 = arith.constant 37 : index
    %54 = vector.load %arg1[%c1_73, %c0_74, %c37_75] : memref<2x8x422xbf16, #tpu.memory_space<vmem>>, vector<1x8x384xbf16>
    %55 = vector.shape_cast %54 : vector<1x8x384xbf16> to vector<8x384xbf16>
    %c56_76 = arith.constant 56 : index
    %c384_77 = arith.constant 384 : index
    %56 = vector.load %arg8[%c56_76, %c384_77] : memref<72x768xbf16, #tpu.memory_space<vmem>>, vector<8x384xbf16>
    tpu.vector_store %arg8[%c56_76, %c384_77], %55 {strides = array<i32>} : memref<72x768xbf16, #tpu.memory_space<vmem>>, vector<8x384xbf16>,
    %c1_78 = arith.constant 1 : index
    %c0_79 = arith.constant 0 : index
    %c38_80 = arith.constant 38 : index
    %57 = vector.load %arg1[%c1_78, %c0_79, %c38_80] : memref<2x8x422xbf16, #tpu.memory_space<vmem>>, vector<1x8x384xbf16>
    %58 = vector.shape_cast %57 : vector<1x8x384xbf16> to vector<8x384xbf16>
    %c64_81 = arith.constant 64 : index
    %c384_82 = arith.constant 384 : index
    %59 = vector.load %arg8[%c64_81, %c384_82] : memref<72x768xbf16, #tpu.memory_space<vmem>>, vector<8x384xbf16>
    tpu.vector_store %arg8[%c64_81, %c384_82], %58 {strides = array<i32>} : memref<72x768xbf16, #tpu.memory_space<vmem>>, vector<8x384xbf16>,
    %c0_83 = arith.constant 0 : index
    %c0_84 = arith.constant 0 : index
    %60 = vector.load %arg2[%c0_83, %c0_84] : memref<32x72xbf16, #tpu.memory_space<vmem>>, vector<32x72xbf16>
    %c0_85 = arith.constant 0 : index
    %c0_86 = arith.constant 0 : index
    %61 = vector.load %arg8[%c0_85, %c0_86] : memref<72x768xbf16, #tpu.memory_space<vmem>>, vector<72x768xbf16>
    %cst = arith.constant dense<0.000000e+00> : vector<32x768xf32>
    %62 = tpu.matmul %60, %61, %cst {dimension_numbers = #tpu.dot_dimension_numbers<[1], [0], [0], [1], [0, 0, 1, 1], [], []>} : vector<32x72xbf16>, vector<72x768xbf16>, vector<32x768xf32> -> vector<32x768xf32>
    %63 = vector.broadcast %0 : vector<32x1xf32> to vector<32x768xf32>
    %64 = arith.addf %62, %63 : vector<32x768xf32>
    %cst_87 = arith.constant 0.000000e+00 : bf16
    %65 = vector.broadcast %cst_87 : bf16 to vector<32x128xbf16>
    %66 = vector.extract_strided_slice %64 {offsets = [0, 0], sizes = [32, 384], strides = [1, 1]} : vector<32x768xf32> to vector<32x384xf32>
    %67 = vector.broadcast %4 : vector<1x384xf32> to vector<32x384xf32>
    %68 = arith.mulf %66, %67 : vector<32x384xf32>
    %cst_88 = arith.constant dense<0.000000e+00> : vector<32xf32>
    %69 = vector.multi_reduction <add>, %68, %cst_88 [1] : vector<32x384xf32> to vector<32xf32>
    %70 = vector.shape_cast %69 : vector<32xf32> to vector<32x1xf32>
    %cst_89 = arith.constant dense<0.000000e+00> : vector<32x1xf32>
    %71 = tpu.matmul %5, %70, %cst_89 {dimension_numbers = #tpu.dot_dimension_numbers<[1], [0], [0], [1], [0, 0, 1, 1], [], []>} : vector<32x32xf32>, vector<32x1xf32>, vector<32x1xf32> -> vector<32x1xf32>
    %72 = vector.broadcast %71 : vector<32x1xf32> to vector<32x384xf32>
    %73 = arith.subf %66, %72 : vector<32x384xf32>
    %74 = vector.broadcast %4 : vector<1x384xf32> to vector<32x384xf32>
    %75 = arith.mulf %73, %74 : vector<32x384xf32>
    %76 = arith.mulf %75, %75 : vector<32x384xf32>
    %cst_90 = arith.constant dense<0.000000e+00> : vector<32xf32>
    %77 = vector.multi_reduction <add>, %76, %cst_90 [1] : vector<32x384xf32> to vector<32xf32>
    %78 = vector.shape_cast %77 : vector<32xf32> to vector<32x1xf32>
    %cst_91 = arith.constant dense<0.000000e+00> : vector<32x1xf32>
    %79 = tpu.matmul %5, %78, %cst_91 {dimension_numbers = #tpu.dot_dimension_numbers<[1], [0], [0], [1], [0, 0, 1, 1], [], []>} : vector<32x32xf32>, vector<32x1xf32>, vector<32x1xf32> -> vector<32x1xf32>
    %cst_92 = arith.constant 9.99999974E-6 : f32
    %80 = vector.broadcast %cst_92 : f32 to vector<32x1xf32>
    %81 = arith.addf %79, %80 : vector<32x1xf32>
    %82 = math.rsqrt %81 : vector<32x1xf32>
    %83 = arith.mulf %82, %1 : vector<32x1xf32>
    %84 = vector.broadcast %83 : vector<32x1xf32> to vector<32x384xf32>
    %85 = arith.mulf %75, %84 : vector<32x384xf32>
    %86 = vector.broadcast %2 : vector<32x1xf32> to vector<32x384xf32>
    %87 = arith.addf %85, %86 : vector<32x384xf32>
    %cst_93 = arith.constant 0.000000e+00 : f32
    %88 = vector.broadcast %cst_93 : f32 to vector<32x384xf32>
    %89 = arith.cmpf ogt, %87, %88 : vector<32x384xf32>
    %cst_94 = arith.constant 0.000000e+00 : f32
    %90 = vector.broadcast %cst_94 : f32 to vector<32x384xf32>
    %91 = arith.minimumf %87, %90 : vector<32x384xf32>
    %92 = math.exp %91 : vector<32x384xf32>
    %cst_95 = arith.constant 1.000000e+00 : f32
    %93 = vector.broadcast %cst_95 : f32 to vector<32x384xf32>
    %94 = arith.subf %92, %93 : vector<32x384xf32>
    %95 = arith.select %89, %87, %94 : vector<32x384xi1>, vector<32x384xf32>
    %96 = vector.broadcast %4 : vector<1x384xf32> to vector<32x384xf32>
    %97 = arith.mulf %95, %96 : vector<32x384xf32>
    %c0_96 = arith.constant 0 : index
    %c0_97 = arith.constant 0 : index
    %98 = vector.load %arg9[%c0_96, %c0_97] : memref<32x1280xbf16, #tpu.memory_space<vmem>>, vector<32x128xbf16>
    tpu.vector_store %arg9[%c0_96, %c0_97], %65 {strides = array<i32>} : memref<32x1280xbf16, #tpu.memory_space<vmem>>, vector<32x128xbf16>,
    %c0_98 = arith.constant 0 : index
    %c512 = arith.constant 512 : index
    %99 = vector.load %arg9[%c0_98, %c512] : memref<32x1280xbf16, #tpu.memory_space<vmem>>, vector<32x128xbf16>
    tpu.vector_store %arg9[%c0_98, %c512], %65 {strides = array<i32>} : memref<32x1280xbf16, #tpu.memory_space<vmem>>, vector<32x128xbf16>,
    %100 = arith.truncf %97 : vector<32x384xf32> to vector<32x384xbf16>
    %c0_99 = arith.constant 0 : index
    %c128 = arith.constant 128 : index
    %101 = vector.load %arg9[%c0_99, %c128] : memref<32x1280xbf16, #tpu.memory_space<vmem>>, vector<32x384xbf16>
    tpu.vector_store %arg9[%c0_99, %c128], %100 {strides = array<i32>} : memref<32x1280xbf16, #tpu.memory_space<vmem>>, vector<32x384xbf16>,
    %102 = vector.extract_strided_slice %64 {offsets = [0, 384], sizes = [32, 384], strides = [1, 1]} : vector<32x768xf32> to vector<32x384xf32>
    %103 = vector.broadcast %4 : vector<1x384xf32> to vector<32x384xf32>
    %104 = arith.mulf %102, %103 : vector<32x384xf32>
    %cst_100 = arith.constant dense<0.000000e+00> : vector<32xf32>
    %105 = vector.multi_reduction <add>, %104, %cst_100 [1] : vector<32x384xf32> to vector<32xf32>
    %106 = vector.shape_cast %105 : vector<32xf32> to vector<32x1xf32>
    %cst_101 = arith.constant dense<0.000000e+00> : vector<32x1xf32>
    %107 = tpu.matmul %5, %106, %cst_101 {dimension_numbers = #tpu.dot_dimension_numbers<[1], [0], [0], [1], [0, 0, 1, 1], [], []>} : vector<32x32xf32>, vector<32x1xf32>, vector<32x1xf32> -> vector<32x1xf32>
    %108 = vector.broadcast %107 : vector<32x1xf32> to vector<32x384xf32>
    %109 = arith.subf %102, %108 : vector<32x384xf32>
    %110 = vector.broadcast %4 : vector<1x384xf32> to vector<32x384xf32>
    %111 = arith.mulf %109, %110 : vector<32x384xf32>
    %112 = arith.mulf %111, %111 : vector<32x384xf32>
    %cst_102 = arith.constant dense<0.000000e+00> : vector<32xf32>
    %113 = vector.multi_reduction <add>, %112, %cst_102 [1] : vector<32x384xf32> to vector<32xf32>
    %114 = vector.shape_cast %113 : vector<32xf32> to vector<32x1xf32>
    %cst_103 = arith.constant dense<0.000000e+00> : vector<32x1xf32>
    %115 = tpu.matmul %5, %114, %cst_103 {dimension_numbers = #tpu.dot_dimension_numbers<[1], [0], [0], [1], [0, 0, 1, 1], [], []>} : vector<32x32xf32>, vector<32x1xf32>, vector<32x1xf32> -> vector<32x1xf32>
    %cst_104 = arith.constant 9.99999974E-6 : f32
    %116 = vector.broadcast %cst_104 : f32 to vector<32x1xf32>
    %117 = arith.addf %115, %116 : vector<32x1xf32>
    %118 = math.rsqrt %117 : vector<32x1xf32>
    %119 = arith.mulf %118, %1 : vector<32x1xf32>
    %120 = vector.broadcast %119 : vector<32x1xf32> to vector<32x384xf32>
    %121 = arith.mulf %111, %120 : vector<32x384xf32>
    %122 = vector.broadcast %2 : vector<32x1xf32> to vector<32x384xf32>
    %123 = arith.addf %121, %122 : vector<32x384xf32>
    %cst_105 = arith.constant 0.000000e+00 : f32
    %124 = vector.broadcast %cst_105 : f32 to vector<32x384xf32>
    %125 = arith.cmpf ogt, %123, %124 : vector<32x384xf32>
    %cst_106 = arith.constant 0.000000e+00 : f32
    %126 = vector.broadcast %cst_106 : f32 to vector<32x384xf32>
    %127 = arith.minimumf %123, %126 : vector<32x384xf32>
    %128 = math.exp %127 : vector<32x384xf32>
    %cst_107 = arith.constant 1.000000e+00 : f32
    %129 = vector.broadcast %cst_107 : f32 to vector<32x384xf32>
    %130 = arith.subf %128, %129 : vector<32x384xf32>
    %131 = arith.select %125, %123, %130 : vector<32x384xi1>, vector<32x384xf32>
    %132 = vector.broadcast %4 : vector<1x384xf32> to vector<32x384xf32>
    %133 = arith.mulf %131, %132 : vector<32x384xf32>
    %c0_108 = arith.constant 0 : index
    %c640 = arith.constant 640 : index
    %134 = vector.load %arg9[%c0_108, %c640] : memref<32x1280xbf16, #tpu.memory_space<vmem>>, vector<32x128xbf16>
    tpu.vector_store %arg9[%c0_108, %c640], %65 {strides = array<i32>} : memref<32x1280xbf16, #tpu.memory_space<vmem>>, vector<32x128xbf16>,
    %c0_109 = arith.constant 0 : index
    %c1152 = arith.constant 1152 : index
    %135 = vector.load %arg9[%c0_109, %c1152] : memref<32x1280xbf16, #tpu.memory_space<vmem>>, vector<32x128xbf16>
    tpu.vector_store %arg9[%c0_109, %c1152], %65 {strides = array<i32>} : memref<32x1280xbf16, #tpu.memory_space<vmem>>, vector<32x128xbf16>,
    %136 = arith.truncf %133 : vector<32x384xf32> to vector<32x384xbf16>
    %c0_110 = arith.constant 0 : index
    %c768 = arith.constant 768 : index
    %137 = vector.load %arg9[%c0_110, %c768] : memref<32x1280xbf16, #tpu.memory_space<vmem>>, vector<32x384xbf16>
    tpu.vector_store %arg9[%c0_110, %c768], %136 {strides = array<i32>} : memref<32x1280xbf16, #tpu.memory_space<vmem>>, vector<32x384xbf16>,
    %c0_111 = arith.constant 0 : index
    %c128_112 = arith.constant 128 : index
    %138 = vector.load %arg9[%c0_111, %c128_112] : memref<32x1280xbf16, #tpu.memory_space<vmem>>, vector<8x384xbf16>
    %c0_113 = arith.constant 0 : index
    %c0_114 = arith.constant 0 : index
    %139 = vector.load %arg10[%c0_113, %c0_114] : memref<128x768xbf16, #tpu.memory_space<vmem>>, vector<8x384xbf16>
    tpu.vector_store %arg10[%c0_113, %c0_114], %138 {strides = array<i32>} : memref<128x768xbf16, #tpu.memory_space<vmem>>, vector<8x384xbf16>,
    %c0_115 = arith.constant 0 : index
    %c129 = arith.constant 129 : index
    %140 = vector.load %arg9[%c0_115, %c129] : memref<32x1280xbf16, #tpu.memory_space<vmem>>, vector<8x384xbf16>
    %c8_116 = arith.constant 8 : index
    %c0_117 = arith.constant 0 : index
    %141 = vector.load %arg10[%c8_116, %c0_117] : memref<128x768xbf16, #tpu.memory_space<vmem>>, vector<8x384xbf16>
    tpu.vector_store %arg10[%c8_116, %c0_117], %140 {strides = array<i32>} : memref<128x768xbf16, #tpu.memory_space<vmem>>, vector<8x384xbf16>,
    %c8_118 = arith.constant 8 : index
    %c127 = arith.constant 127 : index
    %142 = vector.load %arg9[%c8_118, %c127] : memref<32x1280xbf16, #tpu.memory_space<vmem>>, vector<8x384xbf16>
    %c16_119 = arith.constant 16 : index
    %c0_120 = arith.constant 0 : index
    %143 = vector.load %arg10[%c16_119, %c0_120] : memref<128x768xbf16, #tpu.memory_space<vmem>>, vector<8x384xbf16>
    tpu.vector_store %arg10[%c16_119, %c0_120], %142 {strides = array<i32>} : memref<128x768xbf16, #tpu.memory_space<vmem>>, vector<8x384xbf16>,
    %c8_121 = arith.constant 8 : index
    %c128_122 = arith.constant 128 : index
    %144 = vector.load %arg9[%c8_121, %c128_122] : memref<32x1280xbf16, #tpu.memory_space<vmem>>, vector<8x384xbf16>
    %c24_123 = arith.constant 24 : index
    %c0_124 = arith.constant 0 : index
    %145 = vector.load %arg10[%c24_123, %c0_124] : memref<128x768xbf16, #tpu.memory_space<vmem>>, vector<8x384xbf16>
    tpu.vector_store %arg10[%c24_123, %c0_124], %144 {strides = array<i32>} : memref<128x768xbf16, #tpu.memory_space<vmem>>, vector<8x384xbf16>,
    %c0_125 = arith.constant 0 : index
    %c146 = arith.constant 146 : index
    %146 = vector.load %arg9[%c0_125, %c146] : memref<32x1280xbf16, #tpu.memory_space<vmem>>, vector<8x384xbf16>
    %c32_126 = arith.constant 32 : index
    %c0_127 = arith.constant 0 : index
    %147 = vector.load %arg10[%c32_126, %c0_127] : memref<128x768xbf16, #tpu.memory_space<vmem>>, vector<8x384xbf16>
    tpu.vector_store %arg10[%c32_126, %c0_127], %146 {strides = array<i32>} : memref<128x768xbf16, #tpu.memory_space<vmem>>, vector<8x384xbf16>,
    %c0_128 = arith.constant 0 : index
    %c147 = arith.constant 147 : index
    %148 = vector.load %arg9[%c0_128, %c147] : memref<32x1280xbf16, #tpu.memory_space<vmem>>, vector<8x384xbf16>
    %c40_129 = arith.constant 40 : index
    %c0_130 = arith.constant 0 : index
    %149 = vector.load %arg10[%c40_129, %c0_130] : memref<128x768xbf16, #tpu.memory_space<vmem>>, vector<8x384xbf16>
    tpu.vector_store %arg10[%c40_129, %c0_130], %148 {strides = array<i32>} : memref<128x768xbf16, #tpu.memory_space<vmem>>, vector<8x384xbf16>,
    %c8_131 = arith.constant 8 : index
    %c145 = arith.constant 145 : index
    %150 = vector.load %arg9[%c8_131, %c145] : memref<32x1280xbf16, #tpu.memory_space<vmem>>, vector<8x384xbf16>
    %c48_132 = arith.constant 48 : index
    %c0_133 = arith.constant 0 : index
    %151 = vector.load %arg10[%c48_132, %c0_133] : memref<128x768xbf16, #tpu.memory_space<vmem>>, vector<8x384xbf16>
    tpu.vector_store %arg10[%c48_132, %c0_133], %150 {strides = array<i32>} : memref<128x768xbf16, #tpu.memory_space<vmem>>, vector<8x384xbf16>,
    %c8_134 = arith.constant 8 : index
    %c146_135 = arith.constant 146 : index
    %152 = vector.load %arg9[%c8_134, %c146_135] : memref<32x1280xbf16, #tpu.memory_space<vmem>>, vector<8x384xbf16>
    %c56_136 = arith.constant 56 : index
    %c0_137 = arith.constant 0 : index
    %153 = vector.load %arg10[%c56_136, %c0_137] : memref<128x768xbf16, #tpu.memory_space<vmem>>, vector<8x384xbf16>
    tpu.vector_store %arg10[%c56_136, %c0_137], %152 {strides = array<i32>} : memref<128x768xbf16, #tpu.memory_space<vmem>>, vector<8x384xbf16>,
    %c16_138 = arith.constant 16 : index
    %c110 = arith.constant 110 : index
    %154 = vector.load %arg9[%c16_138, %c110] : memref<32x1280xbf16, #tpu.memory_space<vmem>>, vector<8x384xbf16>
    %c64_139 = arith.constant 64 : index
    %c0_140 = arith.constant 0 : index
    %155 = vector.load %arg10[%c64_139, %c0_140] : memref<128x768xbf16, #tpu.memory_space<vmem>>, vector<8x384xbf16>
    tpu.vector_store %arg10[%c64_139, %c0_140], %154 {strides = array<i32>} : memref<128x768xbf16, #tpu.memory_space<vmem>>, vector<8x384xbf16>,
    %c16_141 = arith.constant 16 : index
    %c111 = arith.constant 111 : index
    %156 = vector.load %arg9[%c16_141, %c111] : memref<32x1280xbf16, #tpu.memory_space<vmem>>, vector<8x384xbf16>
    %c72 = arith.constant 72 : index
    %c0_142 = arith.constant 0 : index
    %157 = vector.load %arg10[%c72, %c0_142] : memref<128x768xbf16, #tpu.memory_space<vmem>>, vector<8x384xbf16>
    tpu.vector_store %arg10[%c72, %c0_142], %156 {strides = array<i32>} : memref<128x768xbf16, #tpu.memory_space<vmem>>, vector<8x384xbf16>,
    %c24_143 = arith.constant 24 : index
    %c109 = arith.constant 109 : index
    %158 = vector.load %arg9[%c24_143, %c109] : memref<32x1280xbf16, #tpu.memory_space<vmem>>, vector<8x384xbf16>
    %c80 = arith.constant 80 : index
    %c0_144 = arith.constant 0 : index
    %159 = vector.load %arg10[%c80, %c0_144] : memref<128x768xbf16, #tpu.memory_space<vmem>>, vector<8x384xbf16>
    tpu.vector_store %arg10[%c80, %c0_144], %158 {strides = array<i32>} : memref<128x768xbf16, #tpu.memory_space<vmem>>, vector<8x384xbf16>,
    %c24_145 = arith.constant 24 : index
    %c110_146 = arith.constant 110 : index
    %160 = vector.load %arg9[%c24_145, %c110_146] : memref<32x1280xbf16, #tpu.memory_space<vmem>>, vector<8x384xbf16>
    %c88 = arith.constant 88 : index
    %c0_147 = arith.constant 0 : index
    %161 = vector.load %arg10[%c88, %c0_147] : memref<128x768xbf16, #tpu.memory_space<vmem>>, vector<8x384xbf16>
    tpu.vector_store %arg10[%c88, %c0_147], %160 {strides = array<i32>} : memref<128x768xbf16, #tpu.memory_space<vmem>>, vector<8x384xbf16>,
    %c16_148 = arith.constant 16 : index
    %c128_149 = arith.constant 128 : index
    %162 = vector.load %arg9[%c16_148, %c128_149] : memref<32x1280xbf16, #tpu.memory_space<vmem>>, vector<8x384xbf16>
    %c96 = arith.constant 96 : index
    %c0_150 = arith.constant 0 : index
    %163 = vector.load %arg10[%c96, %c0_150] : memref<128x768xbf16, #tpu.memory_space<vmem>>, vector<8x384xbf16>
    tpu.vector_store %arg10[%c96, %c0_150], %162 {strides = array<i32>} : memref<128x768xbf16, #tpu.memory_space<vmem>>, vector<8x384xbf16>,
    %c16_151 = arith.constant 16 : index
    %c129_152 = arith.constant 129 : index
    %164 = vector.load %arg9[%c16_151, %c129_152] : memref<32x1280xbf16, #tpu.memory_space<vmem>>, vector<8x384xbf16>
    %c104 = arith.constant 104 : index
    %c0_153 = arith.constant 0 : index
    %165 = vector.load %arg10[%c104, %c0_153] : memref<128x768xbf16, #tpu.memory_space<vmem>>, vector<8x384xbf16>
    tpu.vector_store %arg10[%c104, %c0_153], %164 {strides = array<i32>} : memref<128x768xbf16, #tpu.memory_space<vmem>>, vector<8x384xbf16>,
    %c24_154 = arith.constant 24 : index
    %c127_155 = arith.constant 127 : index
    %166 = vector.load %arg9[%c24_154, %c127_155] : memref<32x1280xbf16, #tpu.memory_space<vmem>>, vector<8x384xbf16>
    %c112 = arith.constant 112 : index
    %c0_156 = arith.constant 0 : index
    %167 = vector.load %arg10[%c112, %c0_156] : memref<128x768xbf16, #tpu.memory_space<vmem>>, vector<8x384xbf16>
    tpu.vector_store %arg10[%c112, %c0_156], %166 {strides = array<i32>} : memref<128x768xbf16, #tpu.memory_space<vmem>>, vector<8x384xbf16>,
    %c24_157 = arith.constant 24 : index
    %c128_158 = arith.constant 128 : index
    %168 = vector.load %arg9[%c24_157, %c128_158] : memref<32x1280xbf16, #tpu.memory_space<vmem>>, vector<8x384xbf16>
    %c120 = arith.constant 120 : index
    %c0_159 = arith.constant 0 : index
    %169 = vector.load %arg10[%c120, %c0_159] : memref<128x768xbf16, #tpu.memory_space<vmem>>, vector<8x384xbf16>
    tpu.vector_store %arg10[%c120, %c0_159], %168 {strides = array<i32>} : memref<128x768xbf16, #tpu.memory_space<vmem>>, vector<8x384xbf16>,
    %c0_160 = arith.constant 0 : index
    %c768_161 = arith.constant 768 : index
    %170 = vector.load %arg9[%c0_160, %c768_161] : memref<32x1280xbf16, #tpu.memory_space<vmem>>, vector<8x384xbf16>
    %c0_162 = arith.constant 0 : index
    %c384_163 = arith.constant 384 : index
    %171 = vector.load %arg10[%c0_162, %c384_163] : memref<128x768xbf16, #tpu.memory_space<vmem>>, vector<8x384xbf16>
    tpu.vector_store %arg10[%c0_162, %c384_163], %170 {strides = array<i32>} : memref<128x768xbf16, #tpu.memory_space<vmem>>, vector<8x384xbf16>,
    %c0_164 = arith.constant 0 : index
    %c769 = arith.constant 769 : index
    %172 = vector.load %arg9[%c0_164, %c769] : memref<32x1280xbf16, #tpu.memory_space<vmem>>, vector<8x384xbf16>
    %c8_165 = arith.constant 8 : index
    %c384_166 = arith.constant 384 : index
    %173 = vector.load %arg10[%c8_165, %c384_166] : memref<128x768xbf16, #tpu.memory_space<vmem>>, vector<8x384xbf16>
    tpu.vector_store %arg10[%c8_165, %c384_166], %172 {strides = array<i32>} : memref<128x768xbf16, #tpu.memory_space<vmem>>, vector<8x384xbf16>,
    %c8_167 = arith.constant 8 : index
    %c767 = arith.constant 767 : index
    %174 = vector.load %arg9[%c8_167, %c767] : memref<32x1280xbf16, #tpu.memory_space<vmem>>, vector<8x384xbf16>
    %c16_168 = arith.constant 16 : index
    %c384_169 = arith.constant 384 : index
    %175 = vector.load %arg10[%c16_168, %c384_169] : memref<128x768xbf16, #tpu.memory_space<vmem>>, vector<8x384xbf16>
    tpu.vector_store %arg10[%c16_168, %c384_169], %174 {strides = array<i32>} : memref<128x768xbf16, #tpu.memory_space<vmem>>, vector<8x384xbf16>,
    %c8_170 = arith.constant 8 : index
    %c768_171 = arith.constant 768 : index
    %176 = vector.load %arg9[%c8_170, %c768_171] : memref<32x1280xbf16, #tpu.memory_space<vmem>>, vector<8x384xbf16>
    %c24_172 = arith.constant 24 : index
    %c384_173 = arith.constant 384 : index
    %177 = vector.load %arg10[%c24_172, %c384_173] : memref<128x768xbf16, #tpu.memory_space<vmem>>, vector<8x384xbf16>
    tpu.vector_store %arg10[%c24_172, %c384_173], %176 {strides = array<i32>} : memref<128x768xbf16, #tpu.memory_space<vmem>>, vector<8x384xbf16>,
    %c0_174 = arith.constant 0 : index
    %c786 = arith.constant 786 : index
    %178 = vector.load %arg9[%c0_174, %c786] : memref<32x1280xbf16, #tpu.memory_space<vmem>>, vector<8x384xbf16>
    %c32_175 = arith.constant 32 : index
    %c384_176 = arith.constant 384 : index
    %179 = vector.load %arg10[%c32_175, %c384_176] : memref<128x768xbf16, #tpu.memory_space<vmem>>, vector<8x384xbf16>
    tpu.vector_store %arg10[%c32_175, %c384_176], %178 {strides = array<i32>} : memref<128x768xbf16, #tpu.memory_space<vmem>>, vector<8x384xbf16>,
    %c0_177 = arith.constant 0 : index
    %c787 = arith.constant 787 : index
    %180 = vector.load %arg9[%c0_177, %c787] : memref<32x1280xbf16, #tpu.memory_space<vmem>>, vector<8x384xbf16>
    %c40_178 = arith.constant 40 : index
    %c384_179 = arith.constant 384 : index
    %181 = vector.load %arg10[%c40_178, %c384_179] : memref<128x768xbf16, #tpu.memory_space<vmem>>, vector<8x384xbf16>
    tpu.vector_store %arg10[%c40_178, %c384_179], %180 {strides = array<i32>} : memref<128x768xbf16, #tpu.memory_space<vmem>>, vector<8x384xbf16>,
    %c8_180 = arith.constant 8 : index
    %c785 = arith.constant 785 : index
    %182 = vector.load %arg9[%c8_180, %c785] : memref<32x1280xbf16, #tpu.memory_space<vmem>>, vector<8x384xbf16>
    %c48_181 = arith.constant 48 : index
    %c384_182 = arith.constant 384 : index
    %183 = vector.load %arg10[%c48_181, %c384_182] : memref<128x768xbf16, #tpu.memory_space<vmem>>, vector<8x384xbf16>
    tpu.vector_store %arg10[%c48_181, %c384_182], %182 {strides = array<i32>} : memref<128x768xbf16, #tpu.memory_space<vmem>>, vector<8x384xbf16>,
    %c8_183 = arith.constant 8 : index
    %c786_184 = arith.constant 786 : index
    %184 = vector.load %arg9[%c8_183, %c786_184] : memref<32x1280xbf16, #tpu.memory_space<vmem>>, vector<8x384xbf16>
    %c56_185 = arith.constant 56 : index
    %c384_186 = arith.constant 384 : index
    %185 = vector.load %arg10[%c56_185, %c384_186] : memref<128x768xbf16, #tpu.memory_space<vmem>>, vector<8x384xbf16>
    tpu.vector_store %arg10[%c56_185, %c384_186], %184 {strides = array<i32>} : memref<128x768xbf16, #tpu.memory_space<vmem>>, vector<8x384xbf16>,
    %c16_187 = arith.constant 16 : index
    %c750 = arith.constant 750 : index
    %186 = vector.load %arg9[%c16_187, %c750] : memref<32x1280xbf16, #tpu.memory_space<vmem>>, vector<8x384xbf16>
    %c64_188 = arith.constant 64 : index
    %c384_189 = arith.constant 384 : index
    %187 = vector.load %arg10[%c64_188, %c384_189] : memref<128x768xbf16, #tpu.memory_space<vmem>>, vector<8x384xbf16>
    tpu.vector_store %arg10[%c64_188, %c384_189], %186 {strides = array<i32>} : memref<128x768xbf16, #tpu.memory_space<vmem>>, vector<8x384xbf16>,
    %c16_190 = arith.constant 16 : index
    %c751 = arith.constant 751 : index
    %188 = vector.load %arg9[%c16_190, %c751] : memref<32x1280xbf16, #tpu.memory_space<vmem>>, vector<8x384xbf16>
    %c72_191 = arith.constant 72 : index
    %c384_192 = arith.constant 384 : index
    %189 = vector.load %arg10[%c72_191, %c384_192] : memref<128x768xbf16, #tpu.memory_space<vmem>>, vector<8x384xbf16>
    tpu.vector_store %arg10[%c72_191, %c384_192], %188 {strides = array<i32>} : memref<128x768xbf16, #tpu.memory_space<vmem>>, vector<8x384xbf16>,
    %c24_193 = arith.constant 24 : index
    %c749 = arith.constant 749 : index
    %190 = vector.load %arg9[%c24_193, %c749] : memref<32x1280xbf16, #tpu.memory_space<vmem>>, vector<8x384xbf16>
    %c80_194 = arith.constant 80 : index
    %c384_195 = arith.constant 384 : index
    %191 = vector.load %arg10[%c80_194, %c384_195] : memref<128x768xbf16, #tpu.memory_space<vmem>>, vector<8x384xbf16>
    tpu.vector_store %arg10[%c80_194, %c384_195], %190 {strides = array<i32>} : memref<128x768xbf16, #tpu.memory_space<vmem>>, vector<8x384xbf16>,
    %c24_196 = arith.constant 24 : index
    %c750_197 = arith.constant 750 : index
    %192 = vector.load %arg9[%c24_196, %c750_197] : memref<32x1280xbf16, #tpu.memory_space<vmem>>, vector<8x384xbf16>
    %c88_198 = arith.constant 88 : index
    %c384_199 = arith.constant 384 : index
    %193 = vector.load %arg10[%c88_198, %c384_199] : memref<128x768xbf16, #tpu.memory_space<vmem>>, vector<8x384xbf16>
    tpu.vector_store %arg10[%c88_198, %c384_199], %192 {strides = array<i32>} : memref<128x768xbf16, #tpu.memory_space<vmem>>, vector<8x384xbf16>,
    %c16_200 = arith.constant 16 : index
    %c768_201 = arith.constant 768 : index
    %194 = vector.load %arg9[%c16_200, %c768_201] : memref<32x1280xbf16, #tpu.memory_space<vmem>>, vector<8x384xbf16>
    %c96_202 = arith.constant 96 : index
    %c384_203 = arith.constant 384 : index
    %195 = vector.load %arg10[%c96_202, %c384_203] : memref<128x768xbf16, #tpu.memory_space<vmem>>, vector<8x384xbf16>
    tpu.vector_store %arg10[%c96_202, %c384_203], %194 {strides = array<i32>} : memref<128x768xbf16, #tpu.memory_space<vmem>>, vector<8x384xbf16>,
    %c16_204 = arith.constant 16 : index
    %c769_205 = arith.constant 769 : index
    %196 = vector.load %arg9[%c16_204, %c769_205] : memref<32x1280xbf16, #tpu.memory_space<vmem>>, vector<8x384xbf16>
    %c104_206 = arith.constant 104 : index
    %c384_207 = arith.constant 384 : index
    %197 = vector.load %arg10[%c104_206, %c384_207] : memref<128x768xbf16, #tpu.memory_space<vmem>>, vector<8x384xbf16>
    tpu.vector_store %arg10[%c104_206, %c384_207], %196 {strides = array<i32>} : memref<128x768xbf16, #tpu.memory_space<vmem>>, vector<8x384xbf16>,
    %c24_208 = arith.constant 24 : index
    %c767_209 = arith.constant 767 : index
    %198 = vector.load %arg9[%c24_208, %c767_209] : memref<32x1280xbf16, #tpu.memory_space<vmem>>, vector<8x384xbf16>
    %c112_210 = arith.constant 112 : index
    %c384_211 = arith.constant 384 : index
    %199 = vector.load %arg10[%c112_210, %c384_211] : memref<128x768xbf16, #tpu.memory_space<vmem>>, vector<8x384xbf16>
    tpu.vector_store %arg10[%c112_210, %c384_211], %198 {strides = array<i32>} : memref<128x768xbf16, #tpu.memory_space<vmem>>, vector<8x384xbf16>,
    %c24_212 = arith.constant 24 : index
    %c768_213 = arith.constant 768 : index
    %200 = vector.load %arg9[%c24_212, %c768_213] : memref<32x1280xbf16, #tpu.memory_space<vmem>>, vector<8x384xbf16>
    %c120_214 = arith.constant 120 : index
    %c384_215 = arith.constant 384 : index
    %201 = vector.load %arg10[%c120_214, %c384_215] : memref<128x768xbf16, #tpu.memory_space<vmem>>, vector<8x384xbf16>
    tpu.vector_store %arg10[%c120_214, %c384_215], %200 {strides = array<i32>} : memref<128x768xbf16, #tpu.memory_space<vmem>>, vector<8x384xbf16>,
    %c0_216 = arith.constant 0 : index
    %c0_217 = arith.constant 0 : index
    %202 = vector.load %arg3[%c0_216, %c0_217] : memref<32x128xbf16, #tpu.memory_space<vmem>>, vector<32x128xbf16>
    %c0_218 = arith.constant 0 : index
    %c0_219 = arith.constant 0 : index
    %203 = vector.load %arg10[%c0_218, %c0_219] : memref<128x768xbf16, #tpu.memory_space<vmem>>, vector<128x768xbf16>
    %cst_220 = arith.constant dense<0.000000e+00> : vector<32x768xf32>
    %204 = tpu.matmul %202, %203, %cst_220 {dimension_numbers = #tpu.dot_dimension_numbers<[1], [0], [0], [1], [0, 0, 1, 1], [], []>} : vector<32x128xbf16>, vector<128x768xbf16>, vector<32x768xf32> -> vector<32x768xf32>
    %205 = vector.broadcast %3 : vector<32x1xf32> to vector<32x768xf32>
    %206 = arith.addf %204, %205 : vector<32x768xf32>
    %c0_221 = arith.constant 0 : index
    %c0_222 = arith.constant 0 : index
    %c0_223 = arith.constant 0 : index
    %207 = vector.load %arg7[%c0_221, %c0_222, %c0_223] : memref<1x32x768xf32, #tpu.memory_space<vmem>>, vector<1x32x768xf32>
    %208 = vector.shape_cast %207 : vector<1x32x768xf32> to vector<32x768xf32>
    %209 = vector.shape_cast %206 : vector<32x768xf32> to vector<1x32x768xf32>
    tpu.vector_store %arg7[%c0_221, %c0_222, %c0_223], %209 {strides = array<i32>} : memref<1x32x768xf32, #tpu.memory_space<vmem>>, vector<1x32x768xf32>,
    return
  }
  func.func @transform_0(%arg0: i32) -> (i32, i32, i32) {
    %c0_i32 = arith.constant 0 : i32
    %c0_i32_0 = arith.constant 0 : i32
    %c0_i32_1 = arith.constant 0 : i32
    return %arg0, %c0_i32, %c0_i32_0 : i32, i32, i32
  }
  func.func @transform_1(%arg0: i32) -> (i32, i32) {
    %c0_i32 = arith.constant 0 : i32
    %c0_i32_0 = arith.constant 0 : i32
    %c0_i32_1 = arith.constant 0 : i32
    return %c0_i32, %c0_i32_0 : i32, i32
  }
  func.func @transform_2(%arg0: i32) -> (i32, i32) {
    %c0_i32 = arith.constant 0 : i32
    %c0_i32_0 = arith.constant 0 : i32
    %c0_i32_1 = arith.constant 0 : i32
    return %c0_i32, %c0_i32_0 : i32, i32
  }
  func.func @transform_3(%arg0: i32) -> (i32, i32) {
    %c0_i32 = arith.constant 0 : i32
    %c0_i32_0 = arith.constant 0 : i32
    %c0_i32_1 = arith.constant 0 : i32
    return %c0_i32, %c0_i32_0 : i32, i32
  }
  func.func @transform_4(%arg0: i32) -> (i32, i32) {
    %c0_i32 = arith.constant 0 : i32
    %c0_i32_0 = arith.constant 0 : i32
    %c0_i32_1 = arith.constant 0 : i32
    return %c0_i32, %c0_i32_0 : i32, i32
  }
  func.func @transform_5(%arg0: i32) -> (i32, i32) {
    %c0_i32 = arith.constant 0 : i32
    %c0_i32_0 = arith.constant 0 : i32
    %c0_i32_1 = arith.constant 0 : i32
    return %c0_i32, %c0_i32_0 : i32, i32
  }
  func.func @transform_6(%arg0: i32) -> (i32, i32, i32) {
    %c0_i32 = arith.constant 0 : i32
    %c0_i32_0 = arith.constant 0 : i32
    %c0_i32_1 = arith.constant 0 : i32
    return %arg0, %c0_i32, %c0_i32_0 : i32, i32, i32
  }
}

</mosaic_0001>

<bundles_post_ra>
// kernel: tile.23
= control target key start
LH: loop header
LB: loop body
LE: loop exit
PB: predicated region body
PF: predicated region fallthrough
CT: control target
= control target key end

     0   :  { %s22_s0 = inlined_call_operand.vmem [shape: f32[8], index: 0, kind: input, shape index: {}]   ;;  %s23_s1 = inlined_call_operand.vmem [shape: f32[4,8], index: 1, kind: output, shape index: {}]  }
   0x1   :  { %v4_v0 = vld [vmem:[%s22_s0] ss:$0 sm:$0xff] }
   0x2   :  { %5 = vst [vmem:[%s23_s1] sm:$0xf] %v4_v0 }

// kernel: tile.36
= control target key start
LH: loop header
LB: loop body
LE: loop exit
PB: predicated region body
PF: predicated region fallthrough
CT: control target
= control target key end

     0   :  { %vm7_vm0 = vcmask 64512   ;;  %s37_s8 = smov 8   ;;  %s38_s9 = smov 16   ;;  %vm13_vm1 = vcmask 261312   ;;  %vm19_vm2 = vcmask 195712   ;;  %vm25_vm3 = vcmask 130112   ;;  %s55_s0 = inlined_call_operand.vmem [shape: f32[4,8], index: 0, kind: input, shape index: {}]   ;;  %s56_s1 = inlined_call_operand.vmem [shape: f32[32,1], index: 1, kind: output, shape index: {}]  }
   0x1   :  { %v4_v0 = vld [vmem:[%s55_s0] sm:$0xf]  ;;  %s36_s0 = smov 24  }
   0x2   :  { %5 = vst [vmem:[#allocation1] sm:$0xf] %v4_v0 }
   0x9   :  { %v10_v1 = vld [vmem:[#allocation1 + $0x3] sm:$0x1]   ;;  %v22_v2 = vld [vmem:[#allocation1 + $0x1] sm:$0x1]   ;;  %v6_v3 = vld [vmem:[#allocation1] sm:$0x1]  }
   0xa   :  { %11 = vrot.lane.b32.xlu0 %v10_v1, %s36_s0  ;;  %23 = vrot.lane.b32.xlu1 %v22_v2, %s37_s8  ;;  %v16_v4 = vld [vmem:[#allocation1 + $0x2] sm:$0x1]   ;;  %8 = vst.msk [vmem:[#allocation0] sm:$0x1] %vm7_vm0, %v6_v3  }
   0xe   :  { %17 = vrot.lane.b32.xlu0 %v16_v4, %s38_s9 }
  0x7c   :  { %v12_v5 = vpop.permute.xlu0 %11   ;;  %v24_v6 = vpop.permute.xlu1 %23  }
  0x7d   :  { %14 = vst.msk [vmem:[#allocation0] sm:$0x1] %vm13_vm1, %v12_v5  }
  0x80   :  { %v18_v7 = vpop.permute.xlu0 %17  }
  0x81   :  { %20 = vst.msk [vmem:[#allocation0] sm:$0x1] %vm19_vm2, %v18_v7  }
  0x82   :  { %26 = vst.msk [vmem:[#allocation0] sm:$0x1] %vm25_vm3, %v24_v6  }
  0x89   :  { %v30_v8 = vld [vmem:[#allocation0] sm:$0x1] }
  0x8a   :  { %32 = vst [vmem:[%s56_s1] sm:$0x1] %v30_v8 }

// kernel: upsingle_forward.1
= control target key start
LH: loop header
LB: loop body
LE: loop exit
PB: predicated region body
PF: predicated region fallthrough
CT: control target
= control target key end

     0   :  { %s2992_s23 = smov 126   ;;  %s2993_s24 = smov 127   ;;  %v3000_v6 = vmov 0   ;;  %vm47_vm0 = vcmask 1043456   ;;  %vm67_vm1 = vcmask 1031168   ;;  %vm49_vm2 = vcmask 1039360   ;;  %s4204_s0 = inlined_call_operand.vmem [shape: bf16[2,8,422], index: 0, kind: input, shape index: {}]   ;;  %s4205_s1 = inlined_call_operand.vmem [shape: bf16[32,72], index: 1, kind: input, shape index: {}]   ;;  %s4206_s3 = inlined_call_operand.vmem [shape: f32[32,4], index: 3, kind: input, shape index: {}]   ;;  %s4207_s5 = inlined_call_operand.vmem [shape: f32[1,384], index: 5, kind: input, shape index: {}]   ;;  %s4208_s4 = inlined_call_operand.vmem [shape: f32[32,32], index: 4, kind: input, shape index: {}]   ;;  %s4209_s2 = inlined_call_operand.vmem [shape: bf16[32,128], index: 2, kind: input, shape index: {}]   ;;  %s4210_s6 = inlined_call_operand.vmem [shape: f32[1,32,768], index: 6, kind: output, shape index: {}]  }
   0x1   :  { %v3046_v0 = vld [vmem:[%s4204_s0] sm:$0xff]  ;;  %v2591_v1 = vld [vmem:[%s4204_s0 + $0x10] sm:$0xff]  ;;  %v57_v2 = vld [vmem:[%s4204_s0 + $0x8] sm:$0xff]  ;;  %s2994_s29 = smov 110   ;;  %s2995_s30 = smov 109   ;;  %1167 = vst [vmem:[#allocation3] sm:$0xff] %v3000_v6  ;;  %577 = vmatprep.mubr.bf16.mxu0 %v3000_v6  ;;  %2827 = vset.pattern.permute.xlu1 %v3000_v6 }
   0x2   :  { %60 = vrot.lane.b32.xlu1 %v3046_v0, %s2992_s23  ;;  %41 = vrot.lane.b32.xlu0 %v3046_v0, %s2993_s24  ;;  %185 = vst [vmem:[#allocation2 + $0xc] sm:$0xff] %v2591_v1  ;;  %s2996_s7 = smov 108   ;;  %s2997_s8 = smov 92   ;;  %v34_v3 = vld [vmem:[%s4204_s0 + $0x8] sm:$0xf]  ;;  %v2592_v5 = vld [vmem:[%s4204_s0 + $0x18] sm:$0xff] }
   0x3   :  { %v2590_v4 = vld [vmem:[%s4204_s0 + $0x18] sm:$0xf]  ;;  %36 = vst [vmem:[#allocation2 + $0x8] sm:$0xf] %v34_v3  ;;  %s2998_s13 = smov 91   ;;  %s2999_s14 = smov 90   ;;  %2826 = vset.pattern.permute.xlu0 %v3000_v6 }
   0x4   :  { %186 = vst [vmem:[#allocation2 + $0x14] sm:$0xf] %v2590_v4  ;;  %1168 = vst [vmem:[#allocation3 + $0x50] sm:$0xff] %v3000_v6  ;;  %v25_v7 = vld [vmem:[%s4206_s3 + $0x8] sm:$0xff]  ;;  %v24_v8 = vld [vmem:[%s4206_s3] sm:$0xff]  ;;  %vm85_vm3 = vcmask 900096  }
   0x5   :  { %1169 = vst [vmem:[#allocation3 + $0x20] sm:$0xff] %v3000_v6  ;;  %1170 = vst [vmem:[#allocation3 + $0x70] sm:$0xff] %v3000_v6  ;;  %v26_v9 = vld [vmem:[%s4206_s3 + $0x10] sm:$0xff]  ;;  %v27_v10 = vld [vmem:[%s4206_s3 + $0x18] sm:$0xff]  ;;  %vm103_vm4 = vcmask 891904   ;;  %vm121_vm5 = vcmask 883712  }
   0x6   :  { %62 = vrot.lane.b32.xlu1 %v57_v2, %s2992_s23  ;;  %43 = vrot.lane.b32.xlu0 %v57_v2, %s2993_s24  ;;  %1589 = vst [vmem:[#allocation3 + $0x28] sm:$0xff] %v3000_v6  ;;  %1590 = vst [vmem:[#allocation3 + $0x78] sm:$0xff] %v3000_v6  ;;  %vm139_vm6 = vcmask 752640   ;;  %vm157_vm7 = vcmask 744448   ;;  %vm175_vm8 = vcmask 736256   ;;  %vm519_vm9 = vcmask 588800  }
   0x7   :  { %1591 = vst [vmem:[#allocation3 + $0x48] sm:$0xff] %v3000_v6  ;;  %1592 = vst [vmem:[#allocation3 + $0x98] sm:$0xff] %v3000_v6  ;;  %vm748_vm10 = vcmask 261120   ;;  %s3002_s21 = smov 1   ;;  %s3003_s22 = smov 111  }
   0x8   :  { %s3005_s25 = smov 17   ;;  %s3006_s26 = smov 19  }
   0xa   :  { %80 = vrot.lane.b32.xlu1 %v57_v2, %s2994_s29  ;;  %78 = vrot.lane.b32.xlu0 %v3046_v0, %s2994_s29 }
   0xe   :  { %98 = vrot.lane.b32.xlu1 %v57_v2, %s2995_s30  ;;  %96 = vrot.lane.b32.xlu0 %v3046_v0, %s2995_s30 }
  0x12   :  { %116 = vrot.lane.b32.xlu1 %v57_v2, %s2996_s7  ;;  %114 = vrot.lane.b32.xlu0 %v3046_v0, %s2996_s7 }
  0x16   :  { %134 = vrot.lane.b32.xlu1 %v57_v2, %s2997_s8  ;;  %132 = vrot.lane.b32.xlu0 %v3046_v0, %s2997_s8 }
  0x1a   :  { %152 = vrot.lane.b32.xlu1 %v57_v2, %s2998_s13  ;;  %150 = vrot.lane.b32.xlu0 %v3046_v0, %s2998_s13 }
  0x1e   :  { %170 = vrot.lane.b32.xlu1 %v57_v2, %s2999_s14  ;;  %168 = vrot.lane.b32.xlu0 %v3046_v0, %s2999_s14 }
  0x22   :  { %193 = vrot.lane.b32.xlu1 %v2592_v5, %s2993_s24  ;;  %191 = vrot.lane.b32.xlu0 %v2591_v1, %s2993_s24 }
  0x26   :  { %210 = vrot.lane.b32.xlu1 %v2592_v5, %s2992_s23  ;;  %208 = vrot.lane.b32.xlu0 %v2591_v1, %s2992_s23  ;;  %s3004_s23 = smov 18  }
  0x2a   :  { %227 = vrot.lane.b32.xlu1 %v2592_v5, %s2994_s29  ;;  %225 = vrot.lane.b32.xlu0 %v2591_v1, %s2994_s29 }
  0x2e   :  { %244 = vrot.lane.b32.xlu1 %v2592_v5, %s2995_s30  ;;  %242 = vrot.lane.b32.xlu0 %v2591_v1, %s2995_s30 }
  0x32   :  { %261 = vrot.lane.b32.xlu1 %v2592_v5, %s2996_s7  ;;  %259 = vrot.lane.b32.xlu0 %v2591_v1, %s2996_s7 }
  0x36   :  { %278 = vrot.lane.b32.xlu1 %v2592_v5, %s2997_s8  ;;  %276 = vrot.lane.b32.xlu0 %v2591_v1, %s2997_s8 }
  0x3a   :  { %295 = vrot.lane.b32.xlu1 %v2592_v5, %s2998_s13  ;;  %293 = vrot.lane.b32.xlu0 %v2591_v1, %s2998_s13 }
  0x3e   :  { %312 = vrot.lane.b32.xlu1 %v2592_v5, %s2999_s14  ;;  %310 = vrot.lane.b32.xlu0 %v2591_v1, %s2999_s14 }
  0x42   :  { %361 = vperm.xlu1 %2827, %v25_v7   ;;  %356 = vperm.xlu0 %2826, %v24_v8  }
  0x46   :  { %366 = vperm.xlu1 %2827, %v26_v9   ;;  %371 = vperm.xlu0 %2826, %v27_v10  }
  0x74   :  { %v61_v11 = vpop.permute.xlu1 %60  ;;  %v42_v12 = vpop.permute.xlu0 %41 }
  0x75   :  { %v64_v15 = vrot.slane %v61_v11, 4  ;;  %v45_v16 = vrot.slane %v42_v12, 4 }
  0x78   :  { %v63_v13 = vpop.permute.xlu1 %62  ;;  %v44_v14 = vpop.permute.xlu0 %43 }
  0x79   :  { %v65_v17 = vrot.slane %v63_v13, 4  ;;  %v46_v18 = vrot.slane %v44_v14, 4 }
  0x7b   :  { %v66_v19 = vsel %vm47_vm0, %v64_v15, %v65_v17  ;;  %v69_v20 = vsel %vm67_vm1, %v63_v13, %v65_v17  ;;  %v48_v21 = vsel %vm47_vm0, %v45_v16, %v46_v18  ;;  %v51_v22 = vsel %vm49_vm2, %v44_v14, %v46_v18 }
  0x7c   :  { %v68_v23 = vsel %vm67_vm1, %v61_v11, %v66_v19  ;;  %73 = vst [vmem:[#allocation2 + $0x38] sm:$0xf] %v69_v20  ;;  %v50_v24 = vsel %vm49_vm2, %v42_v12, %v48_v21  ;;  %55 = vst [vmem:[#allocation2 + $0x20] sm:$0xf] %v51_v22  ;;  %v81_v25 = vpop.permute.xlu1 %80  ;;  %v79_v26 = vpop.permute.xlu0 %78  ;;  %v3159_v21 = vld [vmem:[%s4205_s1] sm:$0xff]  }
  0x7d   :  { %v83_v27 = vrot.slane %v81_v25, 4  ;;  %v82_v28 = vrot.slane %v79_v26, 4  ;;  %v2610_v29 = vcombine.high %v3046_v0, %v50_v24  ;;  %v2609_v30 = vcombine.low %v3046_v0, %v50_v24 }
  0x7f   :  { %v87_v31 = vsel %vm85_vm3, %v81_v25, %v83_v27  ;;  %v84_v32 = vsel %vm47_vm0, %v82_v28, %v83_v27  ;;  %545 = vmatprep.subr.bf16.mxu0 %v2610_v29 }
  0x80   :  { %91 = vst [vmem:[#allocation2 + $0x50] sm:$0xf] %v87_v31  ;;  %v86_v33 = vsel %vm85_vm3, %v79_v26, %v84_v32  ;;  %v99_v34 = vpop.permute.xlu1 %98  ;;  %v97_v35 = vpop.permute.xlu0 %96  ;;  %546 = vmatpush1.bf16.msra.mxu0 %v2609_v30 }
  0x81   :  { %v101_v36 = vrot.slane %v99_v34, 4  ;;  %v100_v37 = vrot.slane %v97_v35, 4  ;;  %v2616_v38 = vcombine.high %v68_v23, %v86_v33  ;;  %v2615_v39 = vcombine.low %v68_v23, %v86_v33 }
  0x83   :  { %v105_v40 = vsel %vm103_vm4, %v99_v34, %v101_v36  ;;  %v102_v41 = vsel %vm47_vm0, %v100_v37, %v101_v36  ;;  %547 = vmatprep.subr.bf16.mxu0 %v2616_v38  ;;  %v3173_v36 = vld [vmem:[%s4205_s1 + $0x8] sm:$0xff]  }
  0x84   :  { %109 = vst [vmem:[#allocation2 + $0x68] sm:$0xf] %v105_v40  ;;  %v104_v42 = vsel %vm103_vm4, %v97_v35, %v102_v41  ;;  %v117_v43 = vpop.permute.xlu1 %116  ;;  %v115_v44 = vpop.permute.xlu0 %114  ;;  %548 = vmatpush1.bf16.msra.mxu0 %v2615_v39  ;;  %v2886_v40 = vld [vmem:[#allocation2 + $0x8] ss:$24 sps:$4 sm:$0xff]  }
  0x85   :  { %v119_v45 = vrot.slane %v117_v43, 4  ;;  %v118_v46 = vrot.slane %v115_v44, 4 }
  0x87   :  { %v123_v47 = vsel %vm121_vm5, %v117_v43, %v119_v45  ;;  %v120_v48 = vsel %vm47_vm0, %v118_v46, %v119_v45 }
  0x88   :  { %127 = vst [vmem:[#allocation2 + $0x80] sm:$0xf] %v123_v47  ;;  %v122_v49 = vsel %vm121_vm5, %v115_v44, %v120_v48  ;;  %v135_v50 = vpop.permute.xlu1 %134  ;;  %v133_v51 = vpop.permute.xlu0 %132 }
  0x89   :  { %v137_v52 = vrot.slane %v135_v50, 4  ;;  %v136_v53 = vrot.slane %v133_v51, 4  ;;  %v2622_v54 = vcombine.high %v104_v42, %v122_v49  ;;  %v2621_v55 = vcombine.low %v104_v42, %v122_v49 }
  0x8b   :  { %v141_v56 = vsel %vm139_vm6, %v135_v50, %v137_v52  ;;  %v138_v57 = vsel %vm47_vm0, %v136_v53, %v137_v52  ;;  %549 = vmatprep.subr.bf16.mxu0 %v2622_v54 }
  0x8c   :  { %145 = vst [vmem:[#allocation2 + $0x98] sm:$0xf] %v141_v56  ;;  %v140_v58 = vsel %vm139_vm6, %v133_v51, %v138_v57  ;;  %v153_v59 = vpop.permute.xlu1 %152  ;;  %v151_v60 = vpop.permute.xlu0 %150  ;;  %550 = vmatpush1.bf16.msra.mxu0 %v2621_v55  ;;  %v2890_v56 = vld [vmem:[#allocation2 + $0x38] ss:$24 sps:$4 sm:$0xff]  }
  0x8d   :  { %v155_v61 = vrot.slane %v153_v59, 4  ;;  %v154_v62 = vrot.slane %v151_v60, 4 }
  0x8f   :  { %v159_v63 = vsel %vm157_vm7, %v153_v59, %v155_v61  ;;  %v156_v0 = vsel %vm47_vm0, %v154_v62, %v155_v61 }
  0x90   :  { %163 = vst [vmem:[#allocation2 + $0xb0] sm:$0xf] %v159_v63  ;;  %v158_v1 = vsel %vm157_vm7, %v151_v60, %v156_v0  ;;  %v171_v2 = vpop.permute.xlu1 %170  ;;  %v169_v3 = vpop.permute.xlu0 %168 }
  0x91   :  { %v173_v4 = vrot.slane %v171_v2, 4  ;;  %v172_v5 = vrot.slane %v169_v3, 4  ;;  %v2628_v7 = vcombine.high %v140_v58, %v158_v1  ;;  %v2627_v8 = vcombine.low %v140_v58, %v158_v1 }
  0x93   :  { %v177_v9 = vsel %vm175_vm8, %v171_v2, %v173_v4  ;;  %v174_v10 = vsel %vm47_vm0, %v172_v5, %v173_v4  ;;  %551 = vmatprep.subr.bf16.mxu0 %v2628_v7 }
  0x94   :  { %181 = vst [vmem:[#allocation2 + $0xc8] sm:$0xf] %v177_v9  ;;  %v176_v11 = vsel %vm175_vm8, %v169_v3, %v174_v10  ;;  %v194_v12 = vpop.permute.xlu1 %193  ;;  %v192_v13 = vpop.permute.xlu0 %191  ;;  %552 = vmatpush1.bf16.msra.mxu0 %v2627_v8  ;;  %v2893_v9 = vld [vmem:[#allocation2 + $0x68] ss:$24 sps:$4 sm:$0xff]  }
  0x95   :  { %v196_v14 = vrot.slane %v194_v12, 4  ;;  %v195_v15 = vrot.slane %v192_v13, 4  ;;  %v2634_v16 = vcombine.high %v176_v11, %v176_v11  ;;  %v2633_v17 = vcombine.low %v176_v11, %v176_v11 }
  0x97   :  { %v199_v18 = vsel %vm49_vm2, %v194_v12, %v196_v14  ;;  %v197_v19 = vsel %vm47_vm0, %v195_v15, %v196_v14  ;;  %2639 = vmatprep.subr.msk.bf16.mxu0 %vm47_vm0, %v2634_v16  ;;  %v528_v20 = vsel %vm47_vm0, %v2633_v17, 0  ;;  %v2897_v16 = vld [vmem:[#allocation2 + $0x98] ss:$24 sps:$4 sm:$0xff]  }
  0x98   :  { %203 = vst [vmem:[#allocation2 + $0x2c] sm:$0xf] %v199_v18  ;;  %v198_v22 = vsel %vm49_vm2, %v192_v13, %v197_v19  ;;  %v211_v23 = vpop.permute.xlu1 %210  ;;  %v209_v24 = vpop.permute.xlu0 %208  ;;  %554 = vmatpush1.bf16.msra.mxu0 %v528_v20 }
  0x99   :  { %202 = vst [vmem:[#allocation2 + $0x24] sm:$0xff] %v198_v22  ;;  %v213_v25 = vrot.slane %v211_v23, 4  ;;  %v212_v26 = vrot.slane %v209_v24, 4 }
  0x9b   :  { %v216_v27 = vsel %vm67_vm1, %v211_v23, %v213_v25  ;;  %v214_v28 = vsel %vm47_vm0, %v212_v26, %v213_v25  ;;  %2640 = vmatmul.mubr.msk.bf16.vlgmr.msra.gmra.mrb[0].mxu0 %vm519_vm9, %v3159_v21 }
  0x9c   :  { %220 = vst [vmem:[#allocation2 + $0x44] sm:$0xf] %v216_v27  ;;  %v215_v29 = vsel %vm67_vm1, %v209_v24, %v214_v28  ;;  %v228_v30 = vpop.permute.xlu1 %227  ;;  %v226_v31 = vpop.permute.xlu0 %225  ;;  %587 = vmatprep.mubr.bf16.mxu0 %v3000_v6 }
  0x9d   :  { %219 = vst [vmem:[#allocation2 + $0x3c] sm:$0xff] %v215_v29  ;;  %v230_v32 = vrot.slane %v228_v30, 4  ;;  %v229_v33 = vrot.slane %v226_v31, 4 }
  0x9f   :  { %v233_v34 = vsel %vm85_vm3, %v228_v30, %v230_v32  ;;  %v231_v35 = vsel %vm47_vm0, %v229_v33, %v230_v32  ;;  %v2904_v23 = vld [vmem:[#allocation2 + $0x14] ss:$24 sps:$4 sm:$0xff]  }
  0xa0   :  { %237 = vst [vmem:[#allocation2 + $0x5c] sm:$0xf] %v233_v34  ;;  %v232_v37 = vsel %vm85_vm3, %v226_v31, %v231_v35  ;;  %v245_v38 = vpop.permute.xlu1 %244  ;;  %v243_v39 = vpop.permute.xlu0 %242  ;;  %v2888_v41 = vld [vmem:[#allocation2 + $0xc] ss:$24 sps:$4 sm:$0xff]   ;;  %v2902_v24 = vld [vmem:[#allocation2 + $0x10] ss:$24 sps:$4 sm:$0xff]  }
  0xa1   :  { %236 = vst [vmem:[#allocation2 + $0x54] sm:$0xff] %v232_v37  ;;  %v247_v42 = vrot.slane %v245_v38, 4  ;;  %v246_v43 = vrot.slane %v243_v39, 4  ;;  %598 = vmatprep.subr.bf16.mxu0 %v2888_v41 }
  0xa2   :  { %599 = vmatpush1.bf16.msra.mxu0 %v2886_v40 }
  0xa3   :  { %v250_v44 = vsel %vm103_vm4, %v245_v38, %v247_v42  ;;  %v248_v45 = vsel %vm47_vm0, %v246_v43, %v247_v42  ;;  %2641 = vmatmul.mubr.msk.bf16.gmra.mrb[4].mxu0 %vm519_vm9, %v3173_v36 }
  0xa4   :  { %254 = vst [vmem:[#allocation2 + $0x74] sm:$0xf] %v250_v44  ;;  %v249_v46 = vsel %vm103_vm4, %v243_v39, %v248_v45  ;;  %v262_v47 = vpop.permute.xlu1 %261  ;;  %v260_v48 = vpop.permute.xlu0 %259  ;;  %630 = vmatprep.mubr.bf16.mxu0 %v3000_v6  ;;  %v705_v44 = vlaneseq }
  0xa5   :  { %253 = vst [vmem:[#allocation2 + $0x6c] sm:$0xff] %v249_v46  ;;  %v264_v49 = vrot.slane %v262_v47, 4  ;;  %v263_v50 = vrot.slane %v260_v48, 4 }
  0xa6   :  { %v706_v45 = vshrl.u32 %v705_v44, 7 }
  0xa7   :  { %v267_v51 = vsel %vm121_vm5, %v262_v47, %v264_v49  ;;  %v265_v52 = vsel %vm47_vm0, %v263_v50, %v264_v49  ;;  %v2907_v25 = vld [vmem:[#allocation2 + $0x44] ss:$24 sps:$4 sm:$0xff]  }
  0xa8   :  { %271 = vst [vmem:[#allocation2 + $0x8c] sm:$0xf] %v267_v51  ;;  %v266_v53 = vsel %vm121_vm5, %v260_v48, %v265_v52  ;;  %v279_v54 = vpop.permute.xlu1 %278  ;;  %v277_v55 = vpop.permute.xlu0 %276  ;;  %v2892_v57 = vld [vmem:[#allocation2 + $0x3c] ss:$24 sps:$4 sm:$0xff]   ;;  %v2905_v26 = vld [vmem:[#allocation2 + $0x40] ss:$24 sps:$4 sm:$0xff]  }
  0xa9   :  { %270 = vst [vmem:[#allocation2 + $0x84] sm:$0xff] %v266_v53  ;;  %v281_v58 = vrot.slane %v279_v54, 4  ;;  %v280_v59 = vrot.slane %v277_v55, 4  ;;  %600 = vmatprep.subr.bf16.mxu0 %v2892_v57  ;;  %v711_v46 = vsub.s32 1, %v706_v45  ;;  %v707_v47 = vsub.s32 0, %v706_v45 }
  0xaa   :  { %601 = vmatpush1.bf16.msra.mxu0 %v2890_v56  ;;  %v715_v52 = vsub.s32 2, %v706_v45 }
  0xab   :  { %v284_v60 = vsel %vm139_vm6, %v279_v54, %v281_v58  ;;  %v282_v61 = vsel %vm47_vm0, %v280_v59, %v281_v58 }
  0xac   :  { %288 = vst [vmem:[#allocation2 + $0xa4] sm:$0xf] %v284_v60  ;;  %v283_v62 = vsel %vm139_vm6, %v277_v55, %v282_v61  ;;  %v296_v63 = vpop.permute.xlu1 %295  ;;  %v294_v0 = vpop.permute.xlu0 %293 }
  0xad   :  { %287 = vst [vmem:[#allocation2 + $0x9c] sm:$0xff] %v283_v62  ;;  %v298_v1 = vrot.slane %v296_v63, 4  ;;  %v297_v2 = vrot.slane %v294_v0, 4 }
  0xaf   :  { %v301_v3 = vsel %vm157_vm7, %v296_v63, %v298_v1  ;;  %v299_v4 = vsel %vm47_vm0, %v297_v2, %v298_v1  ;;  %v2910_v27 = vld [vmem:[#allocation2 + $0x74] ss:$24 sps:$4 sm:$0xff]  }
  0xb0   :  { %305 = vst [vmem:[#allocation2 + $0xbc] sm:$0xf] %v301_v3  ;;  %v300_v5 = vsel %vm157_vm7, %v294_v0, %v299_v4  ;;  %v313_v7 = vpop.permute.xlu1 %312  ;;  %v311_v8 = vpop.permute.xlu0 %310  ;;  %v2895_v10 = vld [vmem:[#allocation2 + $0x6c] ss:$24 sps:$4 sm:$0xff]   ;;  %v2908_v28 = vld [vmem:[#allocation2 + $0x70] ss:$24 sps:$4 sm:$0xff]  }
  0xb1   :  { %304 = vst [vmem:[#allocation2 + $0xb4] sm:$0xff] %v300_v5  ;;  %v315_v11 = vrot.slane %v313_v7, 4  ;;  %v314_v12 = vrot.slane %v311_v8, 4  ;;  %602 = vmatprep.subr.bf16.mxu0 %v2895_v10 }
  0xb2   :  { %603 = vmatpush1.bf16.msra.mxu0 %v2893_v9 }
  0xb3   :  { %v318_v13 = vsel %vm175_vm8, %v313_v7, %v315_v11  ;;  %v316_v14 = vsel %vm47_vm0, %v314_v12, %v315_v11 }
  0xb4   :  { %322 = vst [vmem:[#allocation2 + $0xd4] sm:$0xf] %v318_v13  ;;  %v317_v15 = vsel %vm175_vm8, %v311_v8, %v316_v14 }
  0xb5   :  { %321 = vst [vmem:[#allocation2 + $0xcc] sm:$0xff] %v317_v15 }
  0xb7   :  { %v2913_v29 = vld [vmem:[#allocation2 + $0xa4] ss:$24 sps:$4 sm:$0xff]  }
  0xb8   :  { %v2899_v17 = vld [vmem:[#allocation2 + $0x9c] ss:$24 sps:$4 sm:$0xff]   ;;  %v2911_v31 = vld [vmem:[#allocation2 + $0xa0] ss:$24 sps:$4 sm:$0xff]  }
  0xb9   :  { %604 = vmatprep.subr.bf16.mxu0 %v2899_v17 }
  0xba   :  { %605 = vmatpush1.bf16.msra.mxu0 %v2897_v16 }
  0xbc   :  { %v352_v18 = vld [vmem:[#allocation2 + $0xc8] sm:$0xff]  ;;  %v353_v30 = vld [vmem:[#allocation2 + $0xd0] sm:$0xff] }
  0xbd   :  { %v2636_v19 = vcombine.high %v352_v18, %v352_v18  ;;  %v2635_v20 = vcombine.low %v352_v18, %v352_v18  ;;  %v2638_v32 = vcombine.high %v353_v30, %v353_v30  ;;  %v2637_v33 = vcombine.low %v353_v30, %v353_v30 }
  0xbf   :  { %2642 = vmatprep.subr.msk.bf16.mxu0 %vm47_vm0, %v2636_v19  ;;  %v534_v22 = vsel %vm47_vm0, %v2635_v20, 0  ;;  %v540_v34 = vsel %vm47_vm0, %v2637_v33, 0 }
  0xc0   :  { %607 = vmatpush1.bf16.msra.mxu0 %v534_v22 }
  0xc1   :  { %651 = vmatprep.subr.bf16.mxu0 %v2904_v23  ;;  %v3215_v48 = vpop.permute.xlu1 %361 }
  0xc3   :  { %2643 = vmatmul.mubr.msk.bf16.vlgmr.msra.gmra.mrb[8].mxu0 %vm519_vm9, %v3159_v21 }
  0xc4   :  { %652 = vmatpush1.bf16.msra.mxu0 %v2902_v24  ;;  %640 = vmatprep.mubr.bf16.mxu0 %v3000_v6 }
  0xc5   :  { %653 = vmatprep.subr.bf16.mxu0 %v2907_v25  ;;  %v3241_v59 = vpop.permute.xlu1 %366 }
  0xc8   :  { %654 = vmatpush1.bf16.msra.mxu0 %v2905_v26 }
  0xc9   :  { %655 = vmatprep.subr.bf16.mxu0 %v2910_v27 }
  0xcb   :  { %2644 = vmatmul.mubr.msk.bf16.gmra.mrb[12].mxu0 %vm519_vm9, %v3173_v36 }
  0xcc   :  { %656 = vmatpush1.bf16.msra.mxu0 %v2908_v28  ;;  %683 = vmatprep.mubr.bf16.mxu0 %v3000_v6 }
  0xcd   :  { %657 = vmatprep.subr.bf16.mxu0 %v2913_v29 }
  0xd0   :  { %658 = vmatpush1.bf16.msra.mxu0 %v2911_v31 }
  0xd1   :  { %2645 = vmatprep.subr.msk.bf16.mxu0 %vm47_vm0, %v2638_v32 }
  0xd4   :  { %660 = vmatpush1.bf16.msra.mxu0 %v540_v34 }
  0xd7   :  { %2646 = vmatmul.mubr.msk.bf16.vlgmr.msra.gmra.mrb[16].mxu0 %vm519_vm9, %v3159_v21  ;;  %v3210_v21 = vpop.permute.xlu0 %356 }
  0xd8   :  { %693 = vmatprep.mubr.bf16.mxu0 %v3000_v6 }
  0xdb   :  { %v3250_v0 = vpop.permute.xlu0 %371 }
  0xdf   :  { %2647 = vmatmul.mubr.msk.bf16.gmra.mrb[20].mxu0 %vm519_vm9, %v3173_v36  ;;  %v28_v36 = vld [vmem:[%s4207_s5] sm:$0x7] }
  0xe0   :  { %2487 = vmatprep.mubr.bf16.mxu0 %v3000_v6  ;;  %v3217_v6 = vrot.slane %v28_v36, %v711_v46  ;;  %v3219_v49 = vrot.slane %v28_v36, %v707_v47  ;;  %v3237_v57 = vrot.slane %v28_v36, %v715_v52  ;;  %v3313_v36 = vld [vmem:[%s4208_s4 + $0x8] sm:$0xff]  ;;  %v3318_v52 = vld [vmem:[%s4208_s4 + $0x10] sm:$0xff] }
 0x16e   :  { %v579_v35 = vpop.f32.mrb[0].mxu0 }
 0x16f   :  { %v581_v37 = vpop.f32.mrb[1].mxu0  ;;  %v3222_v50 = vadd.f32 %v579_v35, %v3210_v21 }
 0x170   :  { %v583_v38 = vpop.f32.mrb[2].mxu0  ;;  %v3225_v51 = vadd.f32 %v581_v37, %v3210_v21 }
 0x171   :  { %v585_v39 = vpop.f32.mrb[3].mxu0  ;;  %v3231_v54 = vadd.f32 %v583_v38, %v3215_v48  ;;  %v720_v55 = vmul.f32 %v3219_v49, %v3222_v50 }
 0x172   :  { %v3228_v53 = vadd.f32 %v585_v39, %v3215_v48  ;;  %v721_v56 = vmul.f32 %v3217_v6, %v3225_v51 }
 0x173   :  { %v723_v61 = vmul.f32 %v3219_v49, %v3231_v54 }
 0x174   :  { %v724_v58 = vmul.f32 %v3217_v6, %v3228_v53  ;;  %v732_v2 = vadd.f32 %v721_v56, %v720_v55  ;;  %v3327_v55 = vld [vmem:[%s4208_s4 + $0x18] sm:$0xff] }
 0x176   :  { %v589_v40 = vpop.f32.mrb[4].mxu0  ;;  %v736_v9 = vadd.f32 %v724_v58, %v723_v61 }
 0x177   :  { %v591_v41 = vpop.f32.mrb[5].mxu0  ;;  %v3260_v7 = vadd.f32 %v589_v40, %v3241_v59 }
 0x178   :  { %v593_v42 = vpop.f32.mrb[6].mxu0  ;;  %v3263_v8 = vadd.f32 %v591_v41, %v3241_v59  ;;  %v3306_v41 = vld [vmem:[%s4208_s4] sm:$0xff] }
 0x179   :  { %v595_v43 = vpop.f32.mrb[7].mxu0  ;;  %v3271_v13 = vadd.f32 %v593_v42, %v3250_v0  ;;  %v726_v15 = vmul.f32 %v3219_v49, %v3260_v7  ;;  %2730 = vmatprep.mubr.msk.f32.mxu1 %vm748_vm10, %v3306_v41 }
 0x17a   :  { %v3266_v10 = vadd.f32 %v595_v43, %v3250_v0  ;;  %v727_v16 = vmul.f32 %v3217_v6, %v3263_v8 }
 0x17b   :  { %v729_v22 = vmul.f32 %v3219_v49, %v3271_v13 }
 0x17c   :  { %v730_v18 = vmul.f32 %v3217_v6, %v3266_v10  ;;  %v740_v27 = vadd.f32 %v727_v16, %v726_v15 }
 0x17e   :  { %v744_v30 = vadd.f32 %v730_v18, %v729_v22 }
 0x196   :  { %v632_v60 = vpop.f32.mrb[8].mxu0 }
 0x197   :  { %v3246_v62 = vadd.f32 %v632_v60, %v3210_v21  ;;  %v3248_v63 = vpop.f32.mrb[9].mxu0 }
 0x198   :  { %v636_v1 = vpop.f32.mrb[10].mxu0 }
 0x199   :  { %v722_v3 = vmul.f32 %v3237_v57, %v3246_v62  ;;  %v3255_v4 = vadd.f32 %v636_v1, %v3215_v48  ;;  %v3257_v5 = vpop.f32.mrb[11].mxu0 }
 0x19b   :  { %v725_v11 = vmul.f32 %v3237_v57, %v3255_v4  ;;  %v733_v12 = vadd.f32 %v732_v2, %v722_v3  ;;  %v3338_v2 = vadd.f32 %v3248_v63, %v3210_v21 }
 0x19d   :  { %734 = vadd.xlane.f32.xlu1 %v733_v12  ;;  %v737_v14 = vadd.f32 %v736_v9, %v725_v11  ;;  %v3342_v9 = vadd.f32 %v3257_v5, %v3215_v48 }
 0x19e   :  { %v642_v17 = vpop.f32.mrb[12].mxu0 }
 0x19f   :  { %v3280_v19 = vadd.f32 %v642_v17, %v3241_v59  ;;  %v3282_v20 = vpop.f32.mrb[13].mxu0  ;;  %738 = vadd.xlane.f32.xlu0 %v737_v14 }
 0x1a0   :  { %v646_v23 = vpop.f32.mrb[14].mxu0 }
 0x1a1   :  { %v728_v24 = vmul.f32 %v3237_v57, %v3280_v19  ;;  %v3289_v25 = vadd.f32 %v646_v23, %v3250_v0  ;;  %v3291_v26 = vpop.f32.mrb[15].mxu0 }
 0x1a3   :  { %v731_v28 = vmul.f32 %v3237_v57, %v3289_v25  ;;  %v741_v29 = vadd.f32 %v740_v27, %v728_v24 }
 0x1a5   :  { %742 = vadd.xlane.f32.xlu0 %v741_v29  ;;  %v745_v31 = vadd.f32 %v744_v30, %v731_v28 }
 0x1a7   :  { %746 = vadd.xlane.f32.xlu1 %v745_v31 }
 0x1aa   :  { %v685_v32 = vpop.f32.mrb[16].mxu0 }
 0x1ab   :  { %v687_v33 = vpop.f32.mrb[17].mxu0  ;;  %v3334_v1 = vadd.f32 %v685_v32, %v3210_v21 }
 0x1ac   :  { %v689_v34 = vpop.f32.mrb[18].mxu0  ;;  %v3348_v16 = vadd.f32 %v687_v33, %v3210_v21 }
 0x1ad   :  { %v691_v35 = vpop.f32.mrb[19].mxu0  ;;  %v1184_v5 = vmul.f32 %v3217_v6, %v3334_v1  ;;  %v3365_v21 = vadd.f32 %v689_v34, %v3215_v48 }
 0x1b2   :  { %v3295_v37 = vpop.f32.mrb[20].mxu0 }
 0x1b3   :  { %v3297_v38 = vpop.f32.mrb[21].mxu0 }
 0x1b4   :  { %v3299_v39 = vpop.f32.mrb[22].mxu0 }
 0x1b5   :  { %v3301_v40 = vpop.f32.mrb[23].mxu0 }
 0x22a   :  { %v735_v42 = vpop.xlane.xlu1 %734 }
 0x22c   :  { %v739_v43 = vpop.xlane.xlu0 %738 }
 0x22d   :  { %v2778_v44 = vpack.c.bf16 %v739_v43, %v735_v42 }
 0x22f   :  { %2779 = vmatprep.subr.bf16.mxu1 %v2778_v44 }
 0x230   :  { %2781 = vmatpush3.bf16.msra.mxu1 %v2778_v44 }
 0x232   :  { %v743_v45 = vpop.xlane.xlu0 %742 }
 0x234   :  { %v747_v46 = vpop.xlane.xlu1 %746 }
 0x235   :  { %v2782_v47 = vpack.c.bf16 %v747_v46, %v743_v45 }
 0x237   :  { %2783 = vmatprep.subr.bf16.mxu1 %v2782_v47 }
 0x238   :  { %2785 = vmatpush3.bf16.msra.mxu1 %v2782_v47 }
 0x23b   :  { %2731 = vmatmul.mubr.msk.f32.vlgmr.msra.gmra.mrb[0].mxu1 %vm748_vm10, %v3313_v36 }
 0x23c   :  { %2733 = vmatprep.mubr.msk.f32.mxu1 %vm748_vm10, %v3318_v52 }
 0x23f   :  { %2734 = vmatmul.mubr.msk.f32.gmra.mrb[2].mxu1 %vm748_vm10, %v3327_v55 }
 0x240   :  { %2744 = vmatprep.mubr.msk.f32.mxu1 %vm748_vm10, %v3306_v41 }
 0x30e   :  { %v2732_v56 = vpop.f32.mrb[0].mxu1 }
 0x30f   :  { %853 = vperm.xlu1 %2827, %v2732_v56   ;;  %v827_v58 = vpop.f32.mrb[1].mxu1 }
 0x310   :  { %848 = vperm.xlu0 %2826, %v827_v58   ;;  %v1187_v58 = vmul.f32 %v3217_v6, %v3365_v21 }
 0x312   :  { %v2735_v60 = vpop.f32.mrb[2].mxu1 }
 0x313   :  { %v837_v61 = vpop.f32.mrb[3].mxu1 }
 0x314   :  { %863 = vperm.xlu0 %2826, %v2735_v60   ;;  %858 = vperm.xlu1 %2827, %v837_v61   ;;  %v3423_v60 = vadd.f32 %v3295_v37, %v3241_v59  ;;  %v1183_v37 = vmul.f32 %v3219_v49, %v3338_v2 }
 0x38e   :  { %v854_v3 = vpop.permute.xlu1 %853 }
 0x38f   :  { %v869_v11 = vsub.f32 %v3231_v54, %v854_v3  ;;  %v870_v12 = vsub.f32 %v3228_v53, %v854_v3  ;;  %v871_v14 = vsub.f32 %v3255_v4, %v854_v3  ;;  %v849_v15 = vpop.permute.xlu0 %848  ;;  %v3377_v4 = vadd.f32 %v691_v35, %v3215_v48 }
 0x390   :  { %v866_v17 = vsub.f32 %v3222_v50, %v849_v15  ;;  %v867_v63 = vsub.f32 %v3225_v51, %v849_v15  ;;  %v868_v18 = vsub.f32 %v3246_v62, %v849_v15 }
 0x391   :  { %v3356_v22 = vmul.f32 %v869_v11, %v3219_v49  ;;  %v3359_v53 = vmul.f32 %v870_v12, %v3217_v6  ;;  %v3362_v54 = vmul.f32 %v871_v14, %v3237_v57  ;;  %v3431_v11 = vadd.f32 %v3299_v39, %v3250_v0 }
 0x392   :  { %v3368_v50 = vmul.f32 %v866_v17, %v3219_v49  ;;  %v3371_v51 = vmul.f32 %v867_v63, %v3217_v6  ;;  %v3374_v62 = vmul.f32 %v868_v18, %v3237_v57  ;;  %v3439_v17 = vadd.f32 %v3282_v20, %v3241_v59 }
 0x393   :  { %v864_v23 = vpop.permute.xlu0 %863  ;;  %v859_v24 = vpop.permute.xlu1 %858  ;;  %v893_v27 = vmul.f32 %v3356_v22, %v3356_v22  ;;  %v894_v28 = vmul.f32 %v3359_v53, %v3359_v53  ;;  %v895_v29 = vmul.f32 %v3362_v54, %v3362_v54  ;;  %v1186_v39 = vmul.f32 %v3219_v49, %v3342_v9 }
 0x394   :  { %v875_v30 = vsub.f32 %v3271_v13, %v864_v23  ;;  %v876_v31 = vsub.f32 %v3266_v10, %v864_v23  ;;  %v877_v32 = vsub.f32 %v3289_v25, %v864_v23  ;;  %v872_v48 = vsub.f32 %v3260_v7, %v859_v24 }
 0x395   :  { %v873_v33 = vsub.f32 %v3263_v8, %v859_v24  ;;  %v874_v34 = vsub.f32 %v3280_v19, %v859_v24  ;;  %v906_v35 = vadd.f32 %v894_v28, %v893_v27  ;;  %v890_v42 = vmul.f32 %v3368_v50, %v3368_v50 }
 0x396   :  { %v891_v43 = vmul.f32 %v3371_v51, %v3371_v51  ;;  %v892_v13 = vmul.f32 %v3374_v62, %v3374_v62  ;;  %v3398_v10 = vmul.f32 %v875_v30, %v3219_v49  ;;  %v3401_v25 = vmul.f32 %v876_v31, %v3217_v6 }
 0x397   :  { %v907_v7 = vadd.f32 %v906_v35, %v895_v29  ;;  %v3404_v8 = vmul.f32 %v877_v32, %v3237_v57  ;;  %v3407_v19 = vmul.f32 %v872_v48, %v3219_v49  ;;  %v3410_v44 = vmul.f32 %v873_v33, %v3217_v6 }
 0x398   :  { %v902_v45 = vadd.f32 %v891_v43, %v890_v42  ;;  %v899_v46 = vmul.f32 %v3398_v10, %v3398_v10  ;;  %v900_v47 = vmul.f32 %v3401_v25, %v3401_v25  ;;  %v3417_v56 = vmul.f32 %v874_v34, %v3237_v57 }
 0x399   :  { %908 = vadd.xlane.f32.xlu0 %v907_v7  ;;  %v896_v61 = vmul.f32 %v3407_v19, %v3407_v19  ;;  %v897_v3 = vmul.f32 %v3410_v44, %v3410_v44  ;;  %v901_v14 = vmul.f32 %v3404_v8, %v3404_v8  ;;  %v3447_v23 = vadd.f32 %v3291_v26, %v3250_v0 }
 0x39a   :  { %v903_v12 = vadd.f32 %v902_v45, %v892_v13  ;;  %v914_v15 = vadd.f32 %v900_v47, %v899_v46  ;;  %v898_v63 = vmul.f32 %v3417_v56, %v3417_v56  ;;  %v1185_v24 = vmul.f32 %v3237_v57, %v3348_v16 }
 0x39b   :  { %v910_v18 = vadd.f32 %v897_v3, %v896_v61  ;;  %v1190_v20 = vmul.f32 %v3217_v6, %v3423_v60  ;;  %v3455_v28 = vadd.f32 %v3297_v38, %v3241_v59  ;;  %v1195_v30 = vadd.f32 %v1184_v5, %v1183_v37 }
 0x39c   :  { %904 = vadd.xlane.f32.xlu1 %v903_v12  ;;  %v915_v27 = vadd.f32 %v914_v15, %v901_v14  ;;  %v1188_v31 = vmul.f32 %v3237_v57, %v3377_v4  ;;  %v1193_v26 = vmul.f32 %v3217_v6, %v3431_v11  ;;  %v3463_v32 = vadd.f32 %v3301_v40, %v3250_v0 }
 0x39d   :  { %v911_v29 = vadd.f32 %v910_v18, %v898_v63  ;;  %v1199_v48 = vadd.f32 %v1187_v58, %v1186_v39  ;;  %v1189_v33 = vmul.f32 %v3219_v49, %v3439_v17  ;;  %v1192_v59 = vmul.f32 %v3219_v49, %v3447_v23 }
 0x39e   :  { %v1191_v38 = vmul.f32 %v3237_v57, %v3455_v28  ;;  %v1196_v5 = vadd.f32 %v1195_v30, %v1185_v24  ;;  %v1194_v35 = vmul.f32 %v3237_v57, %v3463_v32 }
 0x39f   :  { %912 = vadd.xlane.f32.xlu0 %v911_v29  ;;  %v1203_v34 = vadd.f32 %v1190_v20, %v1189_v33  ;;  %v1200_v42 = vadd.f32 %v1199_v48, %v1188_v31  ;;  %v1207_v0 = vadd.f32 %v1193_v26, %v1192_v59 }
 0x3a0   :  { %916 = vadd.xlane.f32.xlu1 %v915_v27 }
 0x3a1   :  { %v1204_v40 = vadd.f32 %v1203_v34, %v1191_v38  ;;  %v1208_v43 = vadd.f32 %v1207_v0, %v1194_v35 }
 0x3a3   :  { %1197 = vadd.xlane.f32.xlu0 %v1196_v5 }
 0x3a4   :  { %1201 = vadd.xlane.f32.xlu1 %v1200_v42 }
 0x3a7   :  { %1205 = vadd.xlane.f32.xlu0 %v1204_v40 }
 0x3a8   :  { %1209 = vadd.xlane.f32.xlu1 %v1208_v43 }
 0x426   :  { %v909_v13 = vpop.xlane.xlu0 %908 }
 0x429   :  { %v905_v7 = vpop.xlane.xlu1 %904 }
 0x42a   :  { %v2786_v45 = vpack.c.bf16 %v909_v13, %v905_v7 }
 0x42c   :  { %2787 = vmatprep.subr.bf16.mxu1 %v2786_v45  ;;  %v913_v46 = vpop.xlane.xlu0 %912 }
 0x42d   :  { %2789 = vmatpush3.bf16.msra.mxu1 %v2786_v45  ;;  %v917_v47 = vpop.xlane.xlu1 %916 }
 0x42e   :  { %v2790_v58 = vpack.c.bf16 %v917_v47, %v913_v46 }
 0x430   :  { %2791 = vmatprep.subr.bf16.mxu1 %v2790_v58  ;;  %v1198_v61 = vpop.xlane.xlu0 %1197 }
 0x431   :  { %2793 = vmatpush3.bf16.msra.mxu1 %v2790_v58  ;;  %v1202_v3 = vpop.xlane.xlu1 %1201 }
 0x432   :  { %v2794_v12 = vpack.c.bf16 %v1202_v3, %v1198_v61 }
 0x434   :  { %2745 = vmatmul.mubr.msk.f32.vlgmr.msra.gmra.mrb[4].mxu1 %vm748_vm10, %v3313_v36  ;;  %2795 = vmatprep.subr.bf16.mxu1 %v2794_v12  ;;  %v1206_v14 = vpop.xlane.xlu0 %1205 }
 0x435   :  { %2797 = vmatpush3.bf16.msra.mxu1 %v2794_v12  ;;  %v1210_v15 = vpop.xlane.xlu1 %1209  ;;  %2747 = vmatprep.mubr.msk.f32.mxu1 %vm748_vm10, %v3318_v52 }
 0x436   :  { %v2798_v37 = vpack.c.bf16 %v1210_v15, %v1206_v14 }
 0x438   :  { %2748 = vmatmul.mubr.msk.f32.gmra.mrb[6].mxu1 %vm748_vm10, %v3327_v55  ;;  %2799 = vmatprep.subr.bf16.mxu1 %v2798_v37 }
 0x439   :  { %2801 = vmatpush3.bf16.msra.mxu1 %v2798_v37  ;;  %2758 = vmatprep.mubr.msk.f32.mxu1 %vm748_vm10, %v3306_v41 }
 0x43c   :  { %2759 = vmatmul.mubr.msk.f32.vlgmr.msra.gmra.mrb[8].mxu1 %vm748_vm10, %v3313_v36 }
 0x43d   :  { %2761 = vmatprep.mubr.msk.f32.mxu1 %vm748_vm10, %v3318_v52 }
 0x440   :  { %2762 = vmatmul.mubr.msk.f32.gmra.mrb[10].mxu1 %vm748_vm10, %v3327_v55 }
 0x441   :  { %2772 = vmatprep.mubr.msk.f32.mxu1 %vm748_vm10, %v3306_v41 }
 0x507   :  { %v3489_v63 = vpop.f32.mrb[4].mxu1 }
 0x508   :  { %v3491_v18 = vpop.f32.mrb[5].mxu1 }
 0x50b   :  { %v3493_v39 = vpop.f32.mrb[6].mxu1 }
 0x50c   :  { %v3495_v24 = vpop.f32.mrb[7].mxu1 }
 0x50f   :  { %v2760_v27 = vpop.f32.mrb[8].mxu1 }
 0x510   :  { %1303 = vperm.xlu1 %2827, %v2760_v27   ;;  %v1277_v20 = vpop.f32.mrb[9].mxu1 }
 0x511   :  { %1298 = vperm.xlu0 %2826, %v1277_v20  }
 0x513   :  { %v2763_v29 = vpop.f32.mrb[10].mxu1 }
 0x514   :  { %v1287_v30 = vpop.f32.mrb[11].mxu1 }
 0x515   :  { %1313 = vperm.xlu0 %2826, %v2763_v29   ;;  %1308 = vperm.xlu1 %2827, %v1287_v30  }
 0x58f   :  { %v1304_v31 = vpop.permute.xlu1 %1303 }
 0x590   :  { %v1319_v26 = vsub.f32 %v3342_v9, %v1304_v31  ;;  %v1320_v41 = vsub.f32 %v3365_v21, %v1304_v31  ;;  %v1321_v48 = vsub.f32 %v3377_v4, %v1304_v31  ;;  %v1299_v33 = vpop.permute.xlu0 %1298 }
 0x591   :  { %v1316_v59 = vsub.f32 %v3338_v2, %v1299_v33  ;;  %v1317_v38 = vsub.f32 %v3334_v1, %v1299_v33  ;;  %v1318_v5 = vsub.f32 %v3348_v16, %v1299_v33 }
 0x592   :  { %v3504_v34 = vmul.f32 %v1319_v26, %v3219_v49  ;;  %v3507_v35 = vmul.f32 %v1320_v41, %v3217_v6  ;;  %v3510_v42 = vmul.f32 %v1321_v48, %v3237_v57 }
 0x593   :  { %v3513_v9 = vmul.f32 %v1316_v59, %v3219_v49  ;;  %v3516_v21 = vmul.f32 %v1317_v38, %v3217_v6  ;;  %v3519_v2 = vmul.f32 %v1318_v5, %v3237_v57  ;;  %v3001_v38 = vmov 2   ;;  %v2982_v5 = vld [vmem:[%s4206_s3 + $0x8] sm:$0xff] }
 0x594   :  { %v1314_v1 = vpop.permute.xlu0 %1313  ;;  %v1309_v16 = vpop.permute.xlu1 %1308  ;;  %v1343_v4 = vmul.f32 %v3504_v34, %v3504_v34  ;;  %v1344_v0 = vmul.f32 %v3507_v35, %v3507_v35  ;;  %v1345_v40 = vmul.f32 %v3510_v42, %v3510_v42  ;;  %2829 = vset.pattern.permute.xlu0 %v3001_v38 }
 0x595   :  { %v1325_v43 = vsub.f32 %v3447_v23, %v1314_v1  ;;  %v1326_v13 = vsub.f32 %v3431_v11, %v1314_v1  ;;  %v1327_v7 = vsub.f32 %v3463_v32, %v1314_v1  ;;  %v1322_v45 = vsub.f32 %v3439_v17, %v1309_v16  ;;  %v2983_v1 = vld [vmem:[%s4206_s3] sm:$0xff] }
 0x596   :  { %v1323_v46 = vsub.f32 %v3423_v60, %v1309_v16  ;;  %v1324_v47 = vsub.f32 %v3455_v28, %v1309_v16  ;;  %v1356_v58 = vadd.f32 %v1344_v0, %v1343_v4  ;;  %v1340_v61 = vmul.f32 %v3513_v9, %v3513_v9  ;;  %v2984_v16 = vld [vmem:[%s4206_s3 + $0x10] sm:$0xff]  ;;  %v2985_v4 = vld [vmem:[%s4206_s3 + $0x18] sm:$0xff] }
 0x597   :  { %v1341_v3 = vmul.f32 %v3516_v21, %v3516_v21  ;;  %v1342_v23 = vmul.f32 %v3519_v2, %v3519_v2  ;;  %v3540_v11 = vmul.f32 %v1325_v43, %v3219_v49  ;;  %v3543_v32 = vmul.f32 %v1326_v13, %v3217_v6  ;;  %v2986_v0 = vld [vmem:[#allocation3] sm:$0xff] }
 0x598   :  { %v1357_v17 = vadd.f32 %v1356_v58, %v1345_v40  ;;  %v3546_v60 = vmul.f32 %v1327_v7, %v3237_v57  ;;  %v3549_v28 = vmul.f32 %v1322_v45, %v3219_v49  ;;  %v3552_v12 = vmul.f32 %v1323_v46, %v3217_v6 }
 0x599   :  { %v1352_v14 = vadd.f32 %v1341_v3, %v1340_v61  ;;  %v1349_v15 = vmul.f32 %v3540_v11, %v3540_v11  ;;  %v1350_v37 = vmul.f32 %v3543_v32, %v3543_v32  ;;  %v3559_v27 = vmul.f32 %v1324_v47, %v3237_v57 }
 0x59a   :  { %1358 = vadd.xlane.f32.xlu0 %v1357_v17  ;;  %v1346_v20 = vmul.f32 %v3549_v28, %v3549_v28  ;;  %v1347_v29 = vmul.f32 %v3552_v12, %v3552_v12  ;;  %v1351_v31 = vmul.f32 %v3546_v60, %v3546_v60  ;;  %v985_v40 = vadd.f32 1e-05, %v3491_v18 }
 0x59b   :  { %v1353_v30 = vadd.f32 %v1352_v14, %v1342_v23  ;;  %v1364_v26 = vadd.f32 %v1350_v37, %v1349_v15  ;;  %v1348_v41 = vmul.f32 %v3559_v27, %v3559_v27  ;;  %v990_v43 = vadd.f32 1e-05, %v3489_v63 }
 0x59c   :  { %v1360_v48 = vadd.f32 %v1347_v29, %v1346_v20  ;;  %2918 = vrsqrt.f32 %v985_v40  ;;  %v995_v46 = vadd.f32 1e-05, %v3495_v24  ;;  %v1000_v23 = vadd.f32 1e-05, %v3493_v39 }
 0x59d   :  { %1354 = vadd.xlane.f32.xlu1 %v1353_v30  ;;  %v1365_v33 = vadd.f32 %v1364_v26, %v1351_v31  ;;  %2920 = vrsqrt.f32 %v990_v43  ;;  %v1931_v30 = vld [vmem:[#allocation3 + $0x50] sm:$0xf0] }
 0x59e   :  { %v1361_v59 = vadd.f32 %v1360_v48, %v1348_v41  ;;  %2922 = vrsqrt.f32 %v995_v46 }
 0x59f   :  { %2924 = vrsqrt.f32 %v1000_v23 }
 0x5a0   :  { %1362 = vadd.xlane.f32.xlu0 %v1361_v59 }
 0x5a1   :  { %1366 = vadd.xlane.f32.xlu1 %v1365_v33 }
 0x5a6   :  { %v2919_v3 = vpop.eup %2918 }
 0x5a7   :  { %v2921_v63 = vpop.eup %2920 }
 0x5a8   :  { %v2923_v15 = vpop.eup %2922 }
 0x5b2   :  { %1009 = vrot.lane.b32.xlu1 %v2982_v5, %s2993_s24 }
 0x5b6   :  { %1007 = vrot.lane.b32.xlu0 %v2983_v1, %s2993_s24  ;;  %1011 = vrot.lane.b32.xlu1 %v2984_v16, %s2993_s24 }
 0x5ba   :  { %1013 = vrot.lane.b32.xlu0 %v2985_v4, %s2993_s24 }
 0x5be   :  { %1060 = vperm.xlu0 %2829, %v2982_v5  }
 0x5c2   :  { %1064 = vperm.xlu0 %2829, %v2984_v16  }
 0x5c6   :  { %2831 = vset.pattern.permute.xlu0 %v2986_v0 }
 0x627   :  { %v1359_v13 = vpop.xlane.xlu0 %1358 }
 0x62a   :  { %v1355_v7 = vpop.xlane.xlu1 %1354 }
 0x62b   :  { %v2802_v45 = vpack.c.bf16 %v1359_v13, %v1355_v7 }
 0x62d   :  { %2803 = vmatprep.subr.bf16.mxu1 %v2802_v45  ;;  %v1363_v47 = vpop.xlane.xlu0 %1362 }
 0x62e   :  { %2805 = vmatpush3.bf16.msra.mxu1 %v2802_v45  ;;  %v1367_v58 = vpop.xlane.xlu1 %1366 }
 0x62f   :  { %v2806_v61 = vpack.c.bf16 %v1367_v58, %v1363_v47 }
 0x631   :  { %2807 = vmatprep.subr.bf16.mxu1 %v2806_v61  ;;  %v3589_v18 = vpop.permute.xlu0 %1007 }
 0x632   :  { %v1019_v17 = vmul.f32 %v2919_v3, %v3589_v18  ;;  %2809 = vmatpush3.bf16.msra.mxu1 %v2806_v61  ;;  %v3592_v14 = vpop.permute.xlu1 %1009 }
 0x633   :  { %v1020_v24 = vmul.f32 %v2921_v63, %v3592_v14 }
 0x634   :  { %1025 = vperm.xlu1 %2827, %v1019_v17  }
 0x635   :  { %2773 = vmatmul.mubr.msk.f32.vlgmr.msra.gmra.mrb[12].mxu1 %vm748_vm10, %v3313_v36  ;;  %1030 = vperm.xlu0 %2831, %v1020_v24   ;;  %v3604_v20 = vpop.permute.xlu0 %1013  ;;  %v2925_v36 = vpop.eup %2924 }
 0x636   :  { %2775 = vmatprep.mubr.msk.f32.mxu1 %vm748_vm10, %v3318_v52  ;;  %v3599_v39 = vpop.permute.xlu1 %1011  ;;  %v1022_v29 = vmul.f32 %v2925_v36, %v3604_v20  ;;  %v1640_v52 = vld [vmem:[#allocation3] sm:$0xf0] }
 0x637   :  { %v1021_v37 = vmul.f32 %v2923_v15, %v3599_v39  ;;  %v1648_v31 = vrot.slane %v1640_v52, 4 }
 0x638   :  { %2828 = vset.pattern.permute.xlu1 %v3001_v38 }
 0x639   :  { %2776 = vmatmul.mubr.msk.f32.gmra.mrb[14].mxu1 %vm748_vm10, %v3327_v55  ;;  %1056 = vperm.xlu1 %2828, %v2983_v1   ;;  %v1939_v55 = vrot.slane %v1931_v30, 4  ;;  %vm1660_vm10 = vcmask 7168  }
 0x63a   :  { %2434 = vmatprep.mubr.bf16.mxu1 %v2986_v0 }
 0x63b   :  { %v2833_v26 = vpack.i.bf16 %v1939_v55, %v1648_v31 }
 0x63d   :  { %2830 = vset.pattern.permute.xlu1 %v2986_v0  ;;  %2834 = vrot.lane.b32.xlu0 %v2833_v26, %s3002_s21  ;;  %v3608_v41 = vpop.permute.xlu0 %1060 }
 0x63e   :  { %1035 = vperm.xlu1 %2830, %v1021_v37  }
 0x641   :  { %v3610_v48 = vpop.permute.xlu0 %1064 }
 0x642   :  { %1040 = vperm.xlu1 %2830, %v1022_v29  }
 0x646   :  { %2832 = vset.pattern.permute.xlu1 %v3001_v38 }
 0x647   :  { %1068 = vperm.xlu1 %2832, %v2985_v4  }
 0x64b   :  { %2838 = vset.pattern.permute.xlu1 %v2986_v0 }
 0x6b3   :  { %v1026_v33 = vpop.permute.xlu1 %1025 }
 0x6b4   :  { %v1031_v59 = vpop.permute.xlu0 %1030  ;;  %v1043_v40 = vmul.f32 %v1026_v33, %v3368_v50  ;;  %v1044_v43 = vmul.f32 %v1026_v33, %v3371_v51 }
 0x6b5   :  { %v1046_v5 = vmul.f32 %v1031_v59, %v3356_v22  ;;  %v1047_v38 = vmul.f32 %v1031_v59, %v3359_v53  ;;  %v1048_v1 = vmul.f32 %v1031_v59, %v3362_v54  ;;  %v1045_v53 = vmul.f32 %v1026_v33, %v3374_v62 }
 0x6b7   :  { %v3616_v16 = vadd.f32 %v3608_v41, %v1046_v5  ;;  %v3619_v4 = vadd.f32 %v3608_v41, %v1047_v38  ;;  %v3622_v0 = vadd.f32 %v3608_v41, %v1048_v1 }
 0x6b8   :  { %v3626_v13 = vpop.permute.xlu1 %1056 }
 0x6b9   :  { %v1098_v22 = vmin.f32 %v3616_v16, 0.0  ;;  %v1099_v54 = vmin.f32 %v3619_v4, 0.0  ;;  %v1100_v7 = vmin.f32 %v3622_v0, 0.0  ;;  %v3633_v45 = vadd.f32 %v3626_v13, %v1043_v40 }
 0x6ba   :  { %v3636_v46 = vadd.f32 %v3626_v13, %v1044_v43  ;;  %v3639_v50 = vadd.f32 %v3626_v13, %v1045_v53  ;;  %vm1086_vm11 = vcmp.gt.f32.partialorder %v3616_v16, 0.0  ;;  %vm1087_vm12 = vcmp.gt.f32.partialorder %v3619_v4, 0.0 }
 0x6bb   :  { %v1113_v47 = vmul.f32 1.442695, %v1098_v22  ;;  %v1115_v51 = vmul.f32 1.442695, %v1099_v54  ;;  %v1117_v58 = vmul.f32 1.442695, %v1100_v7 }
 0x6bc   :  { %v1095_v61 = vmin.f32 %v3633_v45, 0.0  ;;  %v1096_v62 = vmin.f32 %v3636_v46, 0.0  ;;  %v1097_v23 = vmin.f32 %v3639_v50, 0.0  ;;  %vm1088_vm13 = vcmp.gt.f32.partialorder %v3622_v0, 0.0 }
 0x6bd   :  { %2926 = vpow2.f32 %v1113_v47  ;;  %v1036_v3 = vpop.permute.xlu1 %1035  ;;  %vm1083_vm14 = vcmp.gt.f32.partialorder %v3633_v45, 0.0  ;;  %vm1084_vm15 = vcmp.gt.f32.partialorder %v3636_v46, 0.0  ;;  %vm1085_vm0 = vcmp.gt.f32.partialorder %v3639_v50, 0.0 }
 0x6be   :  { %2928 = vpow2.f32 %v1115_v51  ;;  %v1049_v63 = vmul.f32 %v1036_v3, %v3407_v19  ;;  %v1050_v17 = vmul.f32 %v1036_v3, %v3410_v44  ;;  %v1107_v24 = vmul.f32 1.442695, %v1095_v61 }
 0x6bf   :  { %2930 = vpow2.f32 %v1117_v58  ;;  %v1109_v15 = vmul.f32 1.442695, %v1096_v62  ;;  %v1051_v37 = vmul.f32 %v1036_v3, %v3417_v56  ;;  %v1111_v36 = vmul.f32 1.442695, %v1097_v23 }
 0x6c0   :  { %v3648_v29 = vadd.f32 %v3610_v48, %v1049_v63  ;;  %v3651_v52 = vadd.f32 %v3610_v48, %v1050_v17  ;;  %2932 = vpow2.f32 %v1107_v24 }
 0x6c1   :  { %v3654_v30 = vadd.f32 %v3610_v48, %v1051_v37  ;;  %v1041_v31 = vpop.permute.xlu1 %1040  ;;  %2934 = vpow2.f32 %v1109_v15 }
 0x6c2   :  { %v1101_v19 = vmin.f32 %v3648_v29, 0.0  ;;  %2936 = vpow2.f32 %v1111_v36  ;;  %v1102_v44 = vmin.f32 %v3651_v52, 0.0  ;;  %v1052_v33 = vmul.f32 %v1041_v31, %v3398_v10 }
 0x6c3   :  { %v1103_v56 = vmin.f32 %v3654_v30, 0.0  ;;  %v1053_v59 = vmul.f32 %v1041_v31, %v3401_v25  ;;  %v1054_v5 = vmul.f32 %v1041_v31, %v3404_v8  ;;  %vm1089_vm1 = vcmp.gt.f32.partialorder %v3648_v29, 0.0 }
 0x6c4   :  { %v1119_v55 = vmul.f32 1.442695, %v1101_v19  ;;  %v1121_v26 = vmul.f32 1.442695, %v1102_v44  ;;  %vm1090_vm5 = vcmp.gt.f32.partialorder %v3651_v52, 0.0  ;;  %vm1091_vm6 = vcmp.gt.f32.partialorder %v3654_v30, 0.0 }
 0x6c5   :  { %v1123_v38 = vmul.f32 1.442695, %v1103_v56 }
 0x6c6   :  { %v3662_v1 = vpop.permute.xlu1 %1068  ;;  %2938 = vpow2.f32 %v1119_v55 }
 0x6c7   :  { %v2927_v40 = vpop.eup %2926  ;;  %v3665_v43 = vadd.f32 %v3662_v1, %v1052_v33  ;;  %v3668_v22 = vadd.f32 %v3662_v1, %v1053_v59  ;;  %v3671_v53 = vadd.f32 %v3662_v1, %v1054_v5  ;;  %2940 = vpow2.f32 %v1121_v26 }
 0x6c8   :  { %v2929_v54 = vpop.eup %2928  ;;  %v2659_v7 = vadd.f32 -1.0, %v2927_v40  ;;  %2942 = vpow2.f32 %v1123_v38 }
 0x6c9   :  { %v2931_v10 = vpop.eup %2930  ;;  %v2660_v25 = vadd.f32 -1.0, %v2929_v54  ;;  %v1104_v47 = vmin.f32 %v3665_v43, 0.0  ;;  %v1105_v51 = vmin.f32 %v3668_v22, 0.0  ;;  %v1106_v61 = vmin.f32 %v3671_v53, 0.0 }
 0x6ca   :  { %v2661_v8 = vadd.f32 -1.0, %v2931_v10  ;;  %v2933_v58 = vpop.eup %2932  ;;  %v1146_v3 = vsel %vm1086_vm11, %v3616_v16, %v2659_v7  ;;  %vm1092_vm7 = vcmp.gt.f32.partialorder %v3665_v43, 0.0  ;;  %vm1093_vm8 = vcmp.gt.f32.partialorder %v3668_v22, 0.0 }
 0x6cb   :  { %v2935_v62 = vpop.eup %2934  ;;  %v2656_v23 = vadd.f32 -1.0, %v2933_v58  ;;  %v1125_v63 = vmul.f32 1.442695, %v1104_v47  ;;  %v1147_v24 = vsel %vm1087_vm12, %v3619_v4, %v2660_v25  ;;  %v1127_v37 = vmul.f32 1.442695, %v1105_v51 }
 0x6cc   :  { %v2937_v17 = vpop.eup %2936  ;;  %v2657_v15 = vadd.f32 -1.0, %v2935_v62  ;;  %v1129_v36 = vmul.f32 1.442695, %v1106_v61  ;;  %v1148_v31 = vsel %vm1088_vm13, %v3622_v0, %v2661_v8  ;;  %v1158_v16 = vmul.f32 %v1146_v3, %v3219_v49 }
 0x6cd   :  { %v2658_v19 = vadd.f32 -1.0, %v2937_v17  ;;  %v1143_v44 = vsel %vm1083_vm14, %v3633_v45, %v2656_v23  ;;  %2944 = vpow2.f32 %v1125_v63  ;;  %v1159_v4 = vmul.f32 %v1147_v24, %v3217_v6 }
 0x6ce   :  { %v1144_v56 = vsel %vm1084_vm15, %v3636_v46, %v2657_v15  ;;  %v1155_v55 = vmul.f32 %v1143_v44, %v3219_v49  ;;  %2946 = vpow2.f32 %v1127_v37  ;;  %v1160_v45 = vmul.f32 %v1148_v31, %v3237_v57 }
 0x6cf   :  { %v1145_v26 = vsel %vm1085_vm0, %v3639_v50, %v2658_v19  ;;  %v1156_v0 = vmul.f32 %v1144_v56, %v3217_v6  ;;  %2948 = vpow2.f32 %v1129_v36  ;;  %vm1094_vm9 = vcmp.gt.f32.partialorder %v3671_v53, 0.0 }
 0x6d0   :  { %v1157_v33 = vmul.f32 %v1145_v26, %v3237_v57  ;;  %v1171_v59 = vpack.c.bf16 %v1158_v16, %v1155_v55  ;;  %v2939_v5 = vpop.eup %2938  ;;  %vm1750_vm11 = vcmask 908288   ;;  %vm1801_vm12 = vcmask 146432  }
 0x6d1   :  { %v1172_v38 = vpack.c.bf16 %v1159_v4, %v1156_v0  ;;  %v2941_v46 = vpop.eup %2940  ;;  %v2662_v7 = vadd.f32 -1.0, %v2939_v5  ;;  %vm1831_vm13 = vcmask 138240   ;;  %vm1861_vm14 = vcmask 154624  }
 0x6d2   :  { %v1173_v40 = vpack.c.bf16 %v1160_v45, %v1157_v33  ;;  %1177 = vst [vmem:[#allocation3 + $0x8] sm:$0xff] %v1171_v59  ;;  %v2943_v54 = vpop.eup %2942  ;;  %v2663_v10 = vadd.f32 -1.0, %v2941_v46 }
 0x6d3   :  { %1178 = vst [vmem:[#allocation3 + $0x10] sm:$0xff] %v1172_v38  ;;  %v2664_v25 = vadd.f32 -1.0, %v2943_v54  ;;  %v1149_v47 = vsel %vm1089_vm1, %v3648_v29, %v2662_v7 }
 0x6d4   :  { %1179 = vst [vmem:[#allocation3 + $0x18] sm:$0xff] %v1173_v40  ;;  %v1150_v61 = vsel %vm1090_vm5, %v3651_v52, %v2663_v10  ;;  %v1161_v24 = vmul.f32 %v1149_v47, %v3219_v49 }
 0x6d5   :  { %v1151_v3 = vsel %vm1091_vm6, %v3654_v30, %v2664_v25  ;;  %v1162_v37 = vmul.f32 %v1150_v61, %v3217_v6 }
 0x6d7   :  { %v2945_v50 = vpop.eup %2944 }
 0x6d8   :  { %v2947_v8 = vpop.eup %2946  ;;  %v2665_v51 = vadd.f32 -1.0, %v2945_v50 }
 0x6d9   :  { %v2949_v58 = vpop.eup %2948  ;;  %v2666_v62 = vadd.f32 -1.0, %v2947_v8  ;;  %v1605_v45 = vld [vmem:[#allocation3 + $0x8] sm:$0xf]  ;;  %v1670_v59 = vld [vmem:[#allocation3 + $0x8] sm:$0xf0] }
 0x6da   :  { %v2667_v23 = vadd.f32 -1.0, %v2949_v58  ;;  %v1152_v63 = vsel %vm1092_vm7, %v3665_v43, %v2665_v51  ;;  %v1677_v17 = vld [vmem:[#allocation3 + $0x10] sm:$0xf]  ;;  %v1163_v43 = vmul.f32 %v1151_v3, %v3237_v57  ;;  %v1761_v55 = vld [vmem:[#allocation3 + $0x10] sm:$0xf0] }
 0x6db   :  { %v1153_v29 = vsel %vm1093_vm8, %v3668_v22, %v2666_v62  ;;  %v1164_v15 = vmul.f32 %v1152_v63, %v3219_v49  ;;  %v1678_v52 = vld [vmem:[#allocation3 + $0x18] sm:$0xf]  ;;  %1686 = vrot.lane.b32.xlu1 %v1677_v17, %s2994_s29  ;;  %v1676_v22 = vld [vmem:[#allocation3 + $0x8] sm:$0xf]  ;;  %v1762_v56 = vld [vmem:[#allocation3 + $0x18] sm:$0xf0] }
 0x6dc   :  { %v1154_v30 = vsel %vm1094_vm9, %v3671_v53, %v2667_v23  ;;  %v1165_v36 = vmul.f32 %v1153_v29, %v3217_v6  ;;  %1688 = vrot.lane.b32.xlu0 %v1678_v52, %s2994_s29  ;;  %v1760_v53 = vld [vmem:[#allocation3 + $0x8] sm:$0xf0]  ;;  %v1613_v4 = vld [vmem:[#allocation3 + $0x18] sm:$0xf]  ;;  %v1606_v26 = vld [vmem:[#allocation3 + $0x10] sm:$0xf] }
 0x6dd   :  { %v1166_v31 = vmul.f32 %v1154_v30, %v3237_v57  ;;  %v1174_v19 = vpack.c.bf16 %v1164_v15, %v1161_v24  ;;  %v1612_v0 = vld [vmem:[#allocation3 + $0x10] sm:$0xf]  ;;  %1609 = vst [vmem:[#allocation4 + $0x8] sm:$0xf] %v1606_v26  ;;  %v1671_v33 = vld [vmem:[#allocation3 + $0x10] sm:$0xf0] }
 0x6de   :  { %v1175_v44 = vpack.c.bf16 %v1165_v36, %v1162_v37  ;;  %1608 = vst [vmem:[#allocation4] sm:$0xf] %v1605_v45  ;;  %1674 = vst [vmem:[#allocation4 + $0x38] sm:$0xf0] %v1671_v33  ;;  %v1607_v5 = vld [vmem:[#allocation3 + $0x18] sm:$0xf] }
 0x6df   :  { %v1176_v16 = vpack.c.bf16 %v1166_v31, %v1163_v43  ;;  %1180 = vst [vmem:[#allocation3 + $0x58] sm:$0xff] %v1174_v19  ;;  %1684 = vrot.lane.b32.xlu1 %v1676_v22, %s2994_s29  ;;  %v1672_v38 = vld [vmem:[#allocation3 + $0x18] sm:$0xf0]  ;;  %1673 = vst [vmem:[#allocation4 + $0x30] sm:$0xf0] %v1670_v59  ;;  %v1620_v46 = vrot.slane %v1612_v0, 4 }
 0x6e0   :  { %1181 = vst [vmem:[#allocation3 + $0x60] sm:$0xff] %v1175_v44  ;;  %1772 = vrot.lane.b32.xlu0 %v1762_v56, %s2994_s29  ;;  %1610 = vst [vmem:[#allocation4 + $0x10] sm:$0xf] %v1607_v5  ;;  %v1621_v40 = vrot.slane %v1613_v4, 4  ;;  %v1611_v54 = vld [vmem:[#allocation3 + $0x8] sm:$0xf] }
 0x6e1   :  { %1182 = vst [vmem:[#allocation3 + $0x68] sm:$0xff] %v1176_v16  ;;  %1675 = vst [vmem:[#allocation4 + $0x40] sm:$0xf0] %v1672_v38  ;;  %v1641_v7 = vld [vmem:[#allocation3 + $0x8] sm:$0xf0]  ;;  %v1619_v10 = vrot.slane %v1611_v54, 4 }
 0x6e2   :  { %v1649_v25 = vrot.slane %v1641_v7, 4  ;;  %v1642_v50 = vld [vmem:[#allocation3 + $0x10] sm:$0xf0]  ;;  %v1703_v8 = vld [vmem:[#allocation3 + $0x18] sm:$0xf] }
 0x6e3   :  { %1770 = vrot.lane.b32.xlu1 %v1761_v55, %s2994_s29  ;;  %v1650_v47 = vrot.slane %v1642_v50, 4  ;;  %v1711_v51 = vrot.slane %v1703_v8, 4  ;;  %v1702_v58 = vld [vmem:[#allocation3 + $0x10] sm:$0xf]  ;;  %v1701_v62 = vld [vmem:[#allocation3 + $0x8] sm:$0xf] }
 0x6e4   :  { %1768 = vrot.lane.b32.xlu0 %v1760_v53, %s2994_s29  ;;  %v1710_v24 = vrot.slane %v1702_v58, 4  ;;  %v1709_v15 = vrot.slane %v1701_v62, 4  ;;  %v1731_v52 = vld [vmem:[#allocation3 + $0x10] sm:$0xf0]  ;;  %v1732_v37 = vld [vmem:[#allocation3 + $0x18] sm:$0xf0] }
 0x6e5   :  { %v1739_v30 = vrot.slane %v1731_v52, 4  ;;  %v1740_v36 = vrot.slane %v1732_v37, 4  ;;  %v1730_v43 = vld [vmem:[#allocation3 + $0x8] sm:$0xf0]  ;;  %v1811_v19 = vld [vmem:[#allocation3 + $0x50] sm:$0xf] }
 0x6e6   :  { %v1896_v3 = vld [vmem:[#allocation3 + $0x58] sm:$0xf]  ;;  %v1960_v63 = vld [vmem:[#allocation3 + $0x58] sm:$0xf0]  ;;  %v1738_v31 = vrot.slane %v1730_v43, 4  ;;  %v1819_v56 = vrot.slane %v1811_v19, 4 }
 0x6e7   :  { %1625 = vrot.lane.b32.xlu1 %v1620_v46, %s2993_s24  ;;  %v1897_v61 = vld [vmem:[#allocation3 + $0x60] sm:$0xf]  ;;  %v1961_v23 = vld [vmem:[#allocation3 + $0x60] sm:$0xf0]  ;;  %1899 = vst [vmem:[#allocation4 + $0x120] sm:$0xf] %v1896_v3 }
 0x6e8   :  { %1627 = vrot.lane.b32.xlu0 %v1621_v40, %s2993_s24  ;;  %1900 = vst [vmem:[#allocation4 + $0x128] sm:$0xf] %v1897_v61  ;;  %1964 = vst [vmem:[#allocation4 + $0x158] sm:$0xf0] %v1961_v23  ;;  %v1898_v17 = vld [vmem:[#allocation3 + $0x68] sm:$0xf] }
 0x6e9   :  { %1963 = vst [vmem:[#allocation4 + $0x150] sm:$0xf0] %v1960_v63  ;;  %1901 = vst [vmem:[#allocation4 + $0x130] sm:$0xf] %v1898_v17  ;;  %v1962_v29 = vld [vmem:[#allocation3 + $0x68] sm:$0xf0] }
 0x6ea   :  { %1965 = vst [vmem:[#allocation4 + $0x160] sm:$0xf0] %v1962_v29  ;;  %v2169_v44 = vld [vmem:[#allocation3 + $0x78] sm:$0xf]  ;;  %v1787_v22 = vld [vmem:[#allocation3 + $0x60] sm:$0xf] }
 0x6eb   :  { %1623 = vrot.lane.b32.xlu1 %v1619_v10, %s2993_s24  ;;  %v1813_v16 = vld [vmem:[#allocation3 + $0x60] sm:$0xf]  ;;  %v2177_v53 = vrot.slane %v2169_v44, 4  ;;  %v1786_v4 = vld [vmem:[#allocation3 + $0x58] sm:$0xf] }
 0x6ec   :  { %1654 = vrot.lane.b32.xlu0 %v1649_v25, %s3002_s21  ;;  %v1821_v55 = vrot.slane %v1813_v16, 4  ;;  %v1812_v26 = vld [vmem:[#allocation3 + $0x58] sm:$0xf]  ;;  %v1785_v25 = vld [vmem:[#allocation3 + $0x50] sm:$0xf] }
 0x6ed   :  { %v2844_v0 = vpack.i.bf16 %v2177_v53, %v1819_v56  ;;  %v1820_v45 = vrot.slane %v1812_v26, 4  ;;  %v1871_v50 = vld [vmem:[#allocation3 + $0x50] sm:$0xf0]  ;;  %v1843_v61 = vld [vmem:[#allocation3 + $0x60] sm:$0xf0] }
 0x6ee   :  { %v2839_v58 = vpack.i.bf16 %v1871_v50, %v1785_v25  ;;  %v1851_v62 = vrot.slane %v1843_v61, 4  ;;  %v1842_v3 = vld [vmem:[#allocation3 + $0x58] sm:$0xf0]  ;;  %v1873_v17 = vld [vmem:[#allocation3 + $0x60] sm:$0xf0] }
 0x6ef   :  { %1656 = vrot.lane.b32.xlu1 %v1650_v47, %s3002_s21  ;;  %v1850_v23 = vrot.slane %v1842_v3, 4  ;;  %v1903_v29 = vld [vmem:[#allocation3 + $0x60] sm:$0xf]  ;;  %v1904_v44 = vld [vmem:[#allocation3 + $0x68] sm:$0xf] }
 0x6f0   :  { %1717 = vrot.lane.b32.xlu0 %v1711_v51, %s2995_s30  ;;  %v1911_v37 = vrot.slane %v1903_v29, 4  ;;  %v1614_v43 = vld [vmem:[#allocation3 + $0x20] sm:$0xf]  ;;  %v1912_v56 = vrot.slane %v1904_v44, 4  ;;  %v2093_v61 = vld [vmem:[#allocation3 + $0x48] sm:$0xf0] }
 0x6f1   :  { %v2287_v3 = vld [vmem:[#allocation3 + $0x78] sm:$0xf0]  ;;  %v2122_v29 = vld [vmem:[#allocation3 + $0x48] sm:$0xf0]  ;;  %v1905_v44 = vld [vmem:[#allocation3 + $0x70] sm:$0xf] }
 0x6f3   :  { %1715 = vrot.lane.b32.xlu1 %v1710_v24, %s2995_s30 }
 0x6f4   :  { %1713 = vrot.lane.b32.xlu0 %v1709_v15, %s2995_s30  ;;  %v1841_v15 = vld [vmem:[#allocation3 + $0x50] sm:$0xf0] }
 0x6f7   :  { %1744 = vrot.lane.b32.xlu1 %v1739_v30, %s3003_s22  ;;  %v1849_v30 = vrot.slane %v1841_v15, 4 }
 0x6f8   :  { %1746 = vrot.lane.b32.xlu0 %v1740_v36, %s3003_s22  ;;  %v1902_v36 = vld [vmem:[#allocation3 + $0x58] sm:$0xf] }
 0x6f9   :  { %v1910_v19 = vrot.slane %v1902_v36, 4 }
 0x6fb   :  { %1742 = vrot.lane.b32.xlu1 %v1738_v31, %s3003_s22  ;;  %v1975_v31 = vld [vmem:[#allocation3 + $0x48] sm:$0xf] }
 0x6fc   :  { %1797 = vrot.lane.b32.xlu0 %v1787_v22, %s3004_s23  ;;  %v1622_v22 = vrot.slane %v1614_v43, 4  ;;  %v1983_v16 = vrot.slane %v1975_v31, 4  ;;  %v1788_v43 = vld [vmem:[#allocation3 + $0x68] sm:$0xf] }
 0x6ff   :  { %1795 = vrot.lane.b32.xlu1 %v1786_v4, %s3004_s23  ;;  %v2001_v4 = vld [vmem:[#allocation3 + $0x28] sm:$0xf0] }
 0x700   :  { %1827 = vrot.lane.b32.xlu0 %v1821_v55, %s3005_s25  ;;  %v2849_v55 = vpack.i.bf16 %v1622_v22, %v1983_v16 }
 0x703   :  { %1825 = vrot.lane.b32.xlu1 %v1820_v45, %s3005_s25  ;;  %v2227_v45 = vld [vmem:[#allocation3 + $0x78] sm:$0xf0] }
 0x704   :  { %2845 = vrot.lane.b32.xlu0 %v2844_v0, %s3005_s25  ;;  %v2144_v0 = vld [vmem:[#allocation3 + $0x78] sm:$0xf] }
 0x708   :  { %v2774_v33 = vpop.f32.mrb[12].mxu1 }
 0x709   :  { %v1440_v59 = vadd.f32 1e-05, %v2774_v33  ;;  %v1434_v5 = vpop.f32.mrb[13].mxu1  ;;  %v2009_v33 = vrot.slane %v2001_v4, 4 }
 0x70a   :  { %v1435_v38 = vadd.f32 1e-05, %v1434_v5  ;;  %v1643_v5 = vld [vmem:[#allocation3 + $0x18] sm:$0xf0] }
 0x70b   :  { %2950 = vrsqrt.f32 %v1440_v59  ;;  %v2874_v59 = vpack.i.bf16 %v2227_v45, %v2144_v0  ;;  %v1874_v0 = vld [vmem:[#allocation3 + $0x68] sm:$0xf0] }
 0x70c   :  { %2952 = vrsqrt.f32 %v1435_v38  ;;  %v2777_v46 = vpop.f32.mrb[14].mxu1  ;;  %v1814_v38 = vld [vmem:[#allocation3 + $0x68] sm:$0xf] }
 0x70d   :  { %v1444_v40 = vpop.f32.mrb[15].mxu1  ;;  %v1450_v54 = vadd.f32 1e-05, %v2777_v46  ;;  %v1679_v46 = vld [vmem:[#allocation3 + $0x20] sm:$0xf]  ;;  %v1822_v25 = vrot.slane %v1814_v38, 4 }
 0x70e   :  { %v1445_v10 = vadd.f32 1e-05, %v1444_v40  ;;  %v2039_v40 = vld [vmem:[#allocation3 + $0x48] sm:$0xf] }
 0x70f   :  { %2954 = vrsqrt.f32 %v1450_v54  ;;  %v1704_v54 = vld [vmem:[#allocation3 + $0x20] sm:$0xf]  ;;  %v2854_v50 = vpack.i.bf16 %v1679_v46, %v2039_v40 }
 0x710   :  { %2956 = vrsqrt.f32 %v1445_v10  ;;  %v1651_v10 = vrot.slane %v1643_v5, 4 }
 0x715   :  { %v2951_v7 = vpop.eup %2950 }
 0x716   :  { %v2953_v8 = vpop.eup %2952  ;;  %v1458_v47 = vmul.f32 %v2951_v7, %v3592_v14  ;;  %v1872_v14 = vld [vmem:[#allocation3 + $0x58] sm:$0xf0]  ;;  %v2064_v7 = vld [vmem:[#allocation3 + $0x48] sm:$0xf] }
 0x717   :  { %v1457_v51 = vmul.f32 %v2953_v8, %v3589_v18  ;;  %v1844_v8 = vld [vmem:[#allocation3 + $0x68] sm:$0xf0] }
 0x718   :  { %1468 = vperm.xlu1 %2838, %v1458_v47   ;;  %v1712_v47 = vrot.slane %v1704_v54, 4 }
 0x719   :  { %1463 = vperm.xlu0 %2831, %v1457_v51   ;;  %v2955_v63 = vpop.eup %2954  ;;  %v2072_v51 = vrot.slane %v2064_v7, 4 }
 0x71a   :  { %v2957_v18 = vpop.eup %2956  ;;  %v1460_v24 = vmul.f32 %v2955_v63, %v3604_v20  ;;  %v1933_v20 = vld [vmem:[#allocation3 + $0x60] sm:$0xf0] }
 0x71b   :  { %v1459_v52 = vmul.f32 %v2957_v18, %v3599_v39  ;;  %v1941_v53 = vrot.slane %v1933_v20, 4  ;;  %v1932_v39 = vld [vmem:[#allocation3 + $0x58] sm:$0xf0]  ;;  %v2295_v18 = vrot.slane %v2287_v3, 4  ;;  %v2261_v20 = vld [vmem:[#allocation3 + $0x98] sm:$0xf] }
 0x71c   :  { %2840 = vrot.lane.b32.xlu1 %v2839_v58, %s3004_s23  ;;  %v1940_v26 = vrot.slane %v1932_v39, 4  ;;  %v1733_v58 = vld [vmem:[#allocation3 + $0x20] sm:$0xf0]  ;;  %v2269_v39 = vrot.slane %v2261_v20, 4 }
 0x71d   :  { %1857 = vrot.lane.b32.xlu0 %v1851_v62, %s3006_s26  ;;  %v1852_v62 = vrot.slane %v1844_v8, 4  ;;  %v1741_v63 = vrot.slane %v1733_v58, 4 }
 0x720   :  { %1855 = vrot.lane.b32.xlu1 %v1850_v23, %s3006_s26  ;;  %v2859_v23 = vpack.i.bf16 %v1712_v47, %v2072_v51 }
 0x721   :  { %1883 = vrot.lane.b32.xlu0 %v1873_v17, %s3004_s23  ;;  %v2101_v17 = vrot.slane %v2093_v61, 4 }
 0x724   :  { %1881 = vrot.lane.b32.xlu1 %v1872_v14, %s3004_s23  ;;  %v2864_v14 = vpack.i.bf16 %v1741_v63, %v2101_v17 }
 0x725   :  { %1478 = vperm.xlu0 %2831, %v1460_v24   ;;  %v1763_v24 = vld [vmem:[#allocation3 + $0x20] sm:$0xf0] }
 0x726   :  { %v2869_v15 = vpack.i.bf16 %v1763_v24, %v2122_v29 }
 0x728   :  { %1473 = vperm.xlu1 %2838, %v1459_v52   ;;  %v3765_v52 = vpop.permute.xlu0 %2834 }
 0x729   :  { %1916 = vrot.lane.b32.xlu0 %v1911_v37, %s2993_s24  ;;  %v2198_v37 = vld [vmem:[#allocation3 + $0x78] sm:$0xf0]  ;;  %v2836_v38 = vunpack.i.l.bf16 %v3765_v52 }
 0x72c   :  { %1853 = vrot.lane.b32.xlu1 %v1849_v30, %s3006_s26 }
 0x72d   :  { %1914 = vrot.lane.b32.xlu0 %v1910_v19, %s2993_s24  ;;  %v2206_v19 = vrot.slane %v2198_v37, 4 }
 0x730   :  { %1918 = vrot.lane.b32.xlu1 %v1912_v56, %s2993_s24 }
 0x731   :  { %1947 = vrot.lane.b32.xlu0 %v1941_v53, %s3002_s21  ;;  %v1913_v53 = vrot.slane %v1905_v44, 4 }
 0x734   :  { %1945 = vrot.lane.b32.xlu1 %v1940_v26, %s3002_s21 }
 0x735   :  { %2850 = vrot.lane.b32.xlu0 %v2849_v55, %s2993_s24 }
 0x738   :  { %2013 = vrot.lane.b32.xlu1 %v2009_v33, %s3002_s21  ;;  %v2879_v33 = vpack.i.bf16 %v1913_v53, %v2269_v39 }
 0x739   :  { %2875 = vrot.lane.b32.xlu0 %v2874_v59, %s3004_s23 }
 0x73c   :  { %1658 = vrot.lane.b32.xlu1 %v1651_v10, %s3002_s21 }
 0x73d   :  { %1829 = vrot.lane.b32.xlu0 %v1822_v25, %s3005_s25 }
 0x740   :  { %2855 = vrot.lane.b32.xlu1 %v2854_v50, %s2994_s29 }
 0x741   :  { %1859 = vrot.lane.b32.xlu0 %v1852_v62, %s3006_s26 }
 0x744   :  { %2860 = vrot.lane.b32.xlu1 %v2859_v23, %s2995_s30 }
 0x745   :  { %2299 = vrot.lane.b32.xlu0 %v2295_v18, %s3002_s21 }
 0x748   :  { %2865 = vrot.lane.b32.xlu1 %v2864_v14, %s3003_s22 }
 0x74c   :  { %2870 = vrot.lane.b32.xlu1 %v2869_v15, %s2994_s29 }
 0x74d   :  { %v1687_v30 = vpop.permute.xlu1 %1686 }
 0x74e   :  { %v3768_v36 = vpop.permute.xlu0 %1688 }
 0x74f   :  { %v1693_v31 = vsel %vm85_vm3, %v1687_v30, %v3768_v36 }
 0x750   :  { %1799 = vrot.lane.b32.xlu1 %v1788_v43, %s3004_s23  ;;  %1699 = vst [vmem:[#allocation4 + $0x68] sm:$0xf] %v1693_v31 }
 0x751   :  { %v1685_v22 = vpop.permute.xlu1 %1684 }
 0x752   :  { %v3773_v16 = vpop.permute.xlu0 %1772  ;;  %v1692_v56 = vsel %vm85_vm3, %v1685_v22, %v1687_v30 }
 0x753   :  { %1698 = vst [vmem:[#allocation4 + $0x60] sm:$0xf] %v1692_v56 }
 0x754   :  { %2210 = vrot.lane.b32.xlu1 %v2206_v19, %s3006_s26 }
 0x755   :  { %v1771_v55 = vpop.permute.xlu1 %1770 }
 0x756   :  { %v1769_v4 = vpop.permute.xlu0 %1768  ;;  %v1777_v26 = vsel %vm85_vm3, %v1771_v55, %v3773_v16 }
 0x757   :  { %v1776_v45 = vsel %vm85_vm3, %v1769_v4, %v1771_v55  ;;  %1783 = vst [vmem:[#allocation4 + $0x98] sm:$0xf0] %v1777_v26 }
 0x758   :  { %1885 = vrot.lane.b32.xlu1 %v1874_v0, %s3004_s23  ;;  %1782 = vst [vmem:[#allocation4 + $0x90] sm:$0xf0] %v1776_v45 }
 0x759   :  { %v1626_v59 = vpop.permute.xlu1 %1625 }
 0x75a   :  { %v3781_v5 = vpop.permute.xlu0 %1627 }
 0x75b   :  { %v1632_v46 = vsel %vm49_vm2, %v1626_v59, %v3781_v5 }
 0x75c   :  { %2880 = vrot.lane.b32.xlu1 %v2879_v33, %s2993_s24  ;;  %1638 = vst [vmem:[#allocation4 + $0x8] sm:$0xf0] %v1632_v46 }
 0x75d   :  { %v1624_v40 = vpop.permute.xlu1 %1623 }
 0x75e   :  { %v1655_v54 = vpop.permute.xlu0 %1654  ;;  %v1631_v7 = vsel %vm49_vm2, %v1624_v40, %v1626_v59 }
 0x75f   :  { %v1661_v10 = vsel %vm1660_vm10, %v2836_v38, %v1655_v54  ;;  %1637 = vst [vmem:[#allocation4] sm:$0xf0] %v1631_v7 }
 0x760   :  { %1667 = vst [vmem:[#allocation4 + $0x30] sm:$0xf] %v1661_v10 }
 0x761   :  { %v3789_v25 = vpop.permute.xlu1 %1656 }
 0x762   :  { %v3791_v50 = vpop.permute.xlu0 %1717  ;;  %v1662_v8 = vsel %vm1660_vm10, %v1655_v54, %v3789_v25 }
 0x763   :  { %1668 = vst [vmem:[#allocation4 + $0x38] sm:$0xf] %v1662_v8  ;;  %v2327_v47 = vld [vmem:[#allocation4 + $0x8] sm:$0xff] }
 0x764   :  { %2402 = vmatprep.subr.bf16.mxu1 %v2327_v47 }
 0x765   :  { %v1716_v51 = vpop.permute.xlu1 %1715 }
 0x766   :  { %v1714_v58 = vpop.permute.xlu0 %1713  ;;  %v1722_v61 = vsel %vm103_vm4, %v1716_v51, %v3791_v50  ;;  %v2326_v62 = vld [vmem:[#allocation4] sm:$0xff] }
 0x767   :  { %v1721_v3 = vsel %vm103_vm4, %v1714_v58, %v1716_v51  ;;  %1728 = vst [vmem:[#allocation4 + $0x68] sm:$0xf0] %v1722_v61  ;;  %2403 = vmatpush1.bf16.msra.mxu1 %v2326_v62  ;;  %v2332_v14 = vld [vmem:[#allocation4 + $0x30] sm:$0xff] }
 0x768   :  { %1727 = vst [vmem:[#allocation4 + $0x60] sm:$0xf0] %v1721_v3 }
 0x769   :  { %v1745_v23 = vpop.permute.xlu1 %1744 }
 0x76a   :  { %v3798_v63 = vpop.permute.xlu0 %1746  ;;  %v2333_v17 = vld [vmem:[#allocation4 + $0x38] sm:$0xff] }
 0x76b   :  { %v1752_v18 = vsel %vm1750_vm11, %v1745_v23, %v3798_v63  ;;  %2404 = vmatprep.subr.bf16.mxu1 %v2333_v17 }
 0x76c   :  { %1758 = vst [vmem:[#allocation4 + $0x98] sm:$0xf] %v1752_v18  ;;  %2405 = vmatpush1.bf16.msra.mxu1 %v2332_v14 }
 0x76d   :  { %v1743_v24 = vpop.permute.xlu1 %1742 }
 0x76e   :  { %v3802_v29 = vpop.permute.xlu0 %1797  ;;  %v1751_v15 = vsel %vm1750_vm11, %v1743_v24, %v1745_v23  ;;  %v2339_v37 = vld [vmem:[#allocation4 + $0x68] sm:$0xff] }
 0x76f   :  { %1757 = vst [vmem:[#allocation4 + $0x90] sm:$0xf] %v1751_v15  ;;  %2406 = vmatprep.subr.bf16.mxu1 %v2339_v37  ;;  %v2338_v30 = vld [vmem:[#allocation4 + $0x60] sm:$0xff] }
 0x770   :  { %2407 = vmatpush1.bf16.msra.mxu1 %v2338_v30 }
 0x771   :  { %v1796_v43 = vpop.permute.xlu1 %1795 }
 0x772   :  { %v3805_v31 = vpop.permute.xlu0 %1827  ;;  %v1803_v19 = vsel %vm1801_vm12, %v1796_v43, %v3802_v29 }
 0x773   :  { %1809 = vst [vmem:[#allocation4 + $0xc8] sm:$0xf] %v1803_v19  ;;  %v2345_v44 = vld [vmem:[#allocation4 + $0x98] sm:$0xff] }
 0x774   :  { %2408 = vmatprep.subr.bf16.mxu1 %v2345_v44 }
 0x775   :  { %v1826_v20 = vpop.permute.xlu1 %1825 }
 0x776   :  { %v3809_v22 = vpop.permute.xlu0 %2845  ;;  %v1833_v56 = vsel %vm1831_vm13, %v1826_v20, %v3805_v31  ;;  %v2344_v53 = vld [vmem:[#allocation4 + $0x90] sm:$0xff] }
 0x777   :  { %v2847_v39 = vunpack.i.l.bf16 %v3809_v22  ;;  %1839 = vst [vmem:[#allocation4 + $0xc8] sm:$0xf0] %v1833_v56  ;;  %2409 = vmatpush1.bf16.msra.mxu1 %v2344_v53 }
 0x779   :  { %v1832_v55 = vsel %vm1831_vm13, %v2847_v39, %v1826_v20 }
 0x77a   :  { %1838 = vst [vmem:[#allocation4 + $0xc0] sm:$0xf0] %v1832_v55 }
 0x77e   :  { %v2351_v4 = vld [vmem:[#allocation4 + $0xc8] sm:$0xff] }
 0x77f   :  { %2410 = vmatprep.subr.bf16.mxu1 %v2351_v4 }
 0x797   :  { %v1469_v26 = vpop.permute.xlu1 %1468 }
 0x798   :  { %v1484_v0 = vmul.f32 %v1469_v26, %v3504_v34  ;;  %v1485_v45 = vmul.f32 %v1469_v26, %v3507_v35  ;;  %v1486_v33 = vmul.f32 %v1469_v26, %v3510_v42  ;;  %v1464_v59 = vpop.permute.xlu0 %1463 }
 0x799   :  { %v1481_v38 = vmul.f32 %v1464_v59, %v3513_v9  ;;  %v1482_v46 = vmul.f32 %v1464_v59, %v3516_v21  ;;  %v1483_v40 = vmul.f32 %v1464_v59, %v3519_v2 }
 0x79a   :  { %v3822_v54 = vadd.f32 %v1484_v0, %v3608_v41  ;;  %v3825_v7 = vadd.f32 %v1485_v45, %v3608_v41  ;;  %v3828_v10 = vadd.f32 %v1486_v33, %v3608_v41  ;;  %v2837_v45 = vunpack.i.h.bf16 %v3765_v52 }
 0x79b   :  { %v3831_v34 = vadd.f32 %v1481_v38, %v3626_v13  ;;  %v3834_v35 = vadd.f32 %v1482_v46, %v3626_v13  ;;  %v3837_v42 = vadd.f32 %v1483_v40, %v3626_v13  ;;  %v2841_v9 = vpop.permute.xlu1 %2840 }
 0x79c   :  { %v1520_v21 = vmin.f32 %v3822_v54, 0.0  ;;  %v3840_v2 = vpop.permute.xlu0 %1857  ;;  %v1521_v8 = vmin.f32 %v3825_v7, 0.0  ;;  %v1522_v47 = vmin.f32 %v3828_v10, 0.0  ;;  %v2843_v3 = vunpack.i.h.bf16 %v2841_v9 }
 0x79d   :  { %v1517_v51 = vmin.f32 %v3831_v34, 0.0  ;;  %v1518_v58 = vmin.f32 %v3834_v35, 0.0  ;;  %v1519_v13 = vmin.f32 %v3837_v42, 0.0  ;;  %v2842_v14 = vunpack.i.l.bf16 %v2841_v9 }
 0x79e   :  { %v1535_v41 = vmul.f32 1.442695, %v1520_v21  ;;  %v1537_v61 = vmul.f32 1.442695, %v1521_v8  ;;  %v1539_v62 = vmul.f32 1.442695, %v1522_v47 }
 0x79f   :  { %v3847_v23 = vpop.permute.xlu1 %1855  ;;  %v1529_v17 = vmul.f32 1.442695, %v1517_v51  ;;  %v1531_v18 = vmul.f32 1.442695, %v1518_v58  ;;  %v1533_v15 = vmul.f32 1.442695, %v1519_v13  ;;  %v1802_v30 = vsel %vm1801_vm12, %v2842_v14, %v1796_v43 }
 0x7a0   :  { %2958 = vpow2.f32 %v1535_v41  ;;  %v3849_v24 = vpop.permute.xlu0 %1883  ;;  %v1863_v37 = vsel %vm1861_vm14, %v3847_v23, %v3840_v2  ;;  %1808 = vst [vmem:[#allocation4 + $0xc0] sm:$0xf] %v1802_v30  ;;  %vm1508_vm15 = vcmp.gt.f32.partialorder %v3822_v54, 0.0  ;;  %vm1509_vm0 = vcmp.gt.f32.partialorder %v3825_v7, 0.0 }
 0x7a1   :  { %2960 = vpow2.f32 %v1537_v61  ;;  %1869 = vst [vmem:[#allocation4 + $0xf8] sm:$0xf] %v1863_v37  ;;  %vm1510_vm1 = vcmp.gt.f32.partialorder %v3828_v10, 0.0  ;;  %vm1505_vm5 = vcmp.gt.f32.partialorder %v3831_v34, 0.0  ;;  %vm1506_vm6 = vcmp.gt.f32.partialorder %v3834_v35, 0.0 }
 0x7a2   :  { %2962 = vpow2.f32 %v1539_v62  ;;  %vm1507_vm7 = vcmp.gt.f32.partialorder %v3837_v42, 0.0 }
 0x7a3   :  { %2964 = vpow2.f32 %v1529_v17  ;;  %v1882_v19 = vpop.permute.xlu1 %1881 }
 0x7a4   :  { %2966 = vpow2.f32 %v1531_v18  ;;  %v1887_v44 = vsel %vm1801_vm12, %v2843_v3, %v1882_v19  ;;  %v1888_v20 = vsel %vm1801_vm12, %v1882_v19, %v3849_v24  ;;  %v1479_v56 = vpop.permute.xlu0 %1478 }
 0x7a5   :  { %2968 = vpow2.f32 %v1533_v15  ;;  %1893 = vst [vmem:[#allocation4 + $0xf0] sm:$0xf0] %v1887_v44  ;;  %1894 = vst [vmem:[#allocation4 + $0xf8] sm:$0xf0] %v1888_v20  ;;  %v1490_v53 = vmul.f32 %v1479_v56, %v3540_v11  ;;  %v1491_v39 = vmul.f32 %v1479_v56, %v3543_v32  ;;  %v1492_v43 = vmul.f32 %v1479_v56, %v3546_v60 }
 0x7a7   :  { %v3862_v55 = vadd.f32 %v1490_v53, %v3662_v1  ;;  %v3865_v4 = vadd.f32 %v1491_v39, %v3662_v1  ;;  %v3868_v26 = vadd.f32 %v1492_v43, %v3662_v1  ;;  %v1474_v0 = vpop.permute.xlu1 %1473 }
 0x7a8   :  { %v1487_v11 = vmul.f32 %v1474_v0, %v3549_v28  ;;  %v3873_v33 = vpop.permute.xlu0 %1916  ;;  %v1488_v60 = vmul.f32 %v1474_v0, %v3552_v12  ;;  %v1489_v59 = vmul.f32 %v1474_v0, %v3559_v27  ;;  %v2350_v28 = vld [vmem:[#allocation4 + $0xc0] sm:$0xff] }
 0x7a9   :  { %v1526_v32 = vmin.f32 %v3862_v55, 0.0  ;;  %v1527_v1 = vmin.f32 %v3865_v4, 0.0  ;;  %v1528_v46 = vmin.f32 %v3868_v26, 0.0  ;;  %2411 = vmatpush1.bf16.msra.mxu1 %v2350_v28  ;;  %vm1514_vm8 = vcmp.gt.f32.partialorder %v3862_v55, 0.0 }
 0x7aa   :  { %v2959_v38 = vpop.eup %2958  ;;  %v3886_v51 = vadd.f32 %v1487_v11, %v3610_v48  ;;  %v3892_v3 = vadd.f32 %v1488_v60, %v3610_v48  ;;  %v3895_v17 = vadd.f32 %v1489_v59, %v3610_v48  ;;  %vm1515_vm9 = vcmp.gt.f32.partialorder %v3865_v4, 0.0 }
 0x7ab   :  { %v2961_v40 = vpop.eup %2960  ;;  %v2679_v9 = vadd.f32 -1.0, %v2959_v38  ;;  %v1547_v21 = vmul.f32 1.442695, %v1526_v32  ;;  %v1854_v12 = vpop.permute.xlu1 %1853  ;;  %v1549_v47 = vmul.f32 1.442695, %v1527_v1 }
 0x7ac   :  { %v2963_v27 = vpop.eup %2962  ;;  %v2680_v8 = vadd.f32 -1.0, %v2961_v40  ;;  %v1551_v41 = vmul.f32 1.442695, %v1528_v46  ;;  %v1915_v58 = vpop.permute.xlu0 %1914  ;;  %v2357_v18 = vld [vmem:[#allocation4 + $0xf8] sm:$0xff]  ;;  %v1523_v0 = vmin.f32 %v3886_v51, 0.0  ;;  %v1524_v11 = vmin.f32 %v3892_v3, 0.0 }
 0x7ad   :  { %v2965_v61 = vpop.eup %2964  ;;  %v2681_v62 = vadd.f32 -1.0, %v2963_v27  ;;  %v1568_v13 = vsel %vm1508_vm15, %v3822_v54, %v2679_v9  ;;  %2970 = vpow2.f32 %v1547_v21  ;;  %2412 = vmatprep.subr.bf16.mxu1 %v2357_v18  ;;  %v1862_v59 = vsel %vm1861_vm14, %v1854_v12, %v3847_v23 }
 0x7ae   :  { %v2967_v14 = vpop.eup %2966  ;;  %v1569_v15 = vsel %vm1509_vm0, %v3825_v7, %v2680_v8  ;;  %v1580_v37 = vmul.f32 %v1568_v13, %v3219_v49  ;;  %v2676_v30 = vadd.f32 -1.0, %v2965_v61  ;;  %2972 = vpow2.f32 %v1549_v47  ;;  %1868 = vst [vmem:[#allocation4 + $0xf0] sm:$0xf] %v1862_v59 }
 0x7af   :  { %v2969_v19 = vpop.eup %2968  ;;  %v1570_v54 = vsel %vm1510_vm1, %v3828_v10, %v2681_v62  ;;  %v1581_v44 = vmul.f32 %v1569_v15, %v3217_v6  ;;  %v2677_v48 = vadd.f32 -1.0, %v2967_v14  ;;  %v3905_v20 = vpop.permute.xlu1 %1918  ;;  %2974 = vpow2.f32 %v1551_v41 }
 0x7b0   :  { %v1582_v56 = vmul.f32 %v1570_v54, %v3237_v57  ;;  %v2678_v53 = vadd.f32 -1.0, %v2969_v19  ;;  %v1565_v7 = vsel %vm1505_vm5, %v3831_v34, %v2676_v30  ;;  %v3911_v39 = vpop.permute.xlu0 %1947  ;;  %v1525_v34 = vmin.f32 %v3895_v17, 0.0 }
 0x7b1   :  { %v1566_v10 = vsel %vm1506_vm6, %v3834_v35, %v2677_v48  ;;  %v1577_v43 = vmul.f32 %v1565_v7, %v3219_v49  ;;  %v1541_v1 = vmul.f32 1.442695, %v1523_v0  ;;  %v1543_v46 = vmul.f32 1.442695, %v1524_v11 }
 0x7b2   :  { %v1567_v32 = vsel %vm1507_vm7, %v3837_v42, %v2678_v53  ;;  %v1578_v60 = vmul.f32 %v1566_v10, %v3217_v6  ;;  %v1545_v9 = vmul.f32 1.442695, %v1525_v34  ;;  %v1922_v21 = vsel %vm49_vm2, %v1915_v58, %v3873_v33 }
 0x7b3   :  { %v1579_v38 = vmul.f32 %v1567_v32, %v3237_v57  ;;  %v1593_v35 = vpack.c.bf16 %v1580_v37, %v1577_v43  ;;  %v1946_v28 = vpop.permute.xlu1 %1945  ;;  %v1923_v42 = vsel %vm49_vm2, %v3873_v33, %v3905_v20  ;;  %2976 = vpow2.f32 %v1541_v1  ;;  %1928 = vst [vmem:[#allocation4 + $0x120] sm:$0xf0] %v1922_v21 }
 0x7b4   :  { %v1594_v40 = vpack.c.bf16 %v1581_v44, %v1578_v60  ;;  %v3932_v27 = vpop.permute.xlu0 %2850  ;;  %1929 = vst [vmem:[#allocation4 + $0x128] sm:$0xf0] %v1923_v42  ;;  %v1951_v23 = vsel %vm1660_vm10, %v2837_v45, %v1946_v28  ;;  %v1952_v12 = vsel %vm1660_vm10, %v1946_v28, %v3911_v39  ;;  %2978 = vpow2.f32 %v1543_v46 }
 0x7b5   :  { %v1595_v8 = vpack.c.bf16 %v1582_v56, %v1579_v38  ;;  %1599 = vst [vmem:[#allocation3 + $0x30] sm:$0xff] %v1593_v35  ;;  %1957 = vst [vmem:[#allocation4 + $0x150] sm:$0xf] %v1951_v23  ;;  %v2853_v33 = vunpack.i.h.bf16 %v3932_v27  ;;  %2980 = vpow2.f32 %v1545_v9  ;;  %v2356_v62 = vld [vmem:[#allocation4 + $0xf0] sm:$0xff]  ;;  %vm1516_vm15 = vcmp.gt.f32.partialorder %v3868_v26, 0.0 }
 0x7b6   :  { %1600 = vst [vmem:[#allocation3 + $0x38] sm:$0xff] %v1594_v40  ;;  %1958 = vst [vmem:[#allocation4 + $0x158] sm:$0xf] %v1952_v12  ;;  %2413 = vmatpush1.bf16.msra.mxu1 %v2356_v62  ;;  %vm1511_vm0 = vcmp.gt.f32.partialorder %v3886_v51, 0.0  ;;  %vm1512_vm1 = vcmp.gt.f32.partialorder %v3892_v3, 0.0  ;;  %vm1513_vm5 = vcmp.gt.f32.partialorder %v3895_v17, 0.0 }
 0x7b7   :  { %1601 = vst [vmem:[#allocation3 + $0x40] sm:$0xff] %v1595_v8  ;;  %v3940_v47 = vpop.permute.xlu1 %2013  ;;  %v2971_v41 = vpop.eup %2970  ;;  %v1633_v58 = vsel %vm49_vm2, %v3781_v5, %v2853_v33 }
 0x7b8   :  { %v3944_v52 = vpop.permute.xlu0 %2875  ;;  %v2973_v45 = vpop.eup %2972  ;;  %1639 = vst [vmem:[#allocation4 + $0x10] sm:$0xf0] %v1633_v58  ;;  %v2685_v18 = vadd.f32 -1.0, %v2971_v41 }
 0x7b9   :  { %v2975_v61 = vpop.eup %2974  ;;  %v2686_v14 = vadd.f32 -1.0, %v2973_v45 }
 0x7ba   :  { %v2687_v48 = vadd.f32 -1.0, %v2975_v61  ;;  %v2362_v56 = vld [vmem:[#allocation4 + $0x120] sm:$0xff]  ;;  %v1574_v7 = vsel %vm1514_vm8, %v3862_v55, %v2685_v18 }
 0x7bb   :  { %v1659_v13 = vpop.permute.xlu1 %1658  ;;  %v2363_v15 = vld [vmem:[#allocation4 + $0x128] sm:$0xff]  ;;  %v1575_v10 = vsel %vm1515_vm9, %v3865_v4, %v2686_v14  ;;  %v1586_v40 = vmul.f32 %v1574_v7, %v3219_v49  ;;  %v4011_v7 = vld [vmem:[#allocation3] sm:$0xff] }
 0x7bc   :  { %v2036_v37 = vld [vmem:[#allocation3 + $0x30] sm:$0xf]  ;;  %v1663_v30 = vsel %vm1660_vm10, %v3789_v25, %v1659_v13  ;;  %v1830_v19 = vpop.permute.xlu0 %1829  ;;  %2414 = vmatprep.subr.bf16.mxu1 %v2363_v15  ;;  %v1576_v4 = vsel %vm1516_vm15, %v3868_v26, %v2687_v48  ;;  %v2119_v42 = vld [vmem:[#allocation3 + $0x30] sm:$0xf0] }
 0x7bd   :  { %v2037_v54 = vld [vmem:[#allocation3 + $0x38] sm:$0xf]  ;;  %2044 = vrot.lane.b32.xlu0 %v2036_v37, %s2994_s29  ;;  %1669 = vst [vmem:[#allocation4 + $0x40] sm:$0xf] %v1663_v30  ;;  %v1834_v5 = vsel %vm1831_vm13, %v3805_v31, %v1830_v19  ;;  %v2977_v53 = vpop.eup %2976  ;;  %2415 = vmatpush1.bf16.msra.mxu1 %v2362_v56  ;;  %v2368_v0 = vld [vmem:[#allocation4 + $0x150] sm:$0xff]  ;;  %v1588_v12 = vmul.f32 %v1576_v4, %v3237_v57 }
 0x7be   :  { %v2369_v44 = vld [vmem:[#allocation4 + $0x158] sm:$0xff]  ;;  %2046 = vrot.lane.b32.xlu1 %v2037_v54, %s2994_s29  ;;  %1840 = vst [vmem:[#allocation4 + $0xd0] sm:$0xf0] %v1834_v5  ;;  %v2979_v31 = vpop.eup %2978  ;;  %v2682_v43 = vadd.f32 -1.0, %v2977_v53  ;;  %v2038_v11 = vld [vmem:[#allocation3 + $0x40] sm:$0xf] }
 0x7bf   :  { %v3957_v25 = vpop.permute.xlu1 %2855  ;;  %2416 = vmatprep.subr.bf16.mxu1 %v2369_v44  ;;  %v2981_v34 = vpop.eup %2980  ;;  %v2683_v59 = vadd.f32 -1.0, %v2979_v31  ;;  %v2120_v38 = vld [vmem:[#allocation3 + $0x38] sm:$0xf0]  ;;  %v1972_v55 = vld [vmem:[#allocation3 + $0x30] sm:$0xf]  ;;  %v4004_v54 = vld [vmem:[%s4209_s2] sm:$0xff]  }
 0x7c0   :  { %v2858_v32 = vunpack.i.h.bf16 %v3957_v25  ;;  %v1860_v60 = vpop.permute.xlu0 %1859  ;;  %v2684_v1 = vadd.f32 -1.0, %v2981_v34  ;;  %v1571_v46 = vsel %vm1511_vm0, %v3886_v51, %v2682_v43  ;;  %v1980_v8 = vrot.slane %v1972_v55, 4  ;;  %v1968_v41 = vld [vmem:[#allocation3 + $0x40] sm:$0xf]  ;;  %v1966_v58 = vld [vmem:[#allocation3 + $0x30] sm:$0xf] }
 0x7c1   :  { %2048 = vrot.lane.b32.xlu0 %v2038_v11, %s2994_s29  ;;  %v1864_v35 = vsel %vm1861_vm14, %v3840_v2, %v1860_v60  ;;  %v1587_v2 = vmul.f32 %v1575_v10, %v3217_v6  ;;  %v1572_v9 = vsel %vm1512_vm1, %v3892_v3, %v2683_v59  ;;  %v1583_v26 = vmul.f32 %v1571_v46, %v3219_v49  ;;  %v1974_v49 = vld [vmem:[#allocation3 + $0x40] sm:$0xf]  ;;  %v2030_v61 = vld [vmem:[#allocation3 + $0x30] sm:$0xf0]  ;;  %v2032_v18 = vld [vmem:[#allocation3 + $0x40] sm:$0xf0] }
 0x7c2   :  { %2129 = vrot.lane.b32.xlu1 %v2120_v38, %s2994_s29  ;;  %v1694_v28 = vsel %vm85_vm3, %v3768_v36, %v2858_v32  ;;  %1870 = vst [vmem:[#allocation4 + $0x100] sm:$0xf] %v1864_v35  ;;  %2417 = vmatpush1.bf16.msra.mxu1 %v2368_v0  ;;  %v1573_v51 = vsel %vm1513_vm5, %v3895_v17, %v2684_v1  ;;  %1971 = vst [vmem:[#allocation4 + $0x28] sm:$0xf] %v1968_v41  ;;  %v1967_v17 = vld [vmem:[#allocation3 + $0x38] sm:$0xf] }
 0x7c3   :  { %1700 = vst [vmem:[#allocation4 + $0x70] sm:$0xf] %v1694_v28  ;;  %v3981_v21 = vpop.permute.xlu1 %2860  ;;  %v1584_v36 = vmul.f32 %v1572_v9, %v3217_v6  ;;  %v1585_v3 = vmul.f32 %v1573_v51, %v3237_v57  ;;  %v1596_v33 = vpack.c.bf16 %v1586_v40, %v1583_v26  ;;  %1969 = vst [vmem:[#allocation4 + $0x18] sm:$0xf] %v1966_v58  ;;  %v2121_v57 = vld [vmem:[#allocation3 + $0x40] sm:$0xf0] }
 0x7c4   :  { %v2863_v23 = vunpack.i.h.bf16 %v3981_v21  ;;  %1970 = vst [vmem:[#allocation4 + $0x20] sm:$0xf] %v1967_v17  ;;  %2033 = vst [vmem:[#allocation4 + $0x48] sm:$0xf0] %v2030_v61  ;;  %v1982_v14 = vrot.slane %v1974_v49, 4 }
 0x7c5   :  { %2127 = vrot.lane.b32.xlu0 %v2119_v42, %s2994_s29  ;;  %v1597_v45 = vpack.c.bf16 %v1587_v2, %v1584_v36  ;;  %v1598_v62 = vpack.c.bf16 %v1588_v12, %v1585_v3  ;;  %1602 = vst [vmem:[#allocation3 + $0x80] sm:$0xff] %v1596_v33  ;;  %v1973_v37 = vld [vmem:[#allocation3 + $0x38] sm:$0xf]  ;;  %2035 = vst [vmem:[#allocation4 + $0x58] sm:$0xf0] %v2032_v18  ;;  %2435 = vmatmul.mubr.bf16.vlgmr.msra.gmra.mrb[16].mxu1 %v4004_v54 }
 0x7c6   :  { %1984 = vrot.lane.b32.xlu1 %v1980_v8, %s2993_s24  ;;  %v1723_v6 = vsel %vm103_vm4, %v3791_v50, %v2863_v23  ;;  %v2031_v50 = vld [vmem:[#allocation3 + $0x38] sm:$0xf0]  ;;  %v1981_v5 = vrot.slane %v1973_v37, 4  ;;  %v2002_v53 = vld [vmem:[#allocation3 + $0x30] sm:$0xf0]  ;;  %2444 = vmatprep.mubr.bf16.mxu1 %v4011_v7 }
 0x7c7   :  { %1729 = vst [vmem:[#allocation4 + $0x70] sm:$0xf0] %v1723_v6  ;;  %v3994_v13 = vpop.permute.xlu1 %2865  ;;  %1603 = vst [vmem:[#allocation3 + $0x88] sm:$0xff] %v1597_v45  ;;  %v2003_v30 = vld [vmem:[#allocation3 + $0x38] sm:$0xf0]  ;;  %v2010_v10 = vrot.slane %v2002_v53, 4 }
 0x7c8   :  { %v2868_v15 = vunpack.i.h.bf16 %v3994_v13  ;;  %1604 = vst [vmem:[#allocation3 + $0x90] sm:$0xff] %v1598_v62  ;;  %2034 = vst [vmem:[#allocation4 + $0x50] sm:$0xf0] %v2031_v50  ;;  %v2011_v48 = vrot.slane %v2003_v30, 4  ;;  %v2062_v31 = vld [vmem:[#allocation3 + $0x38] sm:$0xf] }
 0x7c9   :  { %2131 = vrot.lane.b32.xlu0 %v2121_v57, %s2994_s29  ;;  %v2070_v0 = vrot.slane %v2062_v31, 4  ;;  %v2004_v32 = vld [vmem:[#allocation3 + $0x40] sm:$0xf0]  ;;  %v2091_v60 = vld [vmem:[#allocation3 + $0x38] sm:$0xf0] }
 0x7ca   :  { %1988 = vrot.lane.b32.xlu1 %v1982_v14, %s2993_s24  ;;  %v1753_v19 = vsel %vm1750_vm11, %v3798_v63, %v2868_v15  ;;  %v2012_v34 = vrot.slane %v2004_v32, 4  ;;  %v2061_v38 = vld [vmem:[#allocation3 + $0x30] sm:$0xf]  ;;  %v2099_v35 = vrot.slane %v2091_v60, 4  ;;  %v2063_v40 = vld [vmem:[#allocation3 + $0x40] sm:$0xf] }
 0x7cb   :  { %1759 = vst [vmem:[#allocation4 + $0xa0] sm:$0xf] %v1753_v19  ;;  %v4006_v44 = vpop.permute.xlu1 %2870  ;;  %v2071_v51 = vrot.slane %v2063_v40, 4  ;;  %v2092_v3 = vld [vmem:[#allocation3 + $0x40] sm:$0xf0] }
 0x7cc   :  { %v2873_v56 = vunpack.i.h.bf16 %v4006_v44  ;;  %v2252_v55 = vld [vmem:[#allocation3 + $0x80] sm:$0xf]  ;;  %v2228_v33 = vld [vmem:[#allocation3 + $0x80] sm:$0xf0]  ;;  %v2100_v49 = vrot.slane %v2092_v3, 4  ;;  %v2852_v3 = vunpack.i.l.bf16 %v3932_v27 }
 0x7cd   :  { %1986 = vrot.lane.b32.xlu0 %v1981_v5, %s2993_s24  ;;  %2255 = vst [vmem:[#allocation4 + $0x138] sm:$0xf] %v2252_v55  ;;  %v2145_v26 = vld [vmem:[#allocation3 + $0x80] sm:$0xf]  ;;  %v2288_v37 = vld [vmem:[#allocation3 + $0x80] sm:$0xf0] }
 0x7ce   :  { %2017 = vrot.lane.b32.xlu1 %v2011_v48, %s3002_s21  ;;  %v1778_v63 = vsel %vm85_vm3, %v3773_v16, %v2873_v56  ;;  %v2069_v16 = vrot.slane %v2061_v38, 4  ;;  %v2253_v46 = vld [vmem:[#allocation3 + $0x88] sm:$0xf]  ;;  %v2317_v9 = vld [vmem:[#allocation3 + $0x88] sm:$0xf0]  ;;  %v2296_v30 = vrot.slane %v2288_v37, 4 }
 0x7cf   :  { %1784 = vst [vmem:[#allocation4 + $0xa0] sm:$0xf0] %v1778_v63  ;;  %v1800_v43 = vpop.permute.xlu1 %1799  ;;  %v2254_v1 = vld [vmem:[#allocation3 + $0x90] sm:$0xf]  ;;  %2256 = vst [vmem:[#allocation4 + $0x140] sm:$0xf] %v2253_v46 }
 0x7d0   :  { %v1804_v11 = vsel %vm1801_vm12, %v3802_v29, %v1800_v43  ;;  %v2316_v29 = vld [vmem:[#allocation3 + $0x80] sm:$0xf0]  ;;  %2257 = vst [vmem:[#allocation4 + $0x148] sm:$0xf] %v2254_v1  ;;  %v2318_v2 = vld [vmem:[#allocation3 + $0x90] sm:$0xf0]  ;;  %v4074_v1 = vpop.permute.xlu0 %2299 }
 0x7d1   :  { %2015 = vrot.lane.b32.xlu0 %v2010_v10, %s3002_s21  ;;  %1810 = vst [vmem:[#allocation4 + $0xd0] sm:$0xf] %v1804_v11  ;;  %2319 = vst [vmem:[#allocation4 + $0x168] sm:$0xf0] %v2316_v29  ;;  %v2147_v8 = vld [vmem:[#allocation3 + $0x90] sm:$0xf] }
 0x7d2   :  { %2075 = vrot.lane.b32.xlu1 %v2070_v0, %s2995_s30  ;;  %2321 = vst [vmem:[#allocation4 + $0x178] sm:$0xf0] %v2318_v2  ;;  %2320 = vst [vmem:[#allocation4 + $0x170] sm:$0xf0] %v2317_v9  ;;  %v2230_v41 = vld [vmem:[#allocation3 + $0x90] sm:$0xf0]  ;;  %v2857_v2 = vunpack.i.l.bf16 %v3957_v25 }
 0x7d3   :  { %v4021_v59 = vpop.permute.xlu1 %2210  ;;  %v2171_v58 = vld [vmem:[#allocation3 + $0x88] sm:$0xf]  ;;  %v2229_v17 = vld [vmem:[#allocation3 + $0x88] sm:$0xf0]  ;;  %v2170_v62 = vld [vmem:[#allocation3 + $0x80] sm:$0xf] }
 0x7d4   :  { %v2146_v45 = vld [vmem:[#allocation3 + $0x88] sm:$0xf]  ;;  %v2179_v6 = vrot.slane %v2171_v58, 4  ;;  %v2178_v18 = vrot.slane %v2170_v62, 4  ;;  %v2172_v15 = vld [vmem:[#allocation3 + $0x90] sm:$0xf] }
 0x7d5   :  { %2019 = vrot.lane.b32.xlu0 %v2012_v34, %s3002_s21  ;;  %v2259_v57 = vld [vmem:[#allocation3 + $0x88] sm:$0xf]  ;;  %v2180_v50 = vrot.slane %v2172_v15, 4  ;;  %v2199_v19 = vld [vmem:[#allocation3 + $0x80] sm:$0xf0]  ;;  %v4055_v0 = vld [vmem:[%s4209_s2 + $0x8] sm:$0xff]  }
 0x7d6   :  { %2104 = vrot.lane.b32.xlu1 %v2099_v35, %s3003_s22  ;;  %v2267_v14 = vrot.slane %v2259_v57, 4  ;;  %v2290_v5 = vld [vmem:[#allocation3 + $0x90] sm:$0xf0]  ;;  %v2207_v48 = vrot.slane %v2199_v19, 4  ;;  %v2258_v63 = vld [vmem:[#allocation3 + $0x80] sm:$0xf]  ;;  %2445 = vmatmul.mubr.bf16.gmra.mrb[20].mxu1 %v4055_v0 }
 0x7d7   :  { %v1886_v4 = vpop.permute.xlu1 %1885  ;;  %v2298_v56 = vrot.slane %v2290_v5, 4  ;;  %v2201_v53 = vld [vmem:[#allocation3 + $0x90] sm:$0xf0]  ;;  %v2266_v10 = vrot.slane %v2258_v63, 4  ;;  %v2260_v43 = vld [vmem:[#allocation3 + $0x90] sm:$0xf]  ;;  %2540 = vmatprep.mubr.bf16.mxu1 %v4011_v7  ;;  %v2862_v63 = vunpack.i.l.bf16 %v3981_v21 }
 0x7d8   :  { %v1889_v28 = vsel %vm1801_vm12, %v3849_v24, %v1886_v4  ;;  %v2090_v24 = vld [vmem:[#allocation3 + $0x30] sm:$0xf0]  ;;  %v2209_v31 = vrot.slane %v2201_v53, 4  ;;  %v2268_v11 = vrot.slane %v2260_v43, 4  ;;  %v2289_v32 = vld [vmem:[#allocation3 + $0x88] sm:$0xf0] }
 0x7d9   :  { %2073 = vrot.lane.b32.xlu0 %v2069_v16, %s2995_s30  ;;  %1895 = vst [vmem:[#allocation4 + $0x100] sm:$0xf0] %v1889_v28  ;;  %v2098_v12 = vrot.slane %v2090_v24, 4  ;;  %v2297_v60 = vrot.slane %v2289_v32, 4  ;;  %v1934_v34 = vld [vmem:[#allocation3 + $0x68] sm:$0xf0] }
 0x7da   :  { %2154 = vrot.lane.b32.xlu1 %v2145_v26, %s3004_s23  ;;  %v1942_v38 = vrot.slane %v1934_v34, 4  ;;  %v3007_v35 = vmov 3   ;;  %v2988_v16 = vld [vmem:[%s4206_s3 + $0x8] sm:$0xff]  ;;  %v2989_v55 = vld [vmem:[%s4206_s3] sm:$0xff]  ;;  %v2990_v4 = vld [vmem:[%s4206_s3 + $0x10] sm:$0xff] }
 0x7db   :  { %v4029_v36 = vpop.permute.xlu1 %2880  ;;  %2885 = vset.pattern.permute.xlu0 %v3007_v35  ;;  %2884 = vset.pattern.permute.xlu1 %v3007_v35  ;;  %v2991_v29 = vld [vmem:[%s4206_s3 + $0x18] sm:$0xff] }
 0x7dc   :  { %v2883_v42 = vunpack.i.h.bf16 %v4029_v36 }
 0x7dd   :  { %2077 = vrot.lane.b32.xlu0 %v2071_v51, %s2995_s30 }
 0x7de   :  { %2158 = vrot.lane.b32.xlu1 %v2147_v8, %s3004_s23  ;;  %v1924_v23 = vsel %vm49_vm2, %v3905_v20, %v2883_v42  ;;  %v2200_v20 = vld [vmem:[#allocation3 + $0x88] sm:$0xf0] }
 0x7df   :  { %1930 = vst [vmem:[#allocation4 + $0x130] sm:$0xf0] %v1924_v23  ;;  %v2208_v61 = vrot.slane %v2200_v20, 4 }
 0x7e1   :  { %2102 = vrot.lane.b32.xlu0 %v2098_v12, %s3003_s22  ;;  %v2872_v12 = vunpack.i.l.bf16 %v4006_v44 }
 0x7e2   :  { %2237 = vrot.lane.b32.xlu1 %v2228_v33, %s3004_s23 }
 0x7e5   :  { %2106 = vrot.lane.b32.xlu0 %v2100_v49, %s3003_s22 }
 0x7e6   :  { %2241 = vrot.lane.b32.xlu1 %v2230_v41, %s3004_s23 }
 0x7e9   :  { %2156 = vrot.lane.b32.xlu0 %v2146_v45, %s3004_s23 }
 0x7ea   :  { %2185 = vrot.lane.b32.xlu1 %v2179_v6, %s3005_s25 }
 0x7ed   :  { %2239 = vrot.lane.b32.xlu0 %v2229_v17, %s3004_s23 }
 0x7ee   :  { %2214 = vrot.lane.b32.xlu1 %v2208_v61, %s3006_s26 }
 0x7f1   :  { %2183 = vrot.lane.b32.xlu0 %v2178_v18, %s3005_s25 }
 0x7f2   :  { %2272 = vrot.lane.b32.xlu1 %v2267_v14, %s2993_s24 }
 0x7f5   :  { %2187 = vrot.lane.b32.xlu0 %v2180_v50, %s3005_s25 }
 0x7f6   :  { %2301 = vrot.lane.b32.xlu1 %v2296_v30, %s3002_s21  ;;  %v2328_v30 = vld [vmem:[#allocation4 + $0x10] sm:$0xff] }
 0x7f9   :  { %2212 = vrot.lane.b32.xlu0 %v2207_v48, %s3006_s26 }
 0x7fa   :  { %2305 = vrot.lane.b32.xlu1 %v2298_v56, %s3002_s21 }
 0x7fd   :  { %2216 = vrot.lane.b32.xlu0 %v2209_v31, %s3006_s26  ;;  %v2334_v31 = vld [vmem:[#allocation4 + $0x40] sm:$0xff] }
 0x7fe   :  { %2375 = vperm.xlu1 %2884, %v2989_v55  }
 0x801   :  { %2270 = vrot.lane.b32.xlu0 %v2266_v10, %s2993_s24 }
 0x802   :  { %2383 = vperm.xlu1 %2884, %v2990_v4  }
 0x805   :  { %2274 = vrot.lane.b32.xlu0 %v2268_v11, %s2993_s24 }
 0x806   :  { %2387 = vperm.xlu1 %2884, %v2991_v29   ;;  %v2340_v29 = vld [vmem:[#allocation4 + $0x70] sm:$0xff] }
 0x809   :  { %2303 = vrot.lane.b32.xlu0 %v2297_v60, %s3002_s21 }
 0x80d   :  { %1949 = vrot.lane.b32.xlu0 %v1942_v38, %s3002_s21  ;;  %v2878_v38 = vunpack.i.h.bf16 %v3944_v52 }
 0x811   :  { %2379 = vperm.xlu0 %2885, %v2988_v16  }
 0x82f   :  { %v2045_v46 = vpop.permute.xlu0 %2044 }
 0x830   :  { %v2047_v28 = vpop.permute.xlu1 %2046 }
 0x831   :  { %v2052_v40 = vsel %vm85_vm3, %v2045_v46, %v2047_v28  ;;  %v2867_v46 = vunpack.i.l.bf16 %v3994_v13 }
 0x832   :  { %2058 = vst [vmem:[#allocation4 + $0x78] sm:$0xf] %v2052_v40 }
 0x833   :  { %v2049_v9 = vpop.permute.xlu0 %2048 }
 0x834   :  { %v2053_v26 = vsel %vm85_vm3, %v2047_v28, %v2049_v9  ;;  %v2054_v51 = vsel %vm85_vm3, %v2049_v9, %v2857_v2  ;;  %v2130_v42 = vpop.permute.xlu1 %2129 }
 0x835   :  { %2059 = vst [vmem:[#allocation4 + $0x80] sm:$0xf] %v2053_v26  ;;  %2060 = vst [vmem:[#allocation4 + $0x88] sm:$0xf] %v2054_v51 }
 0x837   :  { %v2128_v24 = vpop.permute.xlu0 %2127 }
 0x838   :  { %v2135_v8 = vsel %vm85_vm3, %v2128_v24, %v2130_v42  ;;  %v1985_v23 = vpop.permute.xlu1 %1984 }
 0x839   :  { %2141 = vst [vmem:[#allocation4 + $0xa8] sm:$0xf0] %v2135_v8 }
 0x83b   :  { %v2132_v33 = vpop.permute.xlu0 %2131 }
 0x83c   :  { %v2136_v25 = vsel %vm85_vm3, %v2130_v42, %v2132_v33  ;;  %v2137_v49 = vsel %vm85_vm3, %v2132_v33, %v2872_v12  ;;  %v1989_v41 = vpop.permute.xlu1 %1988 }
 0x83d   :  { %2142 = vst [vmem:[#allocation4 + $0xb0] sm:$0xf0] %v2136_v25  ;;  %2143 = vst [vmem:[#allocation4 + $0xb8] sm:$0xf0] %v2137_v49  ;;  %v1994_v58 = vsel %vm49_vm2, %v1989_v41, %v2852_v3 }
 0x83e   :  { %2000 = vst [vmem:[#allocation4 + $0x28] sm:$0xf0] %v1994_v58  ;;  %v2848_v58 = vunpack.i.h.bf16 %v3809_v22 }
 0x83f   :  { %v1987_v45 = vpop.permute.xlu0 %1986 }
 0x840   :  { %v1992_v6 = vsel %vm49_vm2, %v1985_v23, %v1987_v45  ;;  %v1993_v20 = vsel %vm49_vm2, %v1987_v45, %v1989_v41  ;;  %v2018_v17 = vpop.permute.xlu1 %2017  ;;  %v2346_v23 = vld [vmem:[#allocation4 + $0xa0] sm:$0xff] }
 0x841   :  { %1998 = vst [vmem:[#allocation4 + $0x18] sm:$0xf0] %v1992_v6  ;;  %1999 = vst [vmem:[#allocation4 + $0x20] sm:$0xf0] %v1993_v20 }
 0x843   :  { %v2016_v27 = vpop.permute.xlu0 %2015 }
 0x844   :  { %v2021_v44 = vsel %vm1660_vm10, %v3940_v47, %v2016_v27  ;;  %v2022_v61 = vsel %vm1660_vm10, %v2016_v27, %v2018_v17  ;;  %v2076_v62 = vpop.permute.xlu1 %2075  ;;  %v2877_v47 = vunpack.i.l.bf16 %v3944_v52 }
 0x845   :  { %2027 = vst [vmem:[#allocation4 + $0x48] sm:$0xf] %v2021_v44  ;;  %2028 = vst [vmem:[#allocation4 + $0x50] sm:$0xf] %v2022_v61  ;;  %v2331_v57 = vld [vmem:[#allocation4 + $0x28] sm:$0xff] }
 0x846   :  { %2508 = vmatprep.subr.bf16.mxu1 %v2331_v57 }
 0x847   :  { %v2020_v18 = vpop.permute.xlu0 %2019 }
 0x848   :  { %v2023_v14 = vsel %vm1660_vm10, %v2018_v17, %v2020_v18  ;;  %v2105_v15 = vpop.permute.xlu1 %2104  ;;  %v2329_v37 = vld [vmem:[#allocation4 + $0x18] sm:$0xff]  ;;  %v2330_v50 = vld [vmem:[#allocation4 + $0x20] sm:$0xff] }
 0x849   :  { %2029 = vst [vmem:[#allocation4 + $0x58] sm:$0xf] %v2023_v14  ;;  %2455 = vmatprep.subr.bf16.mxu0 %v2329_v37  ;;  %2509 = vmatpush1.bf16.msra.mxu1 %v2330_v50 }
 0x84a   :  { %2456 = vmatpush1.bf16.msra.mxu0 %v2328_v30 }
 0x84b   :  { %v2074_v19 = vpop.permute.xlu0 %2073 }
 0x84c   :  { %v2081_v5 = vsel %vm103_vm4, %v2074_v19, %v2076_v62  ;;  %v2155_v48 = vpop.permute.xlu1 %2154  ;;  %v2335_v56 = vld [vmem:[#allocation4 + $0x48] sm:$0xff]  ;;  %v2336_v34 = vld [vmem:[#allocation4 + $0x50] sm:$0xff] }
 0x84d   :  { %2087 = vst [vmem:[#allocation4 + $0x78] sm:$0xf0] %v2081_v5  ;;  %v2160_v53 = vsel %vm1801_vm12, %v2877_v47, %v2155_v48  ;;  %2457 = vmatprep.subr.bf16.mxu0 %v2335_v56  ;;  %v2358_v5 = vld [vmem:[#allocation4 + $0x100] sm:$0xff] }
 0x84e   :  { %2166 = vst [vmem:[#allocation4 + $0xd8] sm:$0xf] %v2160_v53  ;;  %2458 = vmatpush1.bf16.msra.mxu0 %v2334_v31 }
 0x84f   :  { %v2078_v10 = vpop.permute.xlu0 %2077 }
 0x850   :  { %v2082_v43 = vsel %vm103_vm4, %v2076_v62, %v2078_v10  ;;  %v2083_v11 = vsel %vm103_vm4, %v2078_v10, %v2862_v63  ;;  %v2159_v32 = vpop.permute.xlu1 %2158  ;;  %v2337_v60 = vld [vmem:[#allocation4 + $0x58] sm:$0xff] }
 0x851   :  { %2088 = vst [vmem:[#allocation4 + $0x80] sm:$0xf0] %v2082_v43  ;;  %2089 = vst [vmem:[#allocation4 + $0x88] sm:$0xf0] %v2083_v11  ;;  %2510 = vmatprep.subr.bf16.mxu1 %v2337_v60 }
 0x852   :  { %2511 = vmatpush1.bf16.msra.mxu1 %v2336_v34 }
 0x853   :  { %v2103_v35 = vpop.permute.xlu0 %2102 }
 0x854   :  { %v2110_v16 = vsel %vm1750_vm11, %v2103_v35, %v2105_v15  ;;  %v2238_v21 = vpop.permute.xlu1 %2237  ;;  %v2341_v55 = vld [vmem:[#allocation4 + $0x78] sm:$0xff] }
 0x855   :  { %2116 = vst [vmem:[#allocation4 + $0xa8] sm:$0xf] %v2110_v16  ;;  %v2243_v4 = vsel %vm1801_vm12, %v2878_v38, %v2238_v21  ;;  %2459 = vmatprep.subr.bf16.mxu0 %v2341_v55 }
 0x856   :  { %2249 = vst [vmem:[#allocation4 + $0x108] sm:$0xf0] %v2243_v4  ;;  %2460 = vmatpush1.bf16.msra.mxu0 %v2340_v29 }
 0x857   :  { %v2107_v28 = vpop.permute.xlu0 %2106 }
 0x858   :  { %v2111_v40 = vsel %vm1750_vm11, %v2105_v15, %v2107_v28  ;;  %v2112_v2 = vsel %vm1750_vm11, %v2107_v28, %v2867_v46  ;;  %v2242_v52 = vpop.permute.xlu1 %2241  ;;  %v2343_v9 = vld [vmem:[#allocation4 + $0x88] sm:$0xff]  ;;  %v2342_v26 = vld [vmem:[#allocation4 + $0x80] sm:$0xff]  ;;  %v2352_v15 = vld [vmem:[#allocation4 + $0xd0] sm:$0xff] }
 0x859   :  { %2117 = vst [vmem:[#allocation4 + $0xb0] sm:$0xf] %v2111_v40  ;;  %2118 = vst [vmem:[#allocation4 + $0xb8] sm:$0xf] %v2112_v2  ;;  %2512 = vmatprep.subr.bf16.mxu1 %v2343_v9 }
 0x85a   :  { %2513 = vmatpush1.bf16.msra.mxu1 %v2342_v26 }
 0x85b   :  { %v2157_v51 = vpop.permute.xlu0 %2156 }
 0x85c   :  { %v2161_v42 = vsel %vm1801_vm12, %v2155_v48, %v2157_v51  ;;  %v2162_v24 = vsel %vm1801_vm12, %v2157_v51, %v2159_v32  ;;  %v2186_v13 = vpop.permute.xlu1 %2185  ;;  %v2347_v8 = vld [vmem:[#allocation4 + $0xa8] sm:$0xff]  ;;  %v2882_v48 = vunpack.i.l.bf16 %v4029_v36  ;;  %v2364_v36 = vld [vmem:[#allocation4 + $0x130] sm:$0xff] }
 0x85d   :  { %2167 = vst [vmem:[#allocation4 + $0xe0] sm:$0xf] %v2161_v42  ;;  %2168 = vst [vmem:[#allocation4 + $0xe8] sm:$0xf] %v2162_v24  ;;  %2461 = vmatprep.subr.bf16.mxu0 %v2347_v8 }
 0x85e   :  { %2462 = vmatpush1.bf16.msra.mxu0 %v2346_v23 }
 0x85f   :  { %v2240_v12 = vpop.permute.xlu0 %2239 }
 0x860   :  { %v2244_v3 = vsel %vm1801_vm12, %v2238_v21, %v2240_v12  ;;  %v2245_v33 = vsel %vm1801_vm12, %v2240_v12, %v2242_v52  ;;  %v2215_v25 = vpop.permute.xlu1 %2214  ;;  %v2349_v49 = vld [vmem:[#allocation4 + $0xb8] sm:$0xff]  ;;  %v2348_v41 = vld [vmem:[#allocation4 + $0xb0] sm:$0xff] }
 0x861   :  { %2250 = vst [vmem:[#allocation4 + $0x110] sm:$0xf0] %v2244_v3  ;;  %2251 = vst [vmem:[#allocation4 + $0x118] sm:$0xf0] %v2245_v33  ;;  %2514 = vmatprep.subr.bf16.mxu1 %v2349_v49 }
 0x862   :  { %2515 = vmatpush1.bf16.msra.mxu1 %v2348_v41 }
 0x863   :  { %v2184_v45 = vpop.permute.xlu0 %2183 }
 0x864   :  { %v2189_v6 = vsel %vm1831_vm13, %v2848_v58, %v2184_v45  ;;  %v2190_v20 = vsel %vm1831_vm13, %v2184_v45, %v2186_v13  ;;  %v2273_v17 = vpop.permute.xlu1 %2272 }
 0x865   :  { %2195 = vst [vmem:[#allocation4 + $0xd8] sm:$0xf0] %v2189_v6  ;;  %2196 = vst [vmem:[#allocation4 + $0xe0] sm:$0xf0] %v2190_v20 }
 0x867   :  { %v2188_v27 = vpop.permute.xlu0 %2187 }
 0x868   :  { %v2191_v44 = vsel %vm1831_vm13, %v2186_v13, %v2188_v27  ;;  %v2302_v61 = vpop.permute.xlu1 %2301 }
 0x869   :  { %2197 = vst [vmem:[#allocation4 + $0xe8] sm:$0xf0] %v2191_v44  ;;  %v2307_v62 = vsel %vm1660_vm10, %v4074_v1, %v2302_v61 }
 0x86a   :  { %2313 = vst [vmem:[#allocation4 + $0x168] sm:$0xf] %v2307_v62 }
 0x86b   :  { %v2213_v57 = vpop.permute.xlu0 %2212 }
 0x86c   :  { %v2218_v22 = vsel %vm1861_vm14, %v4021_v59, %v2213_v57  ;;  %v2219_v18 = vsel %vm1861_vm14, %v2213_v57, %v2215_v25  ;;  %v2353_v14 = vld [vmem:[#allocation4 + $0xd8] sm:$0xff]  ;;  %v2354_v1 = vld [vmem:[#allocation4 + $0xe0] sm:$0xff]  ;;  %v2306_v43 = vpop.permute.xlu1 %2305 }
 0x86d   :  { %2224 = vst [vmem:[#allocation4 + $0x108] sm:$0xf] %v2218_v22  ;;  %2225 = vst [vmem:[#allocation4 + $0x110] sm:$0xf] %v2219_v18  ;;  %2463 = vmatprep.subr.bf16.mxu0 %v2353_v14 }
 0x86e   :  { %2464 = vmatpush1.bf16.msra.mxu0 %v2352_v15 }
 0x86f   :  { %v2217_v37 = vpop.permute.xlu0 %2216 }
 0x870   :  { %v2220_v50 = vsel %vm1861_vm14, %v2215_v25, %v2217_v37  ;;  %v2355_v30 = vld [vmem:[#allocation4 + $0xe8] sm:$0xff] }
 0x871   :  { %2226 = vst [vmem:[#allocation4 + $0x118] sm:$0xf] %v2220_v50  ;;  %2516 = vmatprep.subr.bf16.mxu1 %v2355_v30  ;;  %v2371_v38 = vld [vmem:[#allocation4 + $0x168] sm:$0xff] }
 0x872   :  { %2517 = vmatpush1.bf16.msra.mxu1 %v2354_v1 }
 0x873   :  { %v2271_v47 = vpop.permute.xlu0 %2270 }
 0x874   :  { %v2278_v19 = vsel %vm49_vm2, %v2271_v47, %v2273_v17  ;;  %v2359_v59 = vld [vmem:[#allocation4 + $0x108] sm:$0xff]  ;;  %v2360_v10 = vld [vmem:[#allocation4 + $0x110] sm:$0xff] }
 0x875   :  { %2284 = vst [vmem:[#allocation4 + $0x138] sm:$0xf0] %v2278_v19  ;;  %2465 = vmatprep.subr.bf16.mxu0 %v2359_v59 }
 0x876   :  { %2466 = vmatpush1.bf16.msra.mxu0 %v2358_v5 }
 0x877   :  { %v2275_v56 = vpop.permute.xlu0 %2274 }
 0x878   :  { %v2279_v53 = vsel %vm49_vm2, %v2273_v17, %v2275_v56  ;;  %v2280_v31 = vsel %vm49_vm2, %v2275_v56, %v2882_v48  ;;  %v2361_v63 = vld [vmem:[#allocation4 + $0x118] sm:$0xff] }
 0x879   :  { %2285 = vst [vmem:[#allocation4 + $0x140] sm:$0xf0] %v2279_v53  ;;  %2286 = vst [vmem:[#allocation4 + $0x148] sm:$0xf0] %v2280_v31  ;;  %2518 = vmatprep.subr.bf16.mxu1 %v2361_v63 }
 0x87a   :  { %2519 = vmatpush1.bf16.msra.mxu1 %v2360_v10 }
 0x87b   :  { %v2304_v11 = vpop.permute.xlu0 %2303 }
 0x87c   :  { %v2308_v32 = vsel %vm1660_vm10, %v2302_v61, %v2304_v11  ;;  %v2309_v60 = vsel %vm1660_vm10, %v2304_v11, %v2306_v43  ;;  %v2365_v34 = vld [vmem:[#allocation4 + $0x138] sm:$0xff] }
 0x87d   :  { %2314 = vst [vmem:[#allocation4 + $0x170] sm:$0xf] %v2308_v32  ;;  %2315 = vst [vmem:[#allocation4 + $0x178] sm:$0xf] %v2309_v60  ;;  %2467 = vmatprep.subr.bf16.mxu0 %v2365_v34 }
 0x87e   :  { %2468 = vmatpush1.bf16.msra.mxu0 %v2364_v36 }
 0x87f   :  { %v1950_v35 = vpop.permute.xlu0 %1949  ;;  %2469 = vmatprep.subr.bf16.mxu0 %v2371_v38 }
 0x880   :  { %v1953_v16 = vsel %vm1660_vm10, %v3911_v39, %v1950_v35  ;;  %v2367_v21 = vld [vmem:[#allocation4 + $0x148] sm:$0xff]  ;;  %v2366_v55 = vld [vmem:[#allocation4 + $0x140] sm:$0xff]  ;;  %v2376_v39 = vpop.permute.xlu1 %2375 }
 0x881   :  { %1959 = vst [vmem:[#allocation4 + $0x160] sm:$0xf] %v1953_v16  ;;  %2520 = vmatprep.subr.bf16.mxu1 %v2367_v21 }
 0x882   :  { %2521 = vmatpush1.bf16.msra.mxu1 %v2366_v55 }
 0x884   :  { %v2373_v4 = vld [vmem:[#allocation4 + $0x178] sm:$0xff]  ;;  %v2372_v29 = vld [vmem:[#allocation4 + $0x170] sm:$0xff] }
 0x885   :  { %2522 = vmatprep.subr.bf16.mxu1 %v2373_v4 }
 0x886   :  { %2523 = vmatpush1.bf16.msra.mxu1 %v2372_v29 }
 0x888   :  { %v2370_v46 = vld [vmem:[#allocation4 + $0x160] sm:$0xff] }
 0x889   :  { %2470 = vmatpush1.bf16.msra.mxu0 %v2370_v46  ;;  %2541 = vmatmul.mubr.bf16.vlgmr.msra.gmra.mrb[24].mxu1 %v4004_v54 }
 0x88a   :  { %2550 = vmatprep.mubr.bf16.mxu1 %v4011_v7 }
 0x88c   :  { %2488 = vmatmul.mubr.bf16.vlgmr.msra.gmra.mrb[24].mxu0 %v4004_v54 }
 0x88d   :  { %2497 = vmatprep.mubr.bf16.mxu0 %v4011_v7  ;;  %v2384_v7 = vpop.permute.xlu1 %2383 }
 0x890   :  { %v2380_v40 = vpop.permute.xlu0 %2379 }
 0x891   :  { %2551 = vmatmul.mubr.bf16.gmra.mrb[28].mxu1 %v4055_v0  ;;  %v2388_v24 = vpop.permute.xlu1 %2387 }
 0x894   :  { %2498 = vmatmul.mubr.bf16.gmra.mrb[28].mxu0 %v4055_v0 }
 0x898   :  { %v2436_v28 = vpop.f32.mrb[16].mxu1 }
 0x899   :  { %v2438_v2 = vpop.f32.mrb[17].mxu1  ;;  %v2437_v52 = vadd.f32 %v2436_v28, %v2376_v39 }
 0x89a   :  { %v2440_v9 = vpop.f32.mrb[18].mxu1  ;;  %v2439_v26 = vadd.f32 %v2438_v2, %v2376_v39 }
 0x89b   :  { %v2441_v51 = vadd.f32 %v2440_v9, %v2380_v40  ;;  %2561 = vst [vmem:[%s4210_s6] sm:$0xff] %v2437_v52  ;;  %v2442_v42 = vpop.f32.mrb[19].mxu1 }
 0x89c   :  { %2562 = vst [vmem:[%s4210_s6 + $0x8] sm:$0xff] %v2439_v26  ;;  %v2443_v54 = vadd.f32 %v2442_v42, %v2380_v40 }
 0x89d   :  { %2567 = vst [vmem:[%s4210_s6 + $0x30] sm:$0xff] %v2441_v51 }
 0x89e   :  { %2568 = vst [vmem:[%s4210_s6 + $0x38] sm:$0xff] %v2443_v54 }
 0x8a9   :  { %v2446_v0 = vpop.f32.mrb[20].mxu1 }
 0x8aa   :  { %v2447_v13 = vadd.f32 %v2446_v0, %v2384_v7  ;;  %v2448_v8 = vpop.f32.mrb[21].mxu1 }
 0x8ab   :  { %v2449_v23 = vadd.f32 %v2448_v8, %v2384_v7  ;;  %v2450_v12 = vpop.f32.mrb[22].mxu1 }
 0x8ac   :  { %2573 = vst [vmem:[%s4210_s6 + $0x60] sm:$0xff] %v2447_v13  ;;  %v2451_v3 = vadd.f32 %v2450_v12, %v2388_v24  ;;  %v2452_v33 = vpop.f32.mrb[23].mxu1 }
 0x8ad   :  { %2574 = vst [vmem:[%s4210_s6 + $0x68] sm:$0xff] %v2449_v23  ;;  %v2453_v25 = vadd.f32 %v2452_v33, %v2388_v24 }
 0x8ae   :  { %2579 = vst [vmem:[%s4210_s6 + $0x90] sm:$0xff] %v2451_v3 }
 0x8af   :  { %2580 = vst [vmem:[%s4210_s6 + $0x98] sm:$0xff] %v2453_v25 }
 0x95c   :  { %v2542_v49 = vpop.f32.mrb[24].mxu1 }
 0x95d   :  { %v2543_v41 = vadd.f32 %v2542_v49, %v2376_v39  ;;  %v2544_v58 = vpop.f32.mrb[25].mxu1 }
 0x95e   :  { %v2545_v45 = vadd.f32 %v2544_v58, %v2376_v39  ;;  %v2546_v6 = vpop.f32.mrb[26].mxu1 }
 0x95f   :  { %2565 = vst [vmem:[%s4210_s6 + $0x20] sm:$0xff] %v2543_v41  ;;  %v2489_v20 = vpop.f32.mrb[24].mxu0  ;;  %v2547_v17 = vadd.f32 %v2546_v6, %v2380_v40  ;;  %v2548_v27 = vpop.f32.mrb[27].mxu1 }
 0x960   :  { %2566 = vst [vmem:[%s4210_s6 + $0x28] sm:$0xff] %v2545_v45  ;;  %v2490_v44 = vadd.f32 %v2489_v20, %v2376_v39  ;;  %v2491_v61 = vpop.f32.mrb[25].mxu0  ;;  %v2549_v62 = vadd.f32 %v2548_v27, %v2380_v40 }
 0x961   :  { %2571 = vst [vmem:[%s4210_s6 + $0x50] sm:$0xff] %v2547_v17  ;;  %v2492_v57 = vadd.f32 %v2491_v61, %v2376_v39  ;;  %v2493_v22 = vpop.f32.mrb[26].mxu0 }
 0x962   :  { %2563 = vst [vmem:[%s4210_s6 + $0x10] sm:$0xff] %v2490_v44  ;;  %2572 = vst [vmem:[%s4210_s6 + $0x58] sm:$0xff] %v2549_v62  ;;  %v2494_v18 = vadd.f32 %v2493_v22, %v2380_v40  ;;  %v2495_v14 = vpop.f32.mrb[27].mxu0 }
 0x963   :  { %2564 = vst [vmem:[%s4210_s6 + $0x18] sm:$0xff] %v2492_v57  ;;  %v2496_v15 = vadd.f32 %v2495_v14, %v2380_v40 }
 0x964   :  { %2569 = vst [vmem:[%s4210_s6 + $0x40] sm:$0xff] %v2494_v18  ;;  %v2552_v37 = vpop.f32.mrb[28].mxu1 }
 0x965   :  { %2570 = vst [vmem:[%s4210_s6 + $0x48] sm:$0xff] %v2496_v15  ;;  %v2553_v50 = vadd.f32 %v2552_v37, %v2384_v7  ;;  %v2554_v30 = vpop.f32.mrb[29].mxu1 }
 0x966   :  { %v2555_v1 = vadd.f32 %v2554_v30, %v2384_v7  ;;  %v2556_v47 = vpop.f32.mrb[30].mxu1 }
 0x967   :  { %2577 = vst [vmem:[%s4210_s6 + $0x80] sm:$0xff] %v2553_v50  ;;  %v2557_v19 = vadd.f32 %v2556_v47, %v2388_v24  ;;  %v2499_v59 = vpop.f32.mrb[28].mxu0  ;;  %v2558_v5 = vpop.f32.mrb[31].mxu1 }
 0x968   :  { %2578 = vst [vmem:[%s4210_s6 + $0x88] sm:$0xff] %v2555_v1  ;;  %v2500_v48 = vadd.f32 %v2499_v59, %v2384_v7  ;;  %v2559_v56 = vadd.f32 %v2558_v5, %v2388_v24  ;;  %v2501_v53 = vpop.f32.mrb[29].mxu0 }
 0x969   :  { %2583 = vst [vmem:[%s4210_s6 + $0xb0] sm:$0xff] %v2557_v19  ;;  %v2502_v31 = vadd.f32 %v2501_v53, %v2384_v7  ;;  %v2503_v63 = vpop.f32.mrb[30].mxu0 }
 0x96a   :  { %2575 = vst [vmem:[%s4210_s6 + $0x70] sm:$0xff] %v2500_v48  ;;  %2584 = vst [vmem:[%s4210_s6 + $0xb8] sm:$0xff] %v2559_v56  ;;  %v2504_v10 = vadd.f32 %v2503_v63, %v2388_v24  ;;  %v2505_v43 = vpop.f32.mrb[31].mxu0 }
 0x96b   :  { %2576 = vst [vmem:[%s4210_s6 + $0x78] sm:$0xff] %v2502_v31  ;;  %v2506_v11 = vadd.f32 %v2505_v43, %v2388_v24 }
 0x96c   :  { %2581 = vst [vmem:[%s4210_s6 + $0xa0] sm:$0xff] %v2504_v10 }
 0x96d   :  { %2582 = vst [vmem:[%s4210_s6 + $0xa8] sm:$0xff] %v2506_v11 }

</bundles_post_ra>
